<compile_context>
chip_gen: v7x
topology: tpu7x:2x2x1
jax: 0.10.0
libtpu: 0.0.40
codegen_flags: <defaults>
</compile_context>

<pallas_src>
import jax
import jax.numpy as jnp
from jax import lax
from jax.experimental import pallas as pl
from jax.experimental.pallas import tpu as pltpu

BN_EPS = 1e-5


# ----------------------------- Pallas kernel --------------------------------
def _double_conv_kernel(x_ref, w1_ref, b1_ref, w2_ref, b2_ref, o_ref,
                        xp_ref, y1p_ref):
    # x_ref:   (1, H, W, Cin)      bf16  NHWC input (one image, unpadded)
    # w1_ref:  (9*Cin, Cout)       bf16  conv1 weights, BN1 scale folded in
    # b1_ref:  (1, Cout)           f32   folded BN1 bias
    # w2_ref:  (9*Cout, Cout)      bf16  conv2 weights, BN2 scale folded in
    # b2_ref:  (1, Cout)           f32   folded BN2 bias
    # o_ref:   (1, H*W, Cout)      f32   output block
    # xp_ref:  (H+2, W+2, Cin)     bf16  VMEM scratch: zero-haloed input
    # y1p_ref: (H+2, W+2, Cout)    bf16  VMEM scratch: zero-haloed conv1 out
    h, w, cin = x_ref.shape[1], x_ref.shape[2], x_ref.shape[3]
    cout = w1_ref.shape[1]

    def conv3x3_bn_relu(pad_ref, c, w_ref, b_ref):
        # In-kernel im2col: 9 static tap slices of the zero-haloed tile,
        # lane-axis concat, layout-preserving leading-dim collapse, then one
        # MXU matmul with K = 9*c and f32 accumulation.
        taps = [pad_ref[kh:kh + h, kw:kw + w, :]
                for kh in range(3) for kw in range(3)]
        patches = jnp.concatenate(taps, axis=-1).reshape(h * w, 9 * c)
        acc = jnp.dot(patches, w_ref[...], preferred_element_type=jnp.float32)
        return jnp.maximum(acc + b_ref[...], 0.0)         # (h*w, cout) f32

    # ---- stage zero-padded input in VMEM (conv padding=1) -------------------
    xp_ref[...] = jnp.zeros_like(xp_ref)
    xp_ref[1:h + 1, 1:w + 1, :] = x_ref[0]

    # ---- conv1 (+ folded BN1) -> bias -> ReLU --------------------------------
    y1 = conv3x3_bn_relu(xp_ref, cin, w1_ref, b1_ref)      # (h*w, cout) f32

    # ---- stage intermediate (with zero halo) in VMEM -------------------------
    y1p_ref[...] = jnp.zeros_like(y1p_ref)
    y1p_ref[1:h + 1, 1:w + 1, :] = (
        y1.reshape(h, w, cout).astype(y1p_ref.dtype))

    # ---- conv2 (+ folded BN2) -> bias -> ReLU --------------------------------
    y2 = conv3x3_bn_relu(y1p_ref, cout, w2_ref, b2_ref)     # (h*w, cout) f32
    o_ref[0] = y2.astype(o_ref.dtype)


# ------------------------------ glue helpers ---------------------------------
def _fold_bn(gamma, beta, mean, var):
    scale = gamma / jnp.sqrt(var + BN_EPS)
    return scale, beta - mean * scale


def _fold_weight(w_oihw, scale):
    # OIHW -> (kh, kw, Cin, Cout) -> (9*Cin, Cout); fold BN scale per Cout.
    cout, cin = w_oihw.shape[0], w_oihw.shape[1]
    w_mat = jnp.transpose(w_oihw, (2, 3, 1, 0)).reshape(9 * cin, cout)
    return (w_mat * scale[None, :]).astype(jnp.bfloat16)


@jax.jit
def double_conv(x_nchw, w1, g1, b1, m1, v1, w2, g2, b2, m2, v2):
    n, cin, h, w = x_nchw.shape
    cout = w1.shape[0]

    s1, o1 = _fold_bn(g1, b1, m1, v1)
    s2, o2 = _fold_bn(g2, b2, m2, v2)
    w1m = _fold_weight(w1, s1)
    w2m = _fold_weight(w2, s2)
    b1v = o1.reshape(1, cout).astype(jnp.float32)
    b2v = o2.reshape(1, cout).astype(jnp.float32)

    # NCHW -> NHWC, bf16 for the MXU.  Zero-padding happens inside the kernel.
    x_nhwc = jnp.transpose(x_nchw, (0, 2, 3, 1)).astype(jnp.bfloat16)

    out = pl.pallas_call(
        _double_conv_kernel,
        out_shape=jax.ShapeDtypeStruct((n, h * w, cout), jnp.float32),
        grid=(n,),
        in_specs=[
            pl.BlockSpec((1, h, w, cin), lambda i: (i, 0, 0, 0)),
            # Constant index maps: fetched once, reused across grid steps.
            pl.BlockSpec((9 * cin, cout), lambda i: (0, 0)),
            pl.BlockSpec((1, cout), lambda i: (0, 0)),
            pl.BlockSpec((9 * cout, cout), lambda i: (0, 0)),
            pl.BlockSpec((1, cout), lambda i: (0, 0)),
        ],
        out_specs=pl.BlockSpec((1, h * w, cout), lambda i: (i, 0, 0)),
        scratch_shapes=[
            pltpu.VMEM((h + 2, w + 2, cin), jnp.bfloat16),
            pltpu.VMEM((h + 2, w + 2, cout), jnp.bfloat16),
        ],
        compiler_params=pltpu.CompilerParams(
            dimension_semantics=("parallel",)),
    )(x_nhwc, w1m, b1v, w2m, b2v)

    out = out.reshape(n, h, w, cout)                 # NHWC
    return jnp.transpose(out, (0, 3, 1, 2))          # -> NCHW


# --------------------------- pure-JAX reference -------------------------------
def _ref_double_conv(x, w1, g1, b1, m1, v1, w2, g2, b2, m2, v2):
    def block(x, w, g, b, m, v):
        y = lax.conv_general_dilated(
            x, w, window_strides=(1, 1), padding="SAME",
            dimension_numbers=("NCHW", "OIHW", "NCHW"),
            precision=lax.Precision.HIGHEST)
        y = ((y - m[None, :, None, None])
             / jnp.sqrt(v[None, :, None, None] + BN_EPS)
             * g[None, :, None, None] + b[None, :, None, None])
        return jnp.maximum(y, 0.0)

    y = block(x, w1, g1, b1, m1, v1)
    return block(y, w2, g2, b2, m2, v2)


# ----------------------------------- main -------------------------------------
if __name__ == "__main__":
    N, CIN, COUT, H, W = 2, 4, 8, 16, 16

    key = jax.random.PRNGKey(0)
    ks = jax.random.split(key, 11)

    x = jax.random.normal(ks[0], (N, CIN, H, W), jnp.float32)

    # Conv weights (OIHW, bias=False), deterministic synthetic init.
    w1 = jax.random.normal(ks[1], (COUT, CIN, 3, 3), jnp.float32) * 0.1
    w2 = jax.random.normal(ks[2], (COUT, COUT, 3, 3), jnp.float32) * 0.1

    # BatchNorm2d params + running stats (eval-mode semantics).
    g1 = jax.random.uniform(ks[3], (COUT,), jnp.float32, 0.5, 1.5)
    b1 = jax.random.normal(ks[4], (COUT,), jnp.float32) * 0.1
    m1 = jax.random.normal(ks[5], (COUT,), jnp.float32) * 0.1
    v1 = jax.random.uniform(ks[6], (COUT,), jnp.float32, 0.5, 1.5)

    g2 = jax.random.uniform(ks[7], (COUT,), jnp.float32, 0.5, 1.5)
    b2 = jax.random.normal(ks[8], (COUT,), jnp.float32) * 0.1
    m2 = jax.random.normal(ks[9], (COUT,), jnp.float32) * 0.1
    v2 = jax.random.uniform(ks[10], (COUT,), jnp.float32, 0.5, 1.5)

    out = double_conv(x, w1, g1, b1, m1, v1, w2, g2, b2, m2, v2)
    out = jax.block_until_ready(out)

    ref = _ref_double_conv(x, w1, g1, b1, m1, v1, w2, g2, b2, m2, v2)
    assert out.shape == (N, COUT, H, W), out.shape
    # bf16 MXU operands (incl. the bf16-staged intermediate) vs. an f32
    # reference -> expect O(1e-2) deviations after two conv+BN stages; a
    # structural bug would give O(1) errors.
    err = float(jnp.max(jnp.abs(out - ref)))
    assert jnp.allclose(out, ref, atol=2e-1, rtol=5e-2), f"max abs err {err}"

    print("KERNEL_OK")
</pallas_src>

<mosaic_0001>
module attributes {stable_mosaic.version = 11 : i64} {
  func.func @_double_conv_kernel(%arg0: i32, %arg1: memref<1x16x16x4xbf16, #tpu.memory_space<vmem>>, %arg2: memref<36x8xbf16, #tpu.memory_space<vmem>>, %arg3: memref<1x8xf32, #tpu.memory_space<vmem>>, %arg4: memref<72x8xbf16, #tpu.memory_space<vmem>>, %arg5: memref<1x8xf32, #tpu.memory_space<vmem>>, %arg6: memref<1x256x8xf32, #tpu.memory_space<vmem>>, %arg7: memref<18x18x4xbf16, #tpu.memory_space<vmem>>, %arg8: memref<18x18x8xbf16, #tpu.memory_space<vmem>>) attributes {dimension_semantics = [#tpu.dimension_semantics<parallel>], iteration_bounds = array<i64: 2>, scalar_prefetch = 0 : i64, scratch_operands = 2 : i64, tpu.core_type = #tpu.core_type<tc>, window_params = [{transform_indices = @transform_0, window_bounds = array<i64: 1, 16, 16, 4>}, {pipeline_mode = #tpu.pipeline_mode<synchronous>, transform_indices = @transform_1, window_bounds = array<i64: 36, 8>}, {pipeline_mode = #tpu.pipeline_mode<synchronous>, transform_indices = @transform_2, window_bounds = array<i64: 1, 8>}, {pipeline_mode = #tpu.pipeline_mode<synchronous>, transform_indices = @transform_3, window_bounds = array<i64: 72, 8>}, {pipeline_mode = #tpu.pipeline_mode<synchronous>, transform_indices = @transform_4, window_bounds = array<i64: 1, 8>}, {transform_indices = @transform_5, window_bounds = array<i64: 1, 256, 8>}]} {
    %cst = arith.constant 0.000000e+00 : bf16
    %0 = vector.broadcast %cst : bf16 to vector<18x18x4xbf16>
    %c0 = arith.constant 0 : index
    %c0_0 = arith.constant 0 : index
    %c0_1 = arith.constant 0 : index
    %1 = vector.load %arg7[%c0, %c0_0, %c0_1] : memref<18x18x4xbf16, #tpu.memory_space<vmem>>, vector<18x18x4xbf16>
    tpu.vector_store %arg7[%c0, %c0_0, %c0_1], %0 {strides = array<i32>} : memref<18x18x4xbf16, #tpu.memory_space<vmem>>, vector<18x18x4xbf16>,
    %c0_2 = arith.constant 0 : index
    %c0_3 = arith.constant 0 : index
    %c0_4 = arith.constant 0 : index
    %c0_5 = arith.constant 0 : index
    %2 = vector.load %arg1[%c0_2, %c0_3, %c0_4, %c0_5] : memref<1x16x16x4xbf16, #tpu.memory_space<vmem>>, vector<1x16x16x4xbf16>
    %3 = vector.shape_cast %2 : vector<1x16x16x4xbf16> to vector<16x16x4xbf16>
    %c1 = arith.constant 1 : index
    %c1_6 = arith.constant 1 : index
    %c0_7 = arith.constant 0 : index
    %4 = vector.load %arg7[%c1, %c1_6, %c0_7] : memref<18x18x4xbf16, #tpu.memory_space<vmem>>, vector<16x16x4xbf16>
    tpu.vector_store %arg7[%c1, %c1_6, %c0_7], %3 {strides = array<i32>} : memref<18x18x4xbf16, #tpu.memory_space<vmem>>, vector<16x16x4xbf16>,
    %c0_8 = arith.constant 0 : index
    %c0_9 = arith.constant 0 : index
    %c0_10 = arith.constant 0 : index
    %5 = vector.load %arg7[%c0_8, %c0_9, %c0_10] : memref<18x18x4xbf16, #tpu.memory_space<vmem>>, vector<16x16x4xbf16>
    %c0_11 = arith.constant 0 : index
    %c1_12 = arith.constant 1 : index
    %c0_13 = arith.constant 0 : index
    %6 = vector.load %arg7[%c0_11, %c1_12, %c0_13] : memref<18x18x4xbf16, #tpu.memory_space<vmem>>, vector<16x16x4xbf16>
    %c0_14 = arith.constant 0 : index
    %c2 = arith.constant 2 : index
    %c0_15 = arith.constant 0 : index
    %7 = vector.load %arg7[%c0_14, %c2, %c0_15] : memref<18x18x4xbf16, #tpu.memory_space<vmem>>, vector<16x16x4xbf16>
    %c1_16 = arith.constant 1 : index
    %c0_17 = arith.constant 0 : index
    %c0_18 = arith.constant 0 : index
    %8 = vector.load %arg7[%c1_16, %c0_17, %c0_18] : memref<18x18x4xbf16, #tpu.memory_space<vmem>>, vector<16x16x4xbf16>
    %c1_19 = arith.constant 1 : index
    %c1_20 = arith.constant 1 : index
    %c0_21 = arith.constant 0 : index
    %9 = vector.load %arg7[%c1_19, %c1_20, %c0_21] : memref<18x18x4xbf16, #tpu.memory_space<vmem>>, vector<16x16x4xbf16>
    %c1_22 = arith.constant 1 : index
    %c2_23 = arith.constant 2 : index
    %c0_24 = arith.constant 0 : index
    %10 = vector.load %arg7[%c1_22, %c2_23, %c0_24] : memref<18x18x4xbf16, #tpu.memory_space<vmem>>, vector<16x16x4xbf16>
    %c2_25 = arith.constant 2 : index
    %c0_26 = arith.constant 0 : index
    %c0_27 = arith.constant 0 : index
    %11 = vector.load %arg7[%c2_25, %c0_26, %c0_27] : memref<18x18x4xbf16, #tpu.memory_space<vmem>>, vector<16x16x4xbf16>
    %c2_28 = arith.constant 2 : index
    %c1_29 = arith.constant 1 : index
    %c0_30 = arith.constant 0 : index
    %12 = vector.load %arg7[%c2_28, %c1_29, %c0_30] : memref<18x18x4xbf16, #tpu.memory_space<vmem>>, vector<16x16x4xbf16>
    %c2_31 = arith.constant 2 : index
    %c2_32 = arith.constant 2 : index
    %c0_33 = arith.constant 0 : index
    %13 = vector.load %arg7[%c2_31, %c2_32, %c0_33] : memref<18x18x4xbf16, #tpu.memory_space<vmem>>, vector<16x16x4xbf16>
    %14 = tpu.concatenate %5, %6, %7, %8, %9, %10, %11, %12, %13 in 2 : vector<16x16x4xbf16>, vector<16x16x4xbf16>, vector<16x16x4xbf16>, vector<16x16x4xbf16>, vector<16x16x4xbf16>, vector<16x16x4xbf16>, vector<16x16x4xbf16>, vector<16x16x4xbf16>, vector<16x16x4xbf16> -> vector<16x16x36xbf16>
    %15 = vector.shape_cast %14 : vector<16x16x36xbf16> to vector<256x36xbf16>
    %c0_34 = arith.constant 0 : index
    %c0_35 = arith.constant 0 : index
    %16 = vector.load %arg2[%c0_34, %c0_35] : memref<36x8xbf16, #tpu.memory_space<vmem>>, vector<36x8xbf16>
    %cst_36 = arith.constant dense<0.000000e+00> : vector<256x8xf32>
    %17 = tpu.matmul %15, %16, %cst_36 {dimension_numbers = #tpu.dot_dimension_numbers<[1], [0], [0], [1], [0, 0, 1, 1], [], []>} : vector<256x36xbf16>, vector<36x8xbf16>, vector<256x8xf32> -> vector<256x8xf32>
    %c0_37 = arith.constant 0 : index
    %c0_38 = arith.constant 0 : index
    %18 = vector.load %arg3[%c0_37, %c0_38] : memref<1x8xf32, #tpu.memory_space<vmem>>, vector<1x8xf32>
    %19 = vector.broadcast %18 : vector<1x8xf32> to vector<256x8xf32>
    %20 = arith.addf %17, %19 : vector<256x8xf32>
    %cst_39 = arith.constant 0.000000e+00 : f32
    %21 = vector.broadcast %cst_39 : f32 to vector<256x8xf32>
    %22 = arith.maximumf %20, %21 : vector<256x8xf32>
    %cst_40 = arith.constant 0.000000e+00 : bf16
    %23 = vector.broadcast %cst_40 : bf16 to vector<18x18x8xbf16>
    %c0_41 = arith.constant 0 : index
    %c0_42 = arith.constant 0 : index
    %c0_43 = arith.constant 0 : index
    %24 = vector.load %arg8[%c0_41, %c0_42, %c0_43] : memref<18x18x8xbf16, #tpu.memory_space<vmem>>, vector<18x18x8xbf16>
    tpu.vector_store %arg8[%c0_41, %c0_42, %c0_43], %23 {strides = array<i32>} : memref<18x18x8xbf16, #tpu.memory_space<vmem>>, vector<18x18x8xbf16>,
    %25 = vector.shape_cast %22 : vector<256x8xf32> to vector<16x16x8xf32>
    %26 = arith.truncf %25 : vector<16x16x8xf32> to vector<16x16x8xbf16>
    %c1_44 = arith.constant 1 : index
    %c1_45 = arith.constant 1 : index
    %c0_46 = arith.constant 0 : index
    %27 = vector.load %arg8[%c1_44, %c1_45, %c0_46] : memref<18x18x8xbf16, #tpu.memory_space<vmem>>, vector<16x16x8xbf16>
    tpu.vector_store %arg8[%c1_44, %c1_45, %c0_46], %26 {strides = array<i32>} : memref<18x18x8xbf16, #tpu.memory_space<vmem>>, vector<16x16x8xbf16>,
    %c0_47 = arith.constant 0 : index
    %c0_48 = arith.constant 0 : index
    %c0_49 = arith.constant 0 : index
    %28 = vector.load %arg8[%c0_47, %c0_48, %c0_49] : memref<18x18x8xbf16, #tpu.memory_space<vmem>>, vector<16x16x8xbf16>
    %c0_50 = arith.constant 0 : index
    %c1_51 = arith.constant 1 : index
    %c0_52 = arith.constant 0 : index
    %29 = vector.load %arg8[%c0_50, %c1_51, %c0_52] : memref<18x18x8xbf16, #tpu.memory_space<vmem>>, vector<16x16x8xbf16>
    %c0_53 = arith.constant 0 : index
    %c2_54 = arith.constant 2 : index
    %c0_55 = arith.constant 0 : index
    %30 = vector.load %arg8[%c0_53, %c2_54, %c0_55] : memref<18x18x8xbf16, #tpu.memory_space<vmem>>, vector<16x16x8xbf16>
    %c1_56 = arith.constant 1 : index
    %c0_57 = arith.constant 0 : index
    %c0_58 = arith.constant 0 : index
    %31 = vector.load %arg8[%c1_56, %c0_57, %c0_58] : memref<18x18x8xbf16, #tpu.memory_space<vmem>>, vector<16x16x8xbf16>
    %c1_59 = arith.constant 1 : index
    %c1_60 = arith.constant 1 : index
    %c0_61 = arith.constant 0 : index
    %32 = vector.load %arg8[%c1_59, %c1_60, %c0_61] : memref<18x18x8xbf16, #tpu.memory_space<vmem>>, vector<16x16x8xbf16>
    %c1_62 = arith.constant 1 : index
    %c2_63 = arith.constant 2 : index
    %c0_64 = arith.constant 0 : index
    %33 = vector.load %arg8[%c1_62, %c2_63, %c0_64] : memref<18x18x8xbf16, #tpu.memory_space<vmem>>, vector<16x16x8xbf16>
    %c2_65 = arith.constant 2 : index
    %c0_66 = arith.constant 0 : index
    %c0_67 = arith.constant 0 : index
    %34 = vector.load %arg8[%c2_65, %c0_66, %c0_67] : memref<18x18x8xbf16, #tpu.memory_space<vmem>>, vector<16x16x8xbf16>
    %c2_68 = arith.constant 2 : index
    %c1_69 = arith.constant 1 : index
    %c0_70 = arith.constant 0 : index
    %35 = vector.load %arg8[%c2_68, %c1_69, %c0_70] : memref<18x18x8xbf16, #tpu.memory_space<vmem>>, vector<16x16x8xbf16>
    %c2_71 = arith.constant 2 : index
    %c2_72 = arith.constant 2 : index
    %c0_73 = arith.constant 0 : index
    %36 = vector.load %arg8[%c2_71, %c2_72, %c0_73] : memref<18x18x8xbf16, #tpu.memory_space<vmem>>, vector<16x16x8xbf16>
    %37 = tpu.concatenate %28, %29, %30, %31, %32, %33, %34, %35, %36 in 2 : vector<16x16x8xbf16>, vector<16x16x8xbf16>, vector<16x16x8xbf16>, vector<16x16x8xbf16>, vector<16x16x8xbf16>, vector<16x16x8xbf16>, vector<16x16x8xbf16>, vector<16x16x8xbf16>, vector<16x16x8xbf16> -> vector<16x16x72xbf16>
    %38 = vector.shape_cast %37 : vector<16x16x72xbf16> to vector<256x72xbf16>
    %c0_74 = arith.constant 0 : index
    %c0_75 = arith.constant 0 : index
    %39 = vector.load %arg4[%c0_74, %c0_75] : memref<72x8xbf16, #tpu.memory_space<vmem>>, vector<72x8xbf16>
    %cst_76 = arith.constant dense<0.000000e+00> : vector<256x8xf32>
    %40 = tpu.matmul %38, %39, %cst_76 {dimension_numbers = #tpu.dot_dimension_numbers<[1], [0], [0], [1], [0, 0, 1, 1], [], []>} : vector<256x72xbf16>, vector<72x8xbf16>, vector<256x8xf32> -> vector<256x8xf32>
    %c0_77 = arith.constant 0 : index
    %c0_78 = arith.constant 0 : index
    %41 = vector.load %arg5[%c0_77, %c0_78] : memref<1x8xf32, #tpu.memory_space<vmem>>, vector<1x8xf32>
    %42 = vector.broadcast %41 : vector<1x8xf32> to vector<256x8xf32>
    %43 = arith.addf %40, %42 : vector<256x8xf32>
    %cst_79 = arith.constant 0.000000e+00 : f32
    %44 = vector.broadcast %cst_79 : f32 to vector<256x8xf32>
    %45 = arith.maximumf %43, %44 : vector<256x8xf32>
    %c0_80 = arith.constant 0 : index
    %c0_81 = arith.constant 0 : index
    %c0_82 = arith.constant 0 : index
    %46 = vector.load %arg6[%c0_80, %c0_81, %c0_82] : memref<1x256x8xf32, #tpu.memory_space<vmem>>, vector<1x256x8xf32>
    %47 = vector.shape_cast %46 : vector<1x256x8xf32> to vector<256x8xf32>
    %48 = vector.shape_cast %45 : vector<256x8xf32> to vector<1x256x8xf32>
    tpu.vector_store %arg6[%c0_80, %c0_81, %c0_82], %48 {strides = array<i32>} : memref<1x256x8xf32, #tpu.memory_space<vmem>>, vector<1x256x8xf32>,
    return
  }
  func.func @transform_0(%arg0: i32) -> (i32, i32, i32, i32) {
    %c0_i32 = arith.constant 0 : i32
    %c0_i32_0 = arith.constant 0 : i32
    %c0_i32_1 = arith.constant 0 : i32
    %c0_i32_2 = arith.constant 0 : i32
    return %arg0, %c0_i32, %c0_i32_0, %c0_i32_1 : i32, i32, i32, i32
  }
  func.func @transform_1(%arg0: i32) -> (i32, i32) {
    %c0_i32 = arith.constant 0 : i32
    %c0_i32_0 = arith.constant 0 : i32
    %c0_i32_1 = arith.constant 0 : i32
    return %c0_i32, %c0_i32_0 : i32, i32
  }
  func.func @transform_2(%arg0: i32) -> (i32, i32) {
    %c0_i32 = arith.constant 0 : i32
    %c0_i32_0 = arith.constant 0 : i32
    %c0_i32_1 = arith.constant 0 : i32
    return %c0_i32, %c0_i32_0 : i32, i32
  }
  func.func @transform_3(%arg0: i32) -> (i32, i32) {
    %c0_i32 = arith.constant 0 : i32
    %c0_i32_0 = arith.constant 0 : i32
    %c0_i32_1 = arith.constant 0 : i32
    return %c0_i32, %c0_i32_0 : i32, i32
  }
  func.func @transform_4(%arg0: i32) -> (i32, i32) {
    %c0_i32 = arith.constant 0 : i32
    %c0_i32_0 = arith.constant 0 : i32
    %c0_i32_1 = arith.constant 0 : i32
    return %c0_i32, %c0_i32_0 : i32, i32
  }
  func.func @transform_5(%arg0: i32) -> (i32, i32, i32) {
    %c0_i32 = arith.constant 0 : i32
    %c0_i32_0 = arith.constant 0 : i32
    %c0_i32_1 = arith.constant 0 : i32
    return %arg0, %c0_i32, %c0_i32_0 : i32, i32, i32
  }
}

</mosaic_0001>

<bundles_post_ra>
// kernel: double_conv.1
= control target key start
LH: loop header
LB: loop body
LE: loop exit
PB: predicated region body
PF: predicated region fallthrough
CT: control target
= control target key end

     0   :  { %s6761_s18 = smov 0   ;;  %s9452_s0 = inlined_call_operand.vmem [shape: bf16[2,16,16,4], index: 0, kind: input, shape index: {}]   ;;  %s9453_s1 = inlined_call_operand.vmem [shape: bf16[36,8], index: 1, kind: input, shape index: {}]   ;;  %s9454_s2 = inlined_call_operand.vmem [shape: f32[1,8], index: 2, kind: input, shape index: {}]   ;;  %s9455_s3 = inlined_call_operand.vmem [shape: bf16[72,8], index: 3, kind: input, shape index: {}]   ;;  %s9456_s4 = inlined_call_operand.vmem [shape: f32[1,8], index: 4, kind: input, shape index: {}]   ;;  %s9457_s5 = inlined_call_operand.vmem [shape: f32[2,256,8], index: 5, kind: output, shape index: {}]  }
   0x1 LB: > { %s5881_s19 = sadd.s32 4294967295, %s6716_s18   ;;  %p5885_p0 = scmp.ge.s32.totalorder %s6716_s18, 1  ;;  %s6716_s18 = sphi %s6761_s18, %s15_s18  }
   0x2   : > { %p187_p1 = scmp.lt.s32.totalorder %s6716_s18, 3 }
   0x4   : > { %p188_p2 = pnand %p5885_p0, %p187_p1 }
   0x5   : > { %vm226_vm0 = vcmask (!%p188_p2), 27648   ;;  %vm229_vm1 = vcmask (!%p188_p2), 24576   ;;  %v6718_v0 = vmov (!%p188_p2), 0   ;;  %p215_p3 = scmp.lt.s32.totalorder (!%p188_p2), %s5881_s19, 1  ;;  %vm9458_vm2 = vsmask.f32 (!%p188_p2), 256 }
   0x6   : > { %191 = sbr.rel (%p188_p2) target bundleno = 1037 (0x40d), region = 40  ;;  %227 = vst.msk [vmem:[#allocation2] sm:$0xf] (!%p188_p2), %vm226_vm0, %v6718_v0  ;;  %228 = vst.msk [vmem:[#allocation2 + $0x4] sm:$0xf] (!%p188_p2), %vm226_vm0, %v6718_v0  ;;  %vm1349_vm5 = vcmask (!%p188_p2), 1046528  }
   0x7   : > { %230 = vst.msk [vmem:[#allocation2 + $0x8] sm:$0x1] (!%p188_p2), %vm229_vm1, %v6718_v0  ;;  %233 = vst.msk [vmem:[#allocation2 + $0x14] sm:$0x1] (!%p188_p2), %vm229_vm1, %v6718_v0  ;;  %vm315_vm3 = vsmask.f32 (!%p188_p2), 4368 }
   0x8   : > { %231 = vst.msk [vmem:[#allocation2 + $0xc] sm:$0xf] (!%p188_p2), %vm226_vm0, %v6718_v0  ;;  %232 = vst.msk [vmem:[#allocation2 + $0x10] sm:$0xf] (!%p188_p2), %vm226_vm0, %v6718_v0  ;;  %vm639_vm4 = vsmask.f32 (!%p188_p2), 7938 }
   0x9   : > { %234 = vst.msk [vmem:[#allocation2 + $0x18] sm:$0xf] (!%p188_p2), %vm226_vm0, %v6718_v0  ;;  %235 = vst.msk [vmem:[#allocation2 + $0x1c] sm:$0xf] (!%p188_p2), %vm226_vm0, %v6718_v0  ;;  %vm1076_vm6 = vsmask.f32 (!%p188_p2), 7424 }
   0xa   : > { %236 = vst.msk [vmem:[#allocation2 + $0x20] sm:$0x1] (!%p188_p2), %vm229_vm1, %v6718_v0  ;;  %239 = vst.msk [vmem:[#allocation2 + $0x2c] sm:$0x1] (!%p188_p2), %vm229_vm1, %v6718_v0  ;;  %s6719_s24 = smov (!%p188_p2), 8   ;;  %s6720_s25 = smov (!%p188_p2), 4  }
   0xb   : > { %237 = vst.msk [vmem:[#allocation2 + $0x24] sm:$0xf] (!%p188_p2), %vm226_vm0, %v6718_v0  ;;  %238 = vst.msk [vmem:[#allocation2 + $0x28] sm:$0xf] (!%p188_p2), %vm226_vm0, %v6718_v0  ;;  %s6721_s26 = smov (!%p188_p2), 12   ;;  %s6722_s27 = smov (!%p188_p2), 24  }
   0xc   : > { %240 = vst.msk [vmem:[#allocation2 + $0x30] sm:$0xf] (!%p188_p2), %vm226_vm0, %v6718_v0  ;;  %241 = vst.msk [vmem:[#allocation2 + $0x34] sm:$0xf] (!%p188_p2), %vm226_vm0, %v6718_v0  ;;  %s6723_s7 = smov (!%p188_p2), 20   ;;  %s6724_s8 = smov (!%p188_p2), 32  }
   0xd   : > { %242 = vst.msk [vmem:[#allocation2 + $0x38] sm:$0x1] %vm229_vm1, %v6718_v0  ;;  %245 = vst.msk [vmem:[#allocation2 + $0x44] sm:$0x1] %vm229_vm1, %v6718_v0  ;;  %s9471_s19 = smov (!%p215_p3, %s5881_s19), 1  ;;  %s6725_s9 = smov 16  }
   0xe   : > { %243 = vst.msk [vmem:[#allocation2 + $0x3c] sm:$0xf] %vm226_vm0, %v6718_v0  ;;  %244 = vst.msk [vmem:[#allocation2 + $0x40] sm:$0xf] %vm226_vm0, %v6718_v0  ;;  %s6254_s20 = sshll.u32 %s9471_s19, 7  ;;  %s6726_s10 = smov 28  }
   0xf   : > { %246 = vst.msk [vmem:[#allocation2 + $0x48] sm:$0xf] %vm226_vm0, %v6718_v0  ;;  %247 = vst.msk [vmem:[#allocation2 + $0x4c] sm:$0xf] %vm226_vm0, %v6718_v0  ;;  %s6887_s23 = scalar_lea.vmem %s9452_s0, %s6254_s20  ;;  %v756_v4 = vld [vmem:[#allocation2 + $0x4] sm:$0xf] }
  0x10   : > { %248 = vst.msk [vmem:[#allocation2 + $0x50] sm:$0x1] %vm229_vm1, %v6718_v0  ;;  %251 = vst.msk [vmem:[#allocation2 + $0x5c] sm:$0x1] %vm229_vm1, %v6718_v0  ;;  %v284_v1 = vld [vmem:[%s6887_s23 + $0x8] sm:$0xf] }
  0x11   : > { %249 = vst.msk [vmem:[#allocation2 + $0x54] sm:$0xf] %vm226_vm0, %v6718_v0  ;;  %250 = vst.msk [vmem:[#allocation2 + $0x58] sm:$0xf] %vm226_vm0, %v6718_v0  ;;  %v285_v2 = vld [vmem:[%s6887_s23 + $0xc] sm:$0xf] }
  0x12   : > { %252 = vst.msk [vmem:[#allocation2 + $0x60] sm:$0xf] %vm226_vm0, %v6718_v0  ;;  %253 = vst.msk [vmem:[#allocation2 + $0x64] sm:$0xf] %vm226_vm0, %v6718_v0  ;;  %v282_v3 = vld [vmem:[%s6887_s23] sm:$0xf] }
  0x13   : > { %254 = vst.msk [vmem:[#allocation2 + $0x68] sm:$0x1] %vm229_vm1, %v6718_v0  ;;  %257 = vst.msk [vmem:[#allocation2 + $0x74] sm:$0x1] %vm229_vm1, %v6718_v0  ;;  %v803_v5 = vld [vmem:[#allocation2] sm:$0xe] }
  0x14   : > { %255 = vst.msk [vmem:[#allocation2 + $0x6c] sm:$0xf] %vm226_vm0, %v6718_v0  ;;  %256 = vst.msk [vmem:[#allocation2 + $0x70] sm:$0xf] %vm226_vm0, %v6718_v0  ;;  %v5922_v7 = vcombine.low %v803_v5, %v756_v4  ;;  %v755_v8 = vld [vmem:[#allocation2] sm:$0xf] }
  0x15   : > { %258 = vst.msk [vmem:[#allocation2 + $0x78] sm:$0xf] %vm226_vm0, %v6718_v0  ;;  %259 = vst.msk [vmem:[#allocation2 + $0x7c] sm:$0xf] %vm226_vm0, %v6718_v0  ;;  %v335_v9 = vshrl.u32 %v284_v1, 16  ;;  %v6892_v10 = vcombine.low %v755_v8, %v756_v4  ;;  %v338_v11 = vshll.u32 %v284_v1, 16 }
  0x16   : > { %260 = vst.msk [vmem:[#allocation2 + $0x80] sm:$0x1] %vm229_vm1, %v6718_v0  ;;  %263 = vst.msk [vmem:[#allocation2 + $0x8c] sm:$0x1] %vm229_vm1, %v6718_v0  ;;  %v343_v12 = vshrl.u32 %v285_v2, 16  ;;  %v346_v13 = vshll.u32 %v285_v2, 16 }
  0x17   : > { %261 = vst.msk [vmem:[#allocation2 + $0x84] sm:$0xf] %vm226_vm0, %v6718_v0  ;;  %262 = vst.msk [vmem:[#allocation2 + $0x88] sm:$0xf] %vm226_vm0, %v6718_v0  ;;  %v1350_v14 = vrot.slane %v5922_v7, 1  ;;  %v337_v17 = vrot.slane %v335_v9, 7 }
  0x18   : > { %264 = vst.msk [vmem:[#allocation2 + $0x90] sm:$0xf] %vm226_vm0, %v6718_v0  ;;  %265 = vst.msk [vmem:[#allocation2 + $0x94] sm:$0xf] %vm226_vm0, %v6718_v0  ;;  %v650_v18 = vld [vmem:[#allocation2 + $0x18] sm:$0xf] }
  0x19   : > { %266 = vst.msk [vmem:[#allocation2 + $0x98] sm:$0x1] %vm229_vm1, %v6718_v0  ;;  %269 = vst.msk [vmem:[#allocation2 + $0xa4] sm:$0x1] %vm229_vm1, %v6718_v0  ;;  %v1078_v19 = vshrl.u32 %v6892_v10, 16  ;;  %v1080_v20 = vshll.u32 %v6892_v10, 16  ;;  %v340_v28 = vor.u32 %v338_v11, %v337_v17 }
  0x1a   : > { %267 = vst.msk [vmem:[#allocation2 + $0x9c] sm:$0xf] %vm226_vm0, %v6718_v0  ;;  %268 = vst.msk [vmem:[#allocation2 + $0xa0] sm:$0xf] %vm226_vm0, %v6718_v0  ;;  %v345_v21 = vrot.slane %v343_v12, 7  ;;  %v318_v24 = vshrl.u32 %v282_v3, 16 }
  0x1b   : > { %270 = vst.msk [vmem:[#allocation2 + $0xa8] sm:$0xf] %vm226_vm0, %v6718_v0  ;;  %271 = vst.msk [vmem:[#allocation2 + $0xac] sm:$0xf] %vm226_vm0, %v6718_v0  ;;  %v283_v23 = vld [vmem:[%s6887_s23 + $0x4] sm:$0xf] }
  0x1c   : > { %272 = vst.msk [vmem:[#allocation2 + $0xb0] sm:$0x1] %vm229_vm1, %v6718_v0  ;;  %275 = vst.msk [vmem:[#allocation2 + $0xbc] sm:$0x1] %vm229_vm1, %v6718_v0  ;;  %v341_v29 = vrot.slane %v337_v17, 4  ;;  %v1082_v31 = vrot.slane %v1080_v20, 1  ;;  %v348_v32 = vor.u32 %v346_v13, %v345_v21 }
  0x1d   : > { %273 = vst.msk [vmem:[#allocation2 + $0xb4] sm:$0xf] %vm226_vm0, %v6718_v0  ;;  %274 = vst.msk [vmem:[#allocation2 + $0xb8] sm:$0xf] %vm226_vm0, %v6718_v0  ;;  %v286_v30 = vld [vmem:[%s6887_s23 + $0x10] sm:$0xf] }
  0x1e   : > { %276 = vst.msk [vmem:[#allocation2 + $0xc0] sm:$0xf] %vm226_vm0, %v6718_v0  ;;  %277 = vst.msk [vmem:[#allocation2 + $0xc4] sm:$0xf] %vm226_vm0, %v6718_v0  ;;  %v320_v33 = vrot.slane %v318_v24, 7  ;;  %v321_v34 = vshll.u32 %v282_v3, 16  ;;  %v1083_v41 = vor.u32 %v1082_v31, %v1078_v19 }
  0x1f   : > { %278 = vst.msk [vmem:[#allocation2 + $0xc8] sm:$0x1] %vm229_vm1, %v6718_v0  ;;  %281 = vst.msk [vmem:[#allocation2 + $0xd4] sm:$0x1] %vm229_vm1, %v6718_v0  ;;  %v287_v35 = vld [vmem:[%s6887_s23 + $0x14] sm:$0xf] }
  0x20   : > { %279 = vst.msk [vmem:[#allocation2 + $0xcc] sm:$0xf] %vm226_vm0, %v6718_v0  ;;  %280 = vst.msk [vmem:[#allocation2 + $0xd0] sm:$0xf] %vm226_vm0, %v6718_v0  ;;  %v326_v37 = vshrl.u32 %v283_v23, 16  ;;  %v329_v38 = vshll.u32 %v283_v23, 16  ;;  %v323_v43 = vor.u32 %v321_v34, %v320_v33 }
  0x21   : > { %v6431_v6 = vld [vmem:[#allocation2 + $0x8] ss:$0 sps:$4 sm:$0x11]   ;;  %vm6898_vm7 = vmand %vm226_vm0, %vm639_vm4  ;;  %v641_v39 = vld [vmem:[#allocation2 + $0xc] sm:$0xf]  ;;  %v352_v40 = vshrl.u32 %v286_v30, 16 }
  0x22   : > { %v1351_v15 = vrot.slane %v6431_v6, 1  ;;  %v1085_v16 = vshll.u32 %v6431_v6, 16  ;;  %vm6906_vm8 = vmor %vm9458_vm2, %vm315_vm3  ;;  %v651_v36 = vsel %vm6898_vm7, %v340_v28, %v650_v18  ;;  %v324_v44 = vrot.slane %v320_v33, 4  ;;  %v654_v45 = vld [vmem:[#allocation2 + $0x20] sm:$0x1]  ;;  %s6727_s15 = smov 48  }
  0x23   : > { %v349_v42 = vsel %vm6906_vm8, %v341_v29, %v348_v32  ;;  %652 = vst [vmem:[#allocation2 + $0x18] sm:$0xf] %v651_v36  ;;  %v328_v46 = vrot.slane %v326_v37, 7  ;;  %v354_v47 = vrot.slane %v352_v40, 7  ;;  %v355_v48 = vshll.u32 %v286_v30, 16  ;;  %vm6925_vm9 = vmand %vm229_vm1, %vm9458_vm2  ;;  %s6728_s16 = smov 40  }
  0x24   : > { %v1352_v25 = vsel %vm1349_vm5, %v1350_v14, %v1351_v15  ;;  %v1087_v26 = vrot.slane %v1085_v16, 1  ;;  %653 = vst.msk [vmem:[#allocation2 + $0x1c] sm:$0xf] %vm226_vm0, %v349_v42  ;;  %v360_v49 = vshrl.u32 %v287_v35, 16  ;;  %v288_v50 = vld [vmem:[%s6887_s23 + $0x18] sm:$0xf]  ;;  %v642_v52 = vsel %vm6898_vm7, %v323_v43, %v641_v39 }
  0x25   : > { %1398 = vrot.lane.b32.xlu1 %v1352_v25, %s6719_s24  ;;  %v363_v53 = vshll.u32 %v287_v35, 16  ;;  %v657_v54 = vld [vmem:[#allocation2 + $0x24] sm:$0xf]  ;;  %v350_v55 = vrot.slane %v345_v21, 4  ;;  %v331_v56 = vor.u32 %v329_v38, %v328_v46  ;;  %643 = vst [vmem:[#allocation2 + $0xc] sm:$0xf] %v642_v52  ;;  %v357_v57 = vor.u32 %v355_v48, %v354_v47 }
  0x26   : > { %v1088_v51 = vsel %vm1076_vm6, %v1083_v41, %v1087_v26  ;;  %v358_v58 = vrot.slane %v354_v47, 4  ;;  %v362_v59 = vrot.slane %v360_v49, 7  ;;  %v647_v61 = vld [vmem:[#allocation2 + $0x14] sm:$0x1]  ;;  %v333_v62 = vrot.slane %v328_v46, 4  ;;  %s6729_s17 = smov 64  }
  0x27   : > { %1269 = vrot.lane.b32.xlu0 %v1088_v51, %s6720_s25  ;;  %v655_v63 = vsel %vm6925_vm9, %v350_v55, %v654_v45  ;;  %v661_v1 = vld [vmem:[#allocation2 + $0x2c] sm:$0x1]  ;;  %v369_v2 = vshrl.u32 %v288_v50, 16  ;;  %v372_v3 = vshll.u32 %v288_v50, 16  ;;  %v332_v4 = vsel %vm6906_vm8, %v324_v44, %v331_v56  ;;  %v664_v11 = vld [vmem:[#allocation2 + $0x30] sm:$0xf] }
  0x28   : > { %v365_v5 = vor.u32 %v363_v53, %v362_v59  ;;  %v658_v6 = vsel %vm6898_vm7, %v357_v57, %v657_v54  ;;  %656 = vst [vmem:[#allocation2 + $0x20] sm:$0x1] %v655_v63  ;;  %v367_v7 = vrot.slane %v362_v59, 4  ;;  %644 = vst.msk [vmem:[#allocation2 + $0x10] sm:$0xf] %vm226_vm0, %v332_v4  ;;  %v648_v8 = vsel %vm6925_vm9, %v333_v62, %v647_v61  ;;  %s6730_s20 = smov 56  }
  0x29   : > { %659 = vst [vmem:[#allocation2 + $0x24] sm:$0xf] %v658_v6  ;;  %v6938_v9 = vrot.slane %v369_v2, 7  ;;  %649 = vst [vmem:[#allocation2 + $0x14] sm:$0x1] %v648_v8  ;;  %v6509_v6 = vld [vmem:[%s9453_s1] sm:$0xff]  }
  0x2a   : > { %v821_v12 = vld [vmem:[#allocation2 + $0x18] sm:$0xf]  ;;  %v366_v14 = vsel %vm6906_vm8, %v358_v58, %v365_v5  ;;  %v662_v16 = vsel %vm6925_vm9, %v367_v7, %v661_v1  ;;  %6328 = vmatprep.subr.bf16.mxu0 %v6509_v6  ;;  %vm2778_vm10 = vcmask 1041408   ;;  %vm2454_vm11 = vcmask 31744  }
  0x2b   : > { %v868_v13 = vld [vmem:[#allocation2 + $0x18] sm:$0xe]  ;;  %v822_v17 = vld [vmem:[#allocation2 + $0x1c] sm:$0xf]  ;;  %660 = vst.msk [vmem:[#allocation2 + $0x28] sm:$0xf] %vm226_vm0, %v366_v14  ;;  %v374_v19 = vor.u32 %v372_v3, %v6938_v9  ;;  %6329 = vmatpush3.bf16.msra.mxu0 %v6509_v6 }
  0x2c   : > { %v884_v15 = vld [vmem:[#allocation2 + $0x18] sm:$0xf]  ;;  %v885_v18 = vld [vmem:[#allocation2 + $0x1c] sm:$0xf]  ;;  %663 = vst [vmem:[#allocation2 + $0x2c] sm:$0x1] %v662_v16  ;;  %v5939_v20 = vcombine.low %v821_v12, %v822_v17  ;;  %v5971_v21 = vcombine.low %v868_v13, %v822_v17 }
  0x2d   : > { %v6946_v23 = vcombine.low %v884_v15, %v885_v18  ;;  %v665_v24 = vsel %vm6898_vm7, %v374_v19, %v664_v11  ;;  %v819_v25 = vld [vmem:[#allocation2 + $0xc] sm:$0xf]  ;;  %v932_v28 = vld [vmem:[#allocation2 + $0x18] sm:$0xe]  ;;  %v6958_v41 = vld [vmem:[#allocation2 + $0x1c] sm:$0xf] }
  0x2e   : > { %1512 = vrot.lane.b32.xlu1 %v5939_v20, %s6721_s26  ;;  %v867_v26 = vld [vmem:[#allocation2 + $0xc] sm:$0xe]  ;;  %666 = vst [vmem:[#allocation2 + $0x30] sm:$0xf] %v665_v24  ;;  %v1605_v29 = vshll.u32 %v5939_v20, 16  ;;  %v1865_v39 = vrot.slane %v5971_v21, 1  ;;  %v6018_v43 = vcombine.low %v932_v28, %v885_v18 }
  0x2f   : > { %v2105_v30 = vshll.u32 %v6946_v23, 16  ;;  %v804_v31 = vld [vmem:[#allocation2 + $0xc] sm:$0xe]  ;;  %v820_v32 = vld [vmem:[#allocation2 + $0x10] sm:$0xf]  ;;  %v1603_v49 = vshrl.u32 %v5939_v20, 16 }
  0x30   : > { %v886_v33 = vld [vmem:[#allocation2 + $0x24] sm:$0xf]  ;;  %v757_v34 = vld [vmem:[#allocation2 + $0xc] sm:$0xf]  ;;  %v6952_v35 = vcombine.low %v819_v25, %v820_v32  ;;  %v5970_v36 = vcombine.low %v867_v26, %v820_v32  ;;  %v759_v40 = vld [vmem:[#allocation2 + $0x18] sm:$0xf] }
  0x31   : > { %v6954_v37 = vld [vmem:[#allocation2 + $0x14] ss:$0 sps:$4 sm:$0x11]   ;;  %v6956_v38 = vld [vmem:[#allocation2 + $0x20] ss:$0 sps:$4 sm:$0x11]   ;;  %v6975_v1 = vcombine.low %v759_v40, %v6958_v41 }
  0x32   : > { %v6960_v42 = vld [vmem:[#allocation2 + $0x28] sm:$0xf]  ;;  %v758_v44 = vld [vmem:[#allocation2 + $0x10] sm:$0xf]  ;;  %1510 = vrot.lane.b32.xlu0 %v6952_v35, %s6721_s26  ;;  %v1593_v45 = vshll.u32 %v6952_v35, 16  ;;  %v1862_v47 = vrot.slane %v5970_v36, 1 }
  0x33   : > { %v5987_v46 = vcombine.low %v886_v33, %v6960_v42  ;;  %v6443_v48 = vld [vmem:[#allocation2 + $0x14] ss:$0 sps:$4 sm:$0x11]   ;;  %v1863_v50 = vrot.slane %v6954_v37, 1  ;;  %v5923_v51 = vcombine.low %v804_v31, %v758_v44  ;;  %v6967_v52 = vcombine.low %v757_v34, %v758_v44  ;;  %v6970_v58 = vld [vmem:[#allocation2 + $0x24] sm:$0xe] }
  0x34   : > { %v6447_v53 = vld [vmem:[#allocation2 + $0x20] ss:$0 sps:$4 sm:$0x11]   ;;  %v1354_v55 = vrot.slane %v6443_v48, 1  ;;  %v1607_v56 = vrot.slane %v1605_v29, 1  ;;  %v1097_v57 = vshll.u32 %v6443_v48, 16  ;;  %v6019_v28 = vcombine.low %v6970_v58, %v6960_v42 }
  0x35   : > { %v2117_v54 = vshll.u32 %v5987_v46, 16  ;;  %2024 = vrot.lane.b32.xlu1 %v5987_v46, %s6722_s27  ;;  %v1353_v59 = vrot.slane %v5923_v51, 1  ;;  %v1866_v61 = vrot.slane %v6447_v53, 1  ;;  %v1610_v62 = vshll.u32 %v6447_v53, 16  ;;  %v6992_v18 = vld [vmem:[%s6887_s23 + $0x1c] sm:$0xf] }
  0x36   : > { %v6972_v63 = vld [vmem:[#allocation2 + $0x2c] ss:$0 sps:$4 sm:$0x11]   ;;  %2022 = vrot.lane.b32.xlu0 %v6946_v23, %s6722_s27  ;;  %v1864_v2 = vsel %vm1349_vm5, %v1862_v47, %v1863_v50  ;;  %v2374_v3 = vrot.slane %v6018_v43, 1  ;;  %v2375_v4 = vrot.slane %v6956_v38, 1  ;;  %v1092_v5 = vshll.u32 %v6967_v52, 16 }
  0x37   : > { %v1355_v7 = vsel %vm1349_vm5, %v1353_v59, %v1354_v55  ;;  %v1608_v8 = vor.u32 %v1607_v56, %v1603_v49  ;;  %v1090_v11 = vshrl.u32 %v6967_v52, 16  ;;  %v1099_v12 = vrot.slane %v1097_v57, 1  ;;  %v6987_v13 = vld [vmem:[#allocation2 + $0x20] ss:$0 sps:$4 sm:$0x11]   ;;  %v6514_v26 = vld [vmem:[%s9453_s1 + $0x8] sm:$0xff]  }
  0x38   : > { %v1094_v14 = vrot.slane %v1092_v5, 1  ;;  %v2115_v15 = vshrl.u32 %v5987_v46, 16  ;;  %v2119_v16 = vrot.slane %v2117_v54, 1  ;;  %v2122_v17 = vshll.u32 %v6972_v63, 16  ;;  %v761_v25 = vld [vmem:[#allocation2 + $0x24] sm:$0xf]  ;;  %6330 = vmatprep.subr.bf16.mxu0 %v6514_v26 }
  0x39   : > { %1400 = vrot.lane.b32.xlu1 %v1355_v7, %s6719_s24  ;;  %v1867_v19 = vsel %vm1349_vm5, %v1865_v39, %v1866_v61  ;;  %v1612_v20 = vrot.slane %v1610_v62, 1  ;;  %v1591_v21 = vshrl.u32 %v6952_v35, 16  ;;  %v1595_v24 = vrot.slane %v1593_v45, 1  ;;  %v7005_v33 = vld [vmem:[#allocation2 + $0x28] sm:$0xf]  ;;  %6331 = vmatpush3.bf16.msra.mxu0 %v6514_v26 }
  0x3a   : > { %1910 = vrot.lane.b32.xlu0 %v1864_v2, %s6723_s7  ;;  %v2376_v29 = vsel %vm1349_vm5, %v2374_v3, %v2375_v4  ;;  %v1598_v31 = vshll.u32 %v6954_v37, 16  ;;  %v1104_v32 = vshll.u32 %v6975_v1, 16  ;;  %v1095_v34 = vor.u32 %v1094_v14, %v1090_v11  ;;  %v805_v40 = vld [vmem:[#allocation2 + $0x18] sm:$0xe]  ;;  %v806_v56 = vld [vmem:[#allocation2 + $0x24] sm:$0xe] }
  0x3b   : > { %v2124_v35 = vrot.slane %v2122_v17, 1  ;;  %v1102_v36 = vshrl.u32 %v6975_v1, 16  ;;  %v1109_v39 = vshll.u32 %v6987_v13, 16  ;;  %v2120_v42 = vor.u32 %v2119_v16, %v2115_v15  ;;  %v7013_v45 = vld [vmem:[#allocation2 + $0x2c] ss:$0 sps:$4 sm:$0x11]  }
  0x3c   : > { %v1106_v43 = vrot.slane %v1104_v32, 1  ;;  %v2103_v44 = vshrl.u32 %v6946_v23, 16  ;;  %v2107_v37 = vrot.slane %v2105_v30, 1  ;;  %v1613_v46 = vsel %vm1076_vm6, %v1608_v8, %v1612_v20  ;;  %v668_v7 = vld [vmem:[#allocation2 + $0x38] sm:$0x1] }
  0x3d   : > { %1912 = vrot.lane.b32.xlu1 %v1867_v19, %s6723_s7  ;;  %v2110_v47 = vshll.u32 %v6956_v38, 16  ;;  %v7018_v48 = vcombine.low %v761_v25, %v7005_v33  ;;  %v377_v49 = vshrl.u32 %v6992_v18, 16  ;;  %v1596_v50 = vor.u32 %v1595_v24, %v1591_v21  ;;  %v290_v8 = vld [vmem:[%s6887_s23 + $0x20] sm:$0xf]  ;;  %v823_v14 = vld [vmem:[#allocation2 + $0x24] sm:$0xf] }
  0x3e   : > { %2422 = vrot.lane.b32.xlu0 %v2376_v29, %s6724_s8  ;;  %v1600_v51 = vrot.slane %v1598_v31, 1  ;;  %v5924_v23 = vcombine.low %v805_v40, %v6958_v41  ;;  %v380_v30 = vshll.u32 %v6992_v18, 16  ;;  %v1100_v53 = vsel %vm1076_vm6, %v1095_v34, %v1099_v12  ;;  %v7037_v15 = vld [vmem:[#allocation2 + $0x28] sm:$0xf]  ;;  %v291_v16 = vld [vmem:[%s6887_s23 + $0x24] sm:$0xf] }
  0x3f   : > { %v1107_v54 = vor.u32 %v1106_v43, %v1102_v36  ;;  %v1111_v55 = vrot.slane %v1109_v39, 1  ;;  %v1116_v38 = vshll.u32 %v7018_v48, 16  ;;  %v2125_v57 = vsel %vm1076_vm6, %v2120_v42, %v2124_v35  ;;  %v7042_v19 = vld [vmem:[#allocation2 + $0x2c] ss:$0 sps:$4 sm:$0x11]  }
  0x40   : > { %v2108_v58 = vor.u32 %v2107_v37, %v2103_v44  ;;  %v1121_v59 = vshll.u32 %v7013_v45, 16  ;;  %v2377_v41 = vrot.slane %v6019_v28, 1  ;;  %v2112_v61 = vrot.slane %v2110_v47, 1  ;;  %v292_v26 = vld [vmem:[%s6887_s23 + $0x28] sm:$0xf] }
  0x41   : > { %1784 = vrot.lane.b32.xlu1 %v1613_v46, %s6725_s9  ;;  %v1114_v62 = vshrl.u32 %v7018_v48, 16  ;;  %v1118_v2 = vrot.slane %v1116_v38, 1  ;;  %v2378_v3 = vrot.slane %v6972_v63, 1  ;;  %v5925_v4 = vcombine.low %v806_v56, %v7005_v33  ;;  %v293_v33 = vld [vmem:[%s6887_s23 + $0x2c] sm:$0xf] }
  0x42   : > { %1271 = vrot.lane.b32.xlu0 %v1100_v53, %s6720_s25  ;;  %v375_v5 = vrot.slane %v6938_v9, 4  ;;  %v379_v6 = vrot.slane %v377_v49, 7  ;;  %v1601_v11 = vsel %vm1076_vm6, %v1596_v50, %v1600_v51  ;;  %v1112_v12 = vsel %vm1076_vm6, %v1107_v54, %v1111_v55  ;;  %v294_v40 = vld [vmem:[%s6887_s23 + $0x30] sm:$0xf]  ;;  %v671_v50 = vld [vmem:[#allocation2 + $0x3c] sm:$0xf] }
  0x43   : > { %v1123_v63 = vrot.slane %v1121_v59, 1  ;;  %v1360_v17 = vrot.slane %v7013_v45, 1  ;;  %v2113_v20 = vsel %vm1076_vm6, %v2108_v58, %v2112_v61  ;;  %v1119_v21 = vor.u32 %v1118_v2, %v1114_v62  ;;  %v675_v56 = vld [vmem:[#allocation2 + $0x44] sm:$0x1]  ;;  %v825_v58 = vld [vmem:[#allocation2 + $0x30] sm:$0xf] }
  0x44   : > { %v382_v9 = vor.u32 %v380_v30, %v379_v6  ;;  %v384_v18 = vrot.slane %v379_v6, 4  ;;  %v2379_v24 = vsel %vm1349_vm5, %v2377_v41, %v2378_v3  ;;  %v1356_v25 = vrot.slane %v5924_v23, 1  ;;  %v870_v2 = vld [vmem:[#allocation2 + $0x30] sm:$0xe]  ;;  %v869_v3 = vld [vmem:[#allocation2 + $0x24] sm:$0xe] }
  0x45   : > { %2296 = vrot.lane.b32.xlu1 %v2125_v57, %s6726_s10  ;;  %v1359_v28 = vrot.slane %v5925_v4, 1  ;;  %v1357_v29 = vrot.slane %v6987_v13, 1  ;;  %v7056_v34 = vcombine.low %v823_v14, %v7037_v15  ;;  %v386_v35 = vshrl.u32 %v290_v8, 16  ;;  %v678_v57 = vld [vmem:[#allocation2 + $0x48] sm:$0xf] }
  0x46   : > { %1782 = vrot.lane.b32.xlu0 %v1601_v11, %s6725_s9  ;;  %v383_v31 = vsel %vm6906_vm8, %v375_v5, %v382_v9  ;;  %v669_v32 = vsel %vm6925_vm9, %v384_v18, %v668_v7  ;;  %v389_v36 = vshll.u32 %v290_v8, 16  ;;  %v394_v39 = vshrl.u32 %v291_v16, 16 }
  0x47   : > { %667 = vst.msk [vmem:[#allocation2 + $0x34] sm:$0xf] %vm226_vm0, %v383_v31  ;;  %670 = vst [vmem:[#allocation2 + $0x38] sm:$0x1] %v669_v32  ;;  %v1622_v13 = vshll.u32 %v7042_v19, 16  ;;  %v397_v42 = vshll.u32 %v291_v16, 16  ;;  %v1124_v37 = vsel %vm1076_vm6, %v1119_v21, %v1123_v63  ;;  %v1361_v49 = vsel %vm1349_vm5, %v1359_v28, %v1360_v17 }
  0x48   : > { %v403_v43 = vshrl.u32 %v292_v26, 16  ;;  %v406_v44 = vshll.u32 %v292_v26, 16  ;;  %v388_v45 = vrot.slane %v386_v35, 7  ;;  %v396_v46 = vrot.slane %v394_v39, 7  ;;  %v763_v21 = vld [vmem:[#allocation2 + $0x30] sm:$0xf] }
  0x49   : > { %1273 = vrot.lane.b32.xlu1 %v1112_v12, %s6720_s25  ;;  %v411_v47 = vshrl.u32 %v293_v33, 16  ;;  %v414_v23 = vshll.u32 %v293_v33, 16  ;;  %v420_v30 = vshrl.u32 %v294_v40, 16  ;;  %v1617_v53 = vshll.u32 %v7056_v34, 16  ;;  %v888_v12 = vld [vmem:[#allocation2 + $0x30] sm:$0xf] }
  0x4a   : > { %2294 = vrot.lane.b32.xlu0 %v2113_v20, %s6726_s10  ;;  %v405_v51 = vrot.slane %v403_v43, 7  ;;  %v391_v54 = vor.u32 %v389_v36, %v388_v45  ;;  %v392_v55 = vrot.slane %v388_v45, 4  ;;  %v399_v38 = vor.u32 %v397_v42, %v396_v46  ;;  %v685_v42 = vld [vmem:[#allocation2 + $0x54] sm:$0xf] }
  0x4b   : > { %v401_v59 = vrot.slane %v396_v46, 4  ;;  %v413_v62 = vrot.slane %v411_v47, 7  ;;  %v7070_v6 = vrot.slane %v420_v30, 7  ;;  %v423_v7 = vshll.u32 %v294_v40, 16  ;;  %v682_v40 = vld [vmem:[#allocation2 + $0x50] sm:$0x1] }
  0x4c   : > { %v408_v41 = vor.u32 %v406_v44, %v405_v51  ;;  %v409_v61 = vrot.slane %v405_v51, 4  ;;  %v400_v4 = vsel %vm6906_vm8, %v392_v55, %v399_v38  ;;  %v672_v5 = vsel %vm6898_vm7, %v391_v54, %v671_v50 }
  0x4d   : > { %1275 = vrot.lane.b32.xlu1 %v1124_v37, %s6720_s25  ;;  %v1615_v11 = vshrl.u32 %v7056_v34, 16  ;;  %673 = vst [vmem:[#allocation2 + $0x3c] sm:$0xf] %v672_v5  ;;  %674 = vst.msk [vmem:[#allocation2 + $0x40] sm:$0xf] %vm226_vm0, %v400_v4  ;;  %v676_v14 = vsel %vm6925_vm9, %v401_v59, %v675_v56  ;;  %v416_v16 = vor.u32 %v414_v23, %v413_v62  ;;  %v1619_v20 = vrot.slane %v1617_v53, 1 }
  0x4e   : > { %2424 = vrot.lane.b32.xlu0 %v2379_v24, %s6724_s8  ;;  %v826_v8 = vld [vmem:[#allocation2 + $0x34] sm:$0xf]  ;;  %v679_v63 = vsel %vm6898_vm7, %v408_v41, %v678_v57  ;;  %v1358_v17 = vsel %vm1349_vm5, %v1356_v25, %v1357_v29  ;;  %v6459_v18 = vld [vmem:[#allocation2 + $0x38] ss:$0 sps:$4 sm:$0x11]   ;;  %v418_v32 = vrot.slane %v413_v62, 4  ;;  %v425_v29 = vor.u32 %v423_v7, %v7070_v6 }
  0x4f   : > { %v5941_v9 = vcombine.low %v825_v58, %v826_v8  ;;  %677 = vst [vmem:[#allocation2 + $0x44] sm:$0x1] %v676_v14  ;;  %680 = vst [vmem:[#allocation2 + $0x48] sm:$0xf] %v679_v63  ;;  %v5973_v24 = vcombine.low %v870_v2, %v826_v8  ;;  %v7081_v26 = vld [vmem:[#allocation2 + $0x34] sm:$0xf]  ;;  %v417_v31 = vsel %vm6906_vm8, %v409_v61, %v416_v16 }
  0x50   : > { %v7083_v28 = vld [vmem:[#allocation2 + $0x34] sm:$0xf]  ;;  %v1634_v25 = vshll.u32 %v6459_v18, 16  ;;  %681 = vst.msk [vmem:[#allocation2 + $0x4c] sm:$0xf] %vm226_vm0, %v417_v31  ;;  %v5972_v36 = vcombine.low %v869_v3, %v7037_v15  ;;  %v1624_v39 = vrot.slane %v1622_v13, 1  ;;  %v1620_v37 = vor.u32 %v1619_v20, %v1615_v11 }
  0x51   : > { %1404 = vrot.lane.b32.xlu1 %v1361_v49, %s6719_s24  ;;  %v1629_v33 = vshll.u32 %v5941_v9, 16  ;;  %v1627_v35 = vshrl.u32 %v5941_v9, 16  ;;  %v5988_v45 = vcombine.low %v888_v12, %v7081_v26  ;;  %v1871_v46 = vrot.slane %v5973_v24, 1  ;;  %v7098_v15 = vld [vmem:[#allocation2 + $0x38] ss:$0 sps:$4 sm:$0x11]  }
  0x52   : > { %1402 = vrot.lane.b32.xlu0 %v1358_v17, %s6719_s24  ;;  %v1636_v44 = vrot.slane %v1634_v25, 1  ;;  %v7094_v47 = vcombine.low %v763_v21, %v7083_v28  ;;  %v1872_v50 = vrot.slane %v6459_v18, 1  ;;  %v683_v13 = vsel %vm6925_vm9, %v418_v32, %v682_v40  ;;  %v7109_v38 = vld [vmem:[#allocation2 + $0x38] ss:$0 sps:$4 sm:$0x11]  }
  0x53   : > { %v1631_v43 = vrot.slane %v1629_v33, 1  ;;  %v686_v30 = vsel %vm6898_vm7, %v425_v29, %v685_v42  ;;  %v1868_v53 = vrot.slane %v5972_v36, 1  ;;  %684 = vst [vmem:[#allocation2 + $0x50] sm:$0x1] %v683_v13  ;;  %v1625_v57 = vsel %vm1076_vm6, %v1620_v37, %v1624_v39  ;;  %v934_v8 = vld [vmem:[#allocation2 + $0x30] sm:$0xe] }
  0x54   : > { %v890_v51 = vld [vmem:[#allocation2 + $0x3c] sm:$0xf]  ;;  %v7096_v23 = vld [vmem:[#allocation2 + $0x40] sm:$0xf]  ;;  %687 = vst [vmem:[#allocation2 + $0x54] sm:$0xf] %v686_v30  ;;  %v1873_v2 = vsel %vm1349_vm5, %v1871_v46, %v1872_v50  ;;  %v6020_v32 = vcombine.low %v934_v8, %v7081_v26 }
  0x55   : > { %1516 = vrot.lane.b32.xlu1 %v5941_v9, %s6721_s26  ;;  %v1632_v49 = vor.u32 %v1631_v43, %v1627_v35  ;;  %v5989_v54 = vcombine.low %v890_v51, %v7096_v23  ;;  %v1869_v58 = vrot.slane %v7042_v19, 1  ;;  %v2129_v59 = vshll.u32 %v5988_v45, 16  ;;  %v765_v41 = vld [vmem:[#allocation2 + $0x3c] sm:$0xf]  ;;  %v7114_v61 = vld [vmem:[#allocation2 + $0x40] sm:$0xf] }
  0x56   : > { %1514 = vrot.lane.b32.xlu0 %v7056_v34, %s6721_s26  ;;  %v7107_v55 = vld [vmem:[#allocation2 + $0x44] ss:$0 sps:$4 sm:$0x11]   ;;  %v1128_v62 = vshll.u32 %v7094_v47, 16  ;;  %v7121_v5 = vcombine.low %v765_v41, %v7114_v61  ;;  %v2127_v11 = vshrl.u32 %v5988_v45, 16  ;;  %v2134_v14 = vshll.u32 %v7098_v15, 16 }
  0x57   : > { %v1637_v56 = vsel %vm1076_vm6, %v1632_v49, %v1636_v44  ;;  %v2141_v34 = vshll.u32 %v5989_v54, 16  ;;  %v2139_v3 = vshrl.u32 %v5989_v54, 16  ;;  %v2146_v4 = vshll.u32 %v7107_v55, 16  ;;  %v295_v9 = vld [vmem:[%s6887_s23 + $0x34] sm:$0xf] }
  0x58   : > { %v1870_v7 = vsel %vm1349_vm5, %v1868_v53, %v1869_v58  ;;  %v2131_v12 = vrot.slane %v2129_v59, 1  ;;  %v1126_v16 = vshrl.u32 %v7094_v47, 16  ;;  %v1130_v63 = vrot.slane %v1128_v62, 1  ;;  %v7130_v21 = vld [vmem:[#allocation2 + $0x44] ss:$0 sps:$4 sm:$0x11]  }
  0x59   : > { %1788 = vrot.lane.b32.xlu1 %v1637_v56, %s6725_s9  ;;  %v2143_v19 = vrot.slane %v2141_v34, 1  ;;  %v1133_v17 = vshll.u32 %v7109_v38, 16  ;;  %v2148_v20 = vrot.slane %v2146_v4, 1  ;;  %v1140_v24 = vshll.u32 %v7121_v5, 16  ;;  %v935_v31 = vld [vmem:[#allocation2 + $0x3c] sm:$0xe] }
  0x5a   : > { %1786 = vrot.lane.b32.xlu0 %v1625_v57, %s6725_s9  ;;  %v2132_v33 = vor.u32 %v2131_v12, %v2127_v11  ;;  %v2136_v35 = vrot.slane %v2134_v14, 1  ;;  %v1131_v25 = vor.u32 %v1130_v63, %v1126_v16  ;;  %v428_v36 = vshrl.u32 %v295_v9, 16  ;;  %v808_v44 = vld [vmem:[#allocation2 + $0x3c] sm:$0xe]  ;;  %v829_v26 = vld [vmem:[#allocation2 + $0x48] sm:$0xf] }
  0x5b   : > { %v2144_v18 = vor.u32 %v2143_v19, %v2139_v3  ;;  %v1135_v29 = vrot.slane %v1133_v17, 1  ;;  %v1138_v40 = vshrl.u32 %v7121_v5, 16  ;;  %v1142_v42 = vrot.slane %v1140_v24, 1  ;;  %v7141_v46 = vld [vmem:[#allocation2 + $0x4c] sm:$0xf] }
  0x5c   : > { %v1145_v43 = vshll.u32 %v7130_v21, 16  ;;  %v6021_v37 = vcombine.low %v935_v31, %v7096_v23  ;;  %v2137_v49 = vsel %vm1076_vm6, %v2132_v33, %v2136_v35  ;;  %v2380_v50 = vrot.slane %v6020_v32, 1  ;;  %v807_v13 = vld [vmem:[#allocation2 + $0x30] sm:$0xe]  ;;  %v827_v30 = vld [vmem:[#allocation2 + $0x3c] sm:$0xf] }
  0x5d   : > { %1916 = vrot.lane.b32.xlu1 %v1873_v2, %s6723_s7  ;;  %v2149_v39 = vsel %vm1076_vm6, %v2144_v18, %v2148_v20  ;;  %v2381_v51 = vrot.slane %v7098_v15, 1  ;;  %v5927_v53 = vcombine.low %v808_v44, %v7114_v61  ;;  %v426_v23 = vrot.slane %v7070_v6, 4  ;;  %v689_v15 = vld [vmem:[#allocation2 + $0x5c] sm:$0x1]  ;;  %v296_v3 = vld [vmem:[%s6887_s23 + $0x38] sm:$0xf] }
  0x5e   : > { %1914 = vrot.lane.b32.xlu0 %v1870_v7, %s6723_s7  ;;  %v431_v56 = vshll.u32 %v295_v9, 16  ;;  %v1136_v57 = vsel %vm1076_vm6, %v1131_v25, %v1135_v29  ;;  %v1143_v58 = vor.u32 %v1142_v42, %v1138_v40  ;;  %v1147_v59 = vrot.slane %v1145_v43, 1  ;;  %v7162_v7 = vld [vmem:[#allocation2 + $0x50] ss:$0 sps:$4 sm:$0x11]  }
  0x5f   : > { %v7152_v41 = vcombine.low %v829_v26, %v7141_v46  ;;  %v2383_v34 = vrot.slane %v6021_v37, 1  ;;  %v5926_v62 = vcombine.low %v807_v13, %v7083_v28  ;;  %v2382_v6 = vsel %vm1349_vm5, %v2380_v50, %v2381_v51  ;;  %v297_v18 = vld [vmem:[%s6887_s23 + $0x3c] sm:$0xf]  ;;  %v7179_v31 = vld [vmem:[#allocation2 + $0x44] ss:$0 sps:$4 sm:$0x11]  }
  0x60   : > { %v2384_v4 = vrot.slane %v7107_v55, 1  ;;  %v1366_v8 = vrot.slane %v7130_v21, 1  ;;  %v1148_v12 = vsel %vm1076_vm6, %v1143_v58, %v1147_v59  ;;  %v1365_v14 = vrot.slane %v5927_v53, 1  ;;  %v872_v55 = vld [vmem:[#allocation2 + $0x48] sm:$0xe] }
  0x61   : > { %2028 = vrot.lane.b32.xlu1 %v5989_v54, %s6722_s27  ;;  %v7147_v54 = vld [vmem:[#allocation2 + $0x40] sm:$0xf]  ;;  %v1653_v16 = vshll.u32 %v7152_v41, 16  ;;  %v437_v63 = vshrl.u32 %v296_v3, 16  ;;  %v1362_v17 = vrot.slane %v5926_v62, 1  ;;  %v1363_v9 = vrot.slane %v7109_v38, 1 }
  0x62   : > { %2026 = vrot.lane.b32.xlu0 %v5988_v45, %s6722_s27  ;;  %v430_v45 = vrot.slane %v428_v36, 7  ;;  %v7160_v19 = vcombine.low %v827_v30, %v7147_v54  ;;  %v2385_v20 = vsel %vm1349_vm5, %v2383_v34, %v2384_v4  ;;  %v1658_v24 = vshll.u32 %v7162_v7, 16  ;;  %v692_v25 = vld [vmem:[#allocation2 + $0x60] sm:$0xf]  ;;  %v871_v36 = vld [vmem:[#allocation2 + $0x3c] sm:$0xe] }
  0x63   : > { %v5975_v32 = vcombine.low %v872_v55, %v7141_v46  ;;  %v439_v33 = vrot.slane %v437_v63, 7  ;;  %v440_v35 = vshll.u32 %v296_v3, 16  ;;  %v1367_v29 = vsel %vm1349_vm5, %v1365_v14, %v1366_v8  ;;  %v894_v44 = vld [vmem:[#allocation2 + $0x54] sm:$0xf]  ;;  %v892_v51 = vld [vmem:[#allocation2 + $0x48] sm:$0xf] }
  0x64   : > { %v433_v61 = vor.u32 %v431_v56, %v430_v45  ;;  %v435_v2 = vrot.slane %v430_v45, 4  ;;  %v1641_v21 = vshll.u32 %v7160_v19, 16  ;;  %v1651_v38 = vshrl.u32 %v7152_v41, 16  ;;  %v767_v58 = vld [vmem:[#allocation2 + $0x48] sm:$0xf] }
  0x65   : > { %2300 = vrot.lane.b32.xlu1 %v2149_v39, %s6726_s10  ;;  %v1655_v39 = vrot.slane %v1653_v16, 1  ;;  %v445_v40 = vshrl.u32 %v297_v18, 16  ;;  %v1364_v42 = vsel %vm1349_vm5, %v1362_v17, %v1363_v9  ;;  %v1639_v43 = vshrl.u32 %v7160_v19, 16  ;;  %v7200_v59 = vld [vmem:[#allocation2 + $0x4c] sm:$0xf] }
  0x66   : > { %2298 = vrot.lane.b32.xlu0 %v2137_v49, %s6726_s10  ;;  %v434_v28 = vsel %vm6906_vm8, %v426_v23, %v433_v61  ;;  %v690_v11 = vsel %vm6925_vm9, %v435_v2, %v689_v15  ;;  %v442_v37 = vor.u32 %v440_v35, %v439_v33  ;;  %v448_v26 = vshll.u32 %v297_v18, 16  ;;  %v7193_v23 = vld [vmem:[#allocation2 + $0x4c] sm:$0xf]  ;;  %v696_v16 = vld [vmem:[#allocation2 + $0x68] sm:$0x1] }
  0x67   : > { %688 = vst.msk [vmem:[#allocation2 + $0x58] sm:$0xf] %vm226_vm0, %v434_v28  ;;  %691 = vst [vmem:[#allocation2 + $0x5c] sm:$0x1] %v690_v11  ;;  %v1660_v46 = vrot.slane %v1658_v24, 1  ;;  %v1643_v49 = vrot.slane %v1641_v21, 1  ;;  %v5974_v30 = vcombine.low %v871_v36, %v7147_v54  ;;  %v1656_v56 = vor.u32 %v1655_v39, %v1651_v38 }
  0x68   : > { %v1646_v50 = vshll.u32 %v7179_v31, 16  ;;  %v447_v13 = vrot.slane %v445_v40, 7  ;;  %v693_v45 = vsel %vm6898_vm7, %v442_v37, %v692_v25  ;;  %v1877_v15 = vrot.slane %v5975_v32, 1  ;;  %v7211_v28 = vld [vmem:[#allocation2 + $0x50] ss:$0 sps:$4 sm:$0x11]  }
  0x69   : > { %1277 = vrot.lane.b32.xlu1 %v1136_v57, %s6720_s25  ;;  %694 = vst [vmem:[#allocation2 + $0x60] sm:$0xf] %v693_v45  ;;  %v443_v54 = vrot.slane %v439_v33, 4  ;;  %v1644_v62 = vor.u32 %v1643_v49, %v1639_v43  ;;  %v1878_v2 = vrot.slane %v7162_v7, 1  ;;  %v7205_v3 = vcombine.low %v892_v51, %v7193_v23  ;;  %v936_v37 = vld [vmem:[#allocation2 + $0x48] sm:$0xe] }
  0x6a   : > { %2426 = vrot.lane.b32.xlu0 %v2382_v6, %s6724_s8  ;;  %v450_v34 = vor.u32 %v448_v26, %v447_v13  ;;  %v1648_v61 = vrot.slane %v1646_v50, 1  ;;  %v298_v6 = vld [vmem:[%s6887_s23 + $0x40] sm:$0xf]  ;;  %v1874_v4 = vrot.slane %v5974_v30, 1  ;;  %v1875_v8 = vrot.slane %v7179_v31, 1 }
  0x6b   : > { %v7214_v11 = vcombine.low %v767_v58, %v7200_v59  ;;  %v1661_v14 = vsel %vm1076_vm6, %v1656_v56, %v1660_v46  ;;  %v454_v9 = vshrl.u32 %v298_v6, 16  ;;  %v2153_v21 = vshll.u32 %v7205_v3, 16  ;;  %v7229_v24 = vld [vmem:[#allocation2 + $0x50] ss:$0 sps:$4 sm:$0x11]  }
  0x6c   : > { %v451_v17 = vsel %vm6906_vm8, %v443_v54, %v450_v34  ;;  %v1649_v18 = vsel %vm1076_vm6, %v1644_v62, %v1648_v61  ;;  %v299_v31 = vld [vmem:[%s6887_s23 + $0x44] sm:$0xf]  ;;  %v457_v35 = vshll.u32 %v298_v6, 16  ;;  %v2151_v39 = vshrl.u32 %v7205_v3, 16  ;;  %v703_v56 = vld [vmem:[#allocation2 + $0x74] sm:$0x1] }
  0x6d   : > { %1279 = vrot.lane.b32.xlu1 %v1148_v12, %s6720_s25  ;;  %v452_v12 = vrot.slane %v447_v13, 4  ;;  %695 = vst.msk [vmem:[#allocation2 + $0x64] sm:$0xf] %vm226_vm0, %v451_v17  ;;  %v1152_v32 = vshll.u32 %v7214_v11, 16  ;;  %v2158_v40 = vshll.u32 %v7211_v28, 16  ;;  %v462_v43 = vshrl.u32 %v299_v31, 16 }
  0x6e   : > { %2428 = vrot.lane.b32.xlu0 %v2385_v20, %s6724_s8  ;;  %v7191_v53 = vld [vmem:[#allocation2 + $0x58] sm:$0xf]  ;;  %v7218_v55 = vld [vmem:[#allocation2 + $0x5c] ss:$0 sps:$4 sm:$0x11]   ;;  %v1879_v20 = vsel %vm1349_vm5, %v1877_v15, %v1878_v2  ;;  %v2155_v26 = vrot.slane %v2153_v21, 1  ;;  %v6022_v61 = vcombine.low %v936_v37, %v7193_v23 }
  0x6f   : > { %v7198_v57 = vcombine.low %v894_v44, %v7191_v53  ;;  %v7222_v63 = vld [vmem:[#allocation2 + $0x58] sm:$0xf]  ;;  %v697_v33 = vsel %vm6925_vm9, %v452_v12, %v696_v16  ;;  %v2170_v36 = vshll.u32 %v7218_v55, 16  ;;  %v699_v44 = vld [vmem:[#allocation2 + $0x6c] sm:$0xf]  ;;  %v1150_v46 = vshrl.u32 %v7214_v11, 16 }
  0x70   : > { %698 = vst [vmem:[#allocation2 + $0x68] sm:$0x1] %v697_v33  ;;  %v1157_v49 = vshll.u32 %v7229_v24, 16  ;;  %v465_v50 = vshll.u32 %v299_v31, 16  ;;  %v1154_v51 = vrot.slane %v1152_v32, 1  ;;  %v464_v45 = vrot.slane %v462_v43, 7 }
  0x71   : > { %1408 = vrot.lane.b32.xlu1 %v1367_v29, %s6719_s24  ;;  %v2165_v7 = vshll.u32 %v7198_v57, 16  ;;  %v2163_v25 = vshrl.u32 %v7198_v57, 16  ;;  %v2172_v15 = vrot.slane %v2170_v36, 1  ;;  %v7249_v54 = vld [vmem:[#allocation2 + $0x5c] ss:$0 sps:$4 sm:$0x11]  }
  0x72   : > { %1406 = vrot.lane.b32.xlu0 %v1364_v42, %s6719_s24  ;;  %v456_v42 = vrot.slane %v454_v9, 7  ;;  %v937_v62 = vld [vmem:[#allocation2 + $0x54] sm:$0xe]  ;;  %v467_v2 = vor.u32 %v465_v50, %v464_v45  ;;  %v2160_v12 = vrot.slane %v2158_v40, 1  ;;  %v1155_v16 = vor.u32 %v1154_v51, %v1150_v46  ;;  %v7258_v17 = vld [vmem:[#allocation2 + $0x58] sm:$0xf] }
  0x73   : > { %v2167_v29 = vrot.slane %v2165_v7, 1  ;;  %v831_v7 = vld [vmem:[#allocation2 + $0x54] sm:$0xf]  ;;  %v1169_v31 = vshll.u32 %v7249_v54, 16  ;;  %v2387_v32 = vrot.slane %v7211_v28, 1  ;;  %vm2487_vm12 = vcmask 64512  }
  0x74   : > { %v459_v13 = vor.u32 %v457_v35, %v456_v42  ;;  %v460_v30 = vrot.slane %v456_v42, 4  ;;  %v833_v33 = vld [vmem:[#allocation2 + $0x60] sm:$0xf]  ;;  %v7272_v35 = vld [vmem:[#allocation2 + $0x64] sm:$0xf]  ;;  %vm2520_vm13 = vcmask 97280  }
  0x75   : > { %1520 = vrot.lane.b32.xlu1 %v7152_v41, %s6721_s26  ;;  %v769_v41 = vld [vmem:[#allocation2 + $0x54] sm:$0xf]  ;;  %v2168_v58 = vor.u32 %v2167_v29, %v2163_v25  ;;  %v300_v36 = vld [vmem:[%s6887_s23 + $0x48] sm:$0xf]  ;;  %v1171_v42 = vrot.slane %v1169_v31, 1  ;;  %v7283_v28 = vcombine.low %v833_v33, %v7272_v35  ;;  %vm2553_vm14 = vcmask 130048  }
  0x76   : > { %1518 = vrot.lane.b32.xlu0 %v7160_v19, %s6721_s26  ;;  %v1876_v19 = vsel %vm1349_vm5, %v1874_v4, %v1875_v8  ;;  %v7241_v38 = vcombine.low %v769_v41, %v7222_v63  ;;  %v700_v6 = vsel %vm6898_vm7, %v459_v13, %v699_v44  ;;  %v469_v4 = vrot.slane %v464_v45, 4  ;;  %v7291_v51 = vld [vmem:[#allocation2 + $0x5c] ss:$0 sps:$4 sm:$0x11]   ;;  %v7319_v33 = vld [vmem:[#allocation2 + $0x64] sm:$0xf] }
  0x77   : > { %v2156_v8 = vor.u32 %v2155_v26, %v2151_v39  ;;  %701 = vst [vmem:[#allocation2 + $0x6c] sm:$0xf] %v700_v6  ;;  %v1159_v41 = vrot.slane %v1157_v49, 1  ;;  %v468_v23 = vsel %vm6906_vm8, %v460_v30, %v467_v2  ;;  %v809_v39 = vld [vmem:[#allocation2 + $0x48] sm:$0xe]  ;;  %v471_v37 = vshrl.u32 %v300_v36, 16 }
  0x78   : > { %v1164_v34 = vshll.u32 %v7241_v38, 16  ;;  %v704_v9 = vsel %vm6925_vm9, %v469_v4, %v703_v56  ;;  %702 = vst.msk [vmem:[#allocation2 + $0x70] sm:$0xf] %vm226_vm0, %v468_v23  ;;  %v2390_v26 = vrot.slane %v7218_v55, 1  ;;  %v1372_v49 = vrot.slane %v7249_v54, 1 }
  0x79   : > { %1792 = vrot.lane.b32.xlu1 %v1661_v14, %s6725_s9  ;;  %v810_v14 = vld [vmem:[#allocation2 + $0x54] sm:$0xe]  ;;  %705 = vst [vmem:[#allocation2 + $0x74] sm:$0x1] %v704_v9  ;;  %v2161_v25 = vsel %vm1076_vm6, %v2156_v8, %v2160_v12  ;;  %v5928_v50 = vcombine.low %v809_v39, %v7200_v59  ;;  %v896_v30 = vld [vmem:[#allocation2 + $0x60] sm:$0xf] }
  0x7a   : > { %1790 = vrot.lane.b32.xlu0 %v1649_v18, %s6725_s9  ;;  %v2173_v18 = vsel %vm1076_vm6, %v2168_v58, %v2172_v15  ;;  %v1166_v21 = vrot.slane %v1164_v34, 1  ;;  %v5929_v29 = vcombine.low %v810_v14, %v7222_v63  ;;  %v301_v63 = vld [vmem:[%s6887_s23 + $0x4c] sm:$0xf]  ;;  %v1677_v56 = vshll.u32 %v7283_v28, 16  ;;  %v7299_v15 = vld [vmem:[#allocation2 + $0x64] sm:$0xf] }
  0x7b   : > { %v7297_v58 = vld [vmem:[#allocation2 + $0x68] ss:$0 sps:$4 sm:$0x11]   ;;  %v1369_v55 = vrot.slane %v7229_v24, 1  ;;  %v473_v59 = vrot.slane %v471_v37, 7  ;;  %v474_v54 = vshll.u32 %v300_v36, 16 }
  0x7c   : > { %v1371_v46 = vrot.slane %v5929_v29, 1  ;;  %v873_v2 = vld [vmem:[#allocation2 + $0x54] sm:$0xe]  ;;  %v479_v6 = vshrl.u32 %v301_v63, 16  ;;  %v874_v4 = vld [vmem:[#allocation2 + $0x60] sm:$0xe] }
  0x7d   : > { %1920 = vrot.lane.b32.xlu1 %v1879_v20, %s6723_s7  ;;  %v1162_v20 = vshrl.u32 %v7241_v38, 16  ;;  %v1670_v14 = vshll.u32 %v7291_v51, 16  ;;  %v1675_v24 = vshrl.u32 %v7283_v28, 16  ;;  %v482_v23 = vshll.u32 %v301_v63, 16  ;;  %v706_v9 = vld [vmem:[#allocation2 + $0x78] sm:$0xf] }
  0x7e   : > { %1918 = vrot.lane.b32.xlu0 %v1876_v19, %s6723_s7  ;;  %v2386_v19 = vrot.slane %v6022_v61, 1  ;;  %v1368_v61 = vrot.slane %v5928_v50, 1  ;;  %v476_v31 = vor.u32 %v474_v54, %v473_v59  ;;  %v481_v29 = vrot.slane %v479_v6, 7  ;;  %v303_v50 = vld [vmem:[%s6887_s23 + $0x54] sm:$0xf] }
  0x7f   : > { %v1167_v40 = vor.u32 %v1166_v21, %v1162_v20  ;;  %v898_v20 = vld [vmem:[#allocation2 + $0x6c] sm:$0xf]  ;;  %v7315_v21 = vld [vmem:[#allocation2 + $0x70] sm:$0xf]  ;;  %v1881_v36 = vrot.slane %v7291_v51, 1  ;;  %v1672_v37 = vrot.slane %v1670_v14, 1 }
  0x80   : > { %v2388_v43 = vsel %vm1349_vm5, %v2386_v19, %v2387_v32  ;;  %v5977_v19 = vcombine.low %v874_v4, %v7272_v35  ;;  %v771_v32 = vld [vmem:[#allocation2 + $0x60] sm:$0xf]  ;;  %v707_v39 = vsel %vm6898_vm7, %v476_v31, %v706_v9  ;;  %v7327_v35 = vcombine.low %v898_v20, %v7315_v21 }
  0x81   : > { %2032 = vrot.lane.b32.xlu1 %v7198_v57, %s6722_s27  ;;  %v6023_v57 = vcombine.low %v937_v62, %v7191_v53  ;;  %v7279_v53 = vcombine.low %v831_v7, %v7258_v17  ;;  %v1172_v45 = vsel %vm1076_vm6, %v1167_v40, %v1171_v42  ;;  %v1373_v62 = vsel %vm1349_vm5, %v1371_v46, %v1372_v49  ;;  %v302_v49 = vld [vmem:[%s6887_s23 + $0x50] sm:$0xf] }
  0x82   : > { %2030 = vrot.lane.b32.xlu0 %v7205_v3, %s6722_s27  ;;  %v1160_v3 = vsel %vm1076_vm6, %v1155_v16, %v1159_v41  ;;  %v7309_v7 = vcombine.low %v896_v30, %v7299_v15  ;;  %v1679_v16 = vrot.slane %v1677_v56, 1  ;;  %v1682_v41 = vshll.u32 %v7297_v58, 16  ;;  %708 = vst [vmem:[#allocation2 + $0x78] sm:$0xf] %v707_v39  ;;  %v7342_v56 = vld [vmem:[%s6887_s23 + $0x58] sm:$0xf] }
  0x83   : > { %v2389_v44 = vrot.slane %v6023_v57, 1  ;;  %v1665_v13 = vshll.u32 %v7279_v53, 16  ;;  %v1663_v8 = vshrl.u32 %v7279_v53, 16  ;;  %v1370_v57 = vsel %vm1349_vm5, %v1368_v61, %v1369_v55  ;;  %v7346_v55 = vld [vmem:[#allocation2 + $0x74] ss:$0 sps:$4 sm:$0x11]  }
  0x84   : > { %v1684_v40 = vrot.slane %v1682_v41, 1  ;;  %v484_v42 = vor.u32 %v482_v23, %v481_v29  ;;  %v7334_v46 = vcombine.low %v771_v32, %v7319_v33  ;;  %v1883_v51 = vrot.slane %v5977_v19, 1  ;;  %v773_v61 = vld [vmem:[#allocation2 + $0x6c] sm:$0xf] }
  0x85   : > { %2304 = vrot.lane.b32.xlu1 %v2173_v18, %s6726_s10  ;;  %v2391_v34 = vsel %vm1349_vm5, %v2389_v44, %v2390_v26  ;;  %v1667_v12 = vrot.slane %v1665_v13, 1  ;;  %v5976_v18 = vcombine.low %v873_v2, %v7258_v17  ;;  %v2177_v17 = vshll.u32 %v7309_v7, 16  ;;  %v6517_v44 = vld [vmem:[%s9453_s1 + $0x10] ss:$0 sps:$4 sm:$0x33]  }
  0x86   : > { %2302 = vrot.lane.b32.xlu0 %v2161_v25, %s6726_s10  ;;  %v477_v25 = vrot.slane %v473_v59, 4  ;;  %v1884_v13 = vrot.slane %v7297_v58, 1  ;;  %v7348_v59 = vld [vmem:[#allocation2 + $0x68] ss:$0 sps:$4 sm:$0x11]   ;;  %v2175_v54 = vshrl.u32 %v7309_v7, 16  ;;  %6408 = vmatprep.subr.msk.bf16.mxu0 %vm2778_vm10, %v6517_v44 }
  0x87   : > { %v1668_v63 = vor.u32 %v1667_v12, %v1663_v8  ;;  %v1880_v26 = vrot.slane %v5976_v18, 1  ;;  %v7354_v2 = vld [vmem:[#allocation2 + $0x70] sm:$0xf]  ;;  %v2780_v6 = vsel %vm2778_vm10, %v6517_v44, 0  ;;  %v488_v14 = vshrl.u32 %v302_v49, 16 }
  0x88   : > { %v485_v30 = vsel %vm6906_vm8, %v477_v25, %v484_v42  ;;  %v7362_v12 = vld [vmem:[#allocation2 + $0x68] ss:$0 sps:$4 sm:$0x11]   ;;  %6333 = vmatpush3.bf16.msra.mxu0 %v2780_v6  ;;  %v496_v41 = vshrl.u32 %v303_v50, 16  ;;  %v499_v23 = vshll.u32 %v303_v50, 16  ;;  %v1885_v9 = vsel %vm1349_vm5, %v1883_v51, %v1884_v13 }
  0x89   : > { %1281 = vrot.lane.b32.xlu1 %v1160_v3, %s6720_s25  ;;  %v1680_v3 = vor.u32 %v1679_v16, %v1675_v24  ;;  %709 = vst.msk [vmem:[#allocation2 + $0x7c] sm:$0xf] %vm226_vm0, %v485_v30  ;;  %v1673_v4 = vsel %vm1076_vm6, %v1668_v63, %v1672_v37  ;;  %v1882_v8 = vsel %vm1349_vm5, %v1880_v26, %v1881_v36  ;;  %v1176_v24 = vshll.u32 %v7334_v46, 16  ;;  %v713_v25 = vld [vmem:[#allocation2 + $0x84] sm:$0xf] }
  0x8a   : > { %2430 = vrot.lane.b32.xlu0 %v2388_v43, %s6724_s8  ;;  %v710_v43 = vld [vmem:[#allocation2 + $0x80] sm:$0x1]  ;;  %v491_v16 = vshll.u32 %v302_v49, 16  ;;  %v490_v18 = vrot.slane %v488_v14, 7  ;;  %v505_v20 = vshrl.u32 %v7342_v56, 16  ;;  %v2187_v31 = vshrl.u32 %v7327_v35, 16 }
  0x8b   : > { %v1685_v58 = vsel %vm1076_vm6, %v1680_v3, %v1684_v40  ;;  %v2194_v19 = vshll.u32 %v7346_v55, 16  ;;  %v498_v32 = vrot.slane %v496_v41, 7  ;;  %v2182_v36 = vshll.u32 %v7348_v59, 16  ;;  %v717_v40 = vld [vmem:[#allocation2 + $0x8c] sm:$0x1] }
  0x8c   : > { %v493_v39 = vor.u32 %v491_v16, %v490_v18  ;;  %v494_v3 = vrot.slane %v490_v18, 4  ;;  %v1178_v42 = vrot.slane %v1176_v24, 1  ;;  %v938_v37 = vld [vmem:[#allocation2 + $0x60] sm:$0xe]  ;;  %v7383_v50 = vrot.slane %v505_v20, 7 }
  0x8d   : > { %1283 = vrot.lane.b32.xlu1 %v1172_v45, %s6720_s25  ;;  %v486_v45 = vrot.slane %v481_v29, 4  ;;  %v501_v44 = vor.u32 %v499_v23, %v498_v32  ;;  %v503_v63 = vrot.slane %v498_v32, 4  ;;  %v508_v51 = vshll.u32 %v7342_v56, 16  ;;  %v812_v14 = vld [vmem:[#allocation2 + $0x6c] sm:$0xe] }
  0x8e   : > { %2432 = vrot.lane.b32.xlu0 %v2391_v34, %s6724_s8  ;;  %v2179_v34 = vrot.slane %v2177_v17, 1  ;;  %v1174_v17 = vshrl.u32 %v7334_v46, 16  ;;  %v714_v49 = vsel %vm6898_vm7, %v493_v39, %v713_v25  ;;  %v2196_v30 = vrot.slane %v2194_v19, 1  ;;  %v7398_v24 = vld [vmem:[%s6887_s23 + $0x5c] sm:$0xf] }
  0x8f   : > { %715 = vst [vmem:[#allocation2 + $0x84] sm:$0xf] %v714_v49  ;;  %v6024_v56 = vcombine.low %v938_v37, %v7299_v15  ;;  %v720_v18 = vld [vmem:[#allocation2 + $0x90] sm:$0xf]  ;;  %v811_v19 = vld [vmem:[#allocation2 + $0x60] sm:$0xe] }
  0x90   : > { %v2180_v6 = vor.u32 %v2179_v34, %v2175_v54  ;;  %v1179_v41 = vor.u32 %v1178_v42, %v1174_v17  ;;  %v835_v32 = vld [vmem:[#allocation2 + $0x6c] sm:$0xf]  ;;  %v836_v25 = vld [vmem:[#allocation2 + $0x70] sm:$0xf]  ;;  %v513_v39 = vshrl.u32 %v7398_v24, 16  ;;  %v2396_v37 = vrot.slane %v7346_v55, 1 }
  0x91   : > { %1412 = vrot.lane.b32.xlu1 %v1373_v62, %s6719_s24  ;;  %v2189_v62 = vshll.u32 %v7327_v35, 16  ;;  %v2392_v17 = vrot.slane %v6024_v56, 1  ;;  %vm2586_vm15 = vcmask 162816   ;;  %vm2619_vm1 = vcmask 195584  }
  0x92   : > { %1410 = vrot.lane.b32.xlu0 %v1370_v57, %s6719_s24  ;;  %vm2685_vm3 = vcmask 261120   ;;  %vm2652_vm10 = vcmask 228352   ;;  %vm2745_vm2 = vcmask 293888  }
  0x93   : > { %v2191_v57 = vrot.slane %v2189_v62, 1  ;;  %v718_v62 = vsel %vm6925_vm9, %v503_v63, %v717_v40  ;;  %v7426_v63 = vcombine.low %v835_v32, %v836_v25 }
  0x94   : > { %719 = vst [vmem:[#allocation2 + $0x8c] sm:$0x1] %v718_v62  ;;  %v515_v62 = vrot.slane %v513_v39, 7 }
  0x95   : > { %1524 = vrot.lane.b32.xlu1 %v7283_v28, %s6721_s26  ;;  %v711_v28 = vsel %vm6925_vm9, %v486_v45, %v710_v43  ;;  %v1181_v43 = vshll.u32 %v7362_v12, 16  ;;  %v2192_v13 = vor.u32 %v2191_v57, %v2187_v31  ;;  %v7386_v45 = vld [vmem:[#allocation2 + $0x74] ss:$0 sps:$4 sm:$0x11]   ;;  %v837_v31 = vld [vmem:[#allocation2 + $0x78] sm:$0xf] }
  0x96   : > { %1522 = vrot.lane.b32.xlu0 %v7279_v53, %s6721_s26  ;;  %712 = vst [vmem:[#allocation2 + $0x80] sm:$0x1] %v711_v28  ;;  %v7368_v53 = vcombine.low %v773_v61, %v7354_v2  ;;  %v939_v28 = vld [vmem:[#allocation2 + $0x6c] sm:$0xe]  ;;  %v1193_v34 = vshll.u32 %v7386_v45, 16  ;;  %v1378_v49 = vrot.slane %v7386_v45, 1 }
  0x97   : > { %v7374_v29 = vpop.permute.xlu1 %1398  ;;  %v6025_v20 = vcombine.low %v939_v28, %v7315_v21  ;;  %v2197_v15 = vsel %vm1076_vm6, %v2192_v13, %v2196_v30  ;;  %v7409_v57 = vld [vmem:[#allocation2 + $0x7c] sm:$0xf]  ;;  %v2393_v21 = vrot.slane %v7348_v59, 1  ;;  %v7434_v13 = vld [vmem:[#allocation2 + $0x74] ss:$0 sps:$4 sm:$0x11]  }
  0x98   : > { %v1188_v26 = vshll.u32 %v7368_v53, 16  ;;  %v1186_v23 = vshrl.u32 %v7368_v53, 16  ;;  %v516_v28 = vshll.u32 %v7398_v24, 16 }
  0x99   : > { %1796 = vrot.lane.b32.xlu1 %v1685_v58, %s6725_s9  ;;  %v502_v58 = vsel %vm6906_vm8, %v494_v3, %v501_v44  ;;  %v7393_v61 = vpop.permute.xlu0 %1269  ;;  %v2395_v44 = vrot.slane %v6025_v20, 1  ;;  %v2394_v30 = vsel %vm1349_vm5, %v2392_v17, %v2393_v21  ;;  %v1687_v20 = vshrl.u32 %v7426_v63, 16  ;;  %v307_v17 = vld [vmem:[%s6887_s23 + $0x64] sm:$0xf] }
  0x9a   : > { %1794 = vrot.lane.b32.xlu0 %v1673_v4, %s6725_s9  ;;  %716 = vst.msk [vmem:[#allocation2 + $0x88] sm:$0xf] %vm226_vm0, %v502_v58  ;;  %v2184_v4 = vrot.slane %v2182_v36, 1  ;;  %v1190_v54 = vrot.slane %v1188_v26, 1  ;;  %v875_v58 = vld [vmem:[#allocation2 + $0x6c] sm:$0xe] }
  0x9c   : > { %v2185_v36 = vsel %vm1076_vm6, %v2180_v6, %v2184_v4  ;;  %v1191_v42 = vor.u32 %v1190_v54, %v1186_v23  ;;  %v511_v4 = vrot.slane %v7383_v50, 4  ;;  %v306_v23 = vld [vmem:[%s6887_s23 + $0x60] sm:$0xf] }
  0x9d   : > { %1924 = vrot.lane.b32.xlu1 %v1885_v9, %s6723_s7  ;;  %v510_v9 = vor.u32 %v508_v51, %v7383_v50  ;;  %v5930_v51 = vcombine.low %v811_v19, %v7319_v33  ;;  %v7442_v6 = vld [vmem:[#allocation2 + $0x80] ss:$0 sps:$4 sm:$0x11]   ;;  %v1689_v33 = vshll.u32 %v7426_v63, 16  ;;  %v724_v50 = vld [vmem:[#allocation2 + $0x98] sm:$0x1] }
  0x9e   : > { %1922 = vrot.lane.b32.xlu0 %v1882_v8, %s6723_s7  ;;  %v1183_v8 = vrot.slane %v1181_v43, 1  ;;  %v1195_v43 = vrot.slane %v1193_v34, 1  ;;  %v876_v34 = vld [vmem:[#allocation2 + $0x78] sm:$0xe]  ;;  %v1694_v19 = vshll.u32 %v7434_v13, 16  ;;  %v522_v21 = vshrl.u32 %v306_v23, 16 }
  0x9f   : > { %v1374_v24 = vrot.slane %v5930_v51, 1  ;;  %v1691_v32 = vrot.slane %v1689_v33, 1  ;;  %v775_v51 = vld [vmem:[#allocation2 + $0x78] sm:$0xf] }
  0xa0   : > { %v7402_v16 = vpop.permute.xlu1 %1512  ;;  %v1184_v40 = vsel %vm1076_vm6, %v1179_v41, %v1183_v8  ;;  %v1196_v45 = vsel %vm1076_vm6, %v1191_v42, %v1195_v43  ;;  %v1375_v41 = vrot.slane %v7362_v12, 1  ;;  %v5978_v8 = vcombine.low %v875_v58, %v836_v25  ;;  %v902_v42 = vld [vmem:[#allocation2 + $0x84] sm:$0xf]  ;;  %v727_v58 = vld [vmem:[#allocation2 + $0x9c] sm:$0xf] }
  0xa1   : > { %2036 = vrot.lane.b32.xlu1 %v7327_v35, %s6722_s27  ;;  %v5931_v35 = vcombine.low %v812_v14, %v7354_v2  ;;  %v721_v2 = vsel %vm6898_vm7, %v510_v9, %v720_v18  ;;  %v2397_v9 = vsel %vm1349_vm5, %v2395_v44, %v2396_v37  ;;  %v7468_v43 = vld [vmem:[#allocation2 + $0x88] sm:$0xf]  ;;  %v5979_v37 = vcombine.low %v876_v34, %v7409_v57 }
  0xa2   : > { %2034 = vrot.lane.b32.xlu0 %v7309_v7, %s6722_s27  ;;  %v7422_v7 = vcombine.low %v837_v31, %v7409_v57  ;;  %722 = vst [vmem:[#allocation2 + $0x90] sm:$0xf] %v721_v2  ;;  %v1887_v2 = vrot.slane %v7434_v13, 1  ;;  %v1376_v44 = vsel %vm1349_vm5, %v1374_v24, %v1375_v41  ;;  %v524_v57 = vrot.slane %v522_v21, 7  ;;  %v777_v21 = vld [vmem:[#allocation2 + $0x84] sm:$0xf] }
  0xa3   : > { %v1377_v26 = vrot.slane %v5931_v35, 1  ;;  %v1706_v35 = vshll.u32 %v7442_v6, 16  ;;  %v1696_v33 = vrot.slane %v1694_v19, 1  ;;  %v530_v24 = vshrl.u32 %v307_v17, 16 }
  0xa4   : > { %v7417_v3 = vpop.permute.xlu0 %1510  ;;  %v1701_v55 = vshll.u32 %v7422_v7, 16  ;;  %v1699_v31 = vshrl.u32 %v7422_v7, 16  ;;  %v533_v41 = vshll.u32 %v307_v17, 16 }
  0xa5   : > { %2308 = vrot.lane.b32.xlu1 %v2197_v15, %s6726_s10  ;;  %v1379_v18 = vsel %vm1349_vm5, %v1377_v26, %v1378_v49  ;;  %v518_v15 = vor.u32 %v516_v28, %v515_v62  ;;  %v900_v26 = vld [vmem:[#allocation2 + $0x78] sm:$0xf]  ;;  %v7473_v49 = vld [vmem:[#allocation2 + $0x7c] sm:$0xf]  ;;  %v1708_v28 = vrot.slane %v1706_v35, 1 }
  0xa6   : > { %2306 = vrot.lane.b32.xlu0 %v2185_v36, %s6726_s10  ;;  %v1703_v12 = vrot.slane %v1701_v55, 1  ;;  %v520_v36 = vrot.slane %v515_v62, 4  ;;  %v7480_v55 = vld [vmem:[#allocation2 + $0x7c] sm:$0xf]  ;;  %v731_v35 = vld [vmem:[#allocation2 + $0xa4] sm:$0x1] }
  0xa7   : > { %v7429_v59 = vpop.permute.xlu1 %2024  ;;  %v519_v25 = vsel %vm6906_vm8, %v511_v4, %v518_v15  ;;  %v7483_v4 = vcombine.low %v902_v42, %v7468_v43  ;;  %v7490_v15 = vcombine.low %v900_v26, %v7473_v49  ;;  %v7496_v34 = vcombine.low %v775_v51, %v7480_v55  ;;  %v7519_v26 = vld [vmem:[#allocation2 + $0x80] ss:$0 sps:$4 sm:$0x11]  }
  0xa8   : > { %v7438_v56 = vpop.permute.xlu0 %2022  ;;  %723 = vst.msk [vmem:[#allocation2 + $0x94] sm:$0xf] %vm226_vm0, %v519_v25  ;;  %v1704_v13 = vor.u32 %v1703_v12, %v1699_v31  ;;  %v528_v31 = vrot.slane %v524_v57, 4  ;;  %v532_v12 = vrot.slane %v530_v24, 7  ;;  %v1890_v25 = vrot.slane %v7442_v6, 1 }
  0xa9   : > { %1285 = vrot.lane.b32.xlu1 %v1184_v40, %s6720_s25  ;;  %v1886_v40 = vrot.slane %v5978_v8, 1  ;;  %v2213_v17 = vshll.u32 %v7483_v4, 16 }
  0xaa   : > { %2434 = vrot.lane.b32.xlu0 %v2394_v30, %s6724_s8  ;;  %v725_v30 = vsel %vm6925_vm9, %v520_v36, %v724_v50  ;;  %v7502_v36 = vld [vmem:[#allocation2 + $0x8c] ss:$0 sps:$4 sm:$0x11]  }
  0xab   : > { %v7448_v14 = vpop.permute.xlu1 %1400  ;;  %726 = vst [vmem:[#allocation2 + $0x98] sm:$0x1] %v725_v30  ;;  %v7523_v30 = vld [vmem:[#allocation2 + $0x80] ss:$0 sps:$4 sm:$0x11]   ;;  %v2215_v24 = vrot.slane %v2213_v17, 1 }
  0xac   : > { %v7455_v54 = vpop.permute.xlu0 %1910 }
  0xad   : > { %1287 = vrot.lane.b32.xlu1 %v1196_v45, %s6720_s25  ;;  %v525_v45 = vshll.u32 %v306_v23, 16  ;;  %v2456_v23 = vsel %vm2454_vm11, %v6892_v10, %v7393_v61 }
  0xae   : > { %2436 = vrot.lane.b32.xlu0 %v2397_v9, %s6724_s8  ;;  %v1692_v9 = vor.u32 %v1691_v32, %v1687_v20  ;;  %v1709_v20 = vsel %vm1076_vm6, %v1704_v13, %v1708_v28  ;;  %v1889_v32 = vrot.slane %v5979_v37, 1  ;;  %v2489_v6 = vsel %vm2487_vm12, %v2456_v23, %v7374_v29 }
  0xaf   : > { %v7465_v39 = vpop.permute.xlu1 %1912  ;;  %v527_v50 = vor.u32 %v525_v45, %v524_v57  ;;  %v2201_v37 = vshll.u32 %v7490_v15, 16  ;;  %v1200_v29 = vshll.u32 %v7496_v34, 16  ;;  %v2206_v23 = vshll.u32 %v7519_v26, 16 }
  0xb0   : > { %v7477_v62 = vpop.permute.xlu0 %2422 }
  0xb1   : > { %1416 = vrot.lane.b32.xlu1 %v1379_v18, %s6719_s24  ;;  %v7487_v18 = vsel %vm1349_vm5, %v1886_v40, %v1887_v2  ;;  %v728_v10 = vsel %vm6898_vm7, %v527_v50, %v727_v58  ;;  %v7509_v40 = vld [vmem:[#allocation2 + $0x88] sm:$0xf]  ;;  %v537_v2 = vrot.slane %v532_v12, 4  ;;  %v2522_v58 = vsel %vm2520_vm13, %v2489_v6, %v7417_v3 }
  0xb2   : > { %1414 = vrot.lane.b32.xlu0 %v1376_v44, %s6719_s24  ;;  %729 = vst [vmem:[#allocation2 + $0x9c] sm:$0xf] %v728_v10  ;;  %v7536_v57 = vcombine.low %v777_v21, %v7509_v40  ;;  %v2211_v3 = vshrl.u32 %v7483_v4, 16  ;;  %v2199_v50 = vshrl.u32 %v7490_v15, 16 }
  0xb3   : > { %v1785_v8 = vpop.permute.xlu1 %1784  ;;  %v7557_v10 = vld [vmem:[#allocation2 + $0x8c] ss:$0 sps:$4 sm:$0x11]  }
  0xb4   : > { %v1272_v19 = vpop.permute.xlu0 %1271  ;;  %v2216_v21 = vor.u32 %v2215_v24, %v2211_v3  ;;  %v7580_v3 = vld [vmem:[#allocation2 + $0x94] sm:$0xf] }
  0xb5   : > { %1528 = vrot.lane.b32.xlu1 %v7422_v7, %s6721_s26  ;;  %v2458_v61 = vsel %vm2454_vm11, %v6967_v52, %v1272_v19  ;;  %v535_v7 = vor.u32 %v533_v41, %v532_v12  ;;  %v1697_v52 = vsel %vm1076_vm6, %v1692_v9, %v1696_v33  ;;  %v1891_v33 = vsel %vm1349_vm5, %v1889_v32, %v1890_v25 }
  0xb6   : > { %v2491_v42 = vsel %vm2487_vm12, %v2458_v61, %v7448_v14  ;;  %1526 = vrot.lane.b32.xlu0 %v7426_v63, %s6721_s26  ;;  %v732_v63 = vsel %vm6925_vm9, %v537_v2, %v731_v35  ;;  %v940_v35 = vld [vmem:[#allocation2 + $0x78] sm:$0xe]  ;;  %v2203_v19 = vrot.slane %v2201_v37, 1  ;;  %v1202_v25 = vrot.slane %v1200_v29, 1  ;;  %v814_v37 = vld [vmem:[#allocation2 + $0x84] sm:$0xe] }
  0xb7   : > { %v2297_v44 = vpop.permute.xlu1 %2296  ;;  %v2524_v51 = vsel %vm2520_vm13, %v2491_v42, %v7402_v16  ;;  %v536_v14 = vsel %vm6906_vm8, %v528_v31, %v535_v7  ;;  %v2218_v16 = vshll.u32 %v7502_v36, 16  ;;  %733 = vst [vmem:[#allocation2 + $0xa4] sm:$0x1] %v732_v63  ;;  %v308_v31 = vld [vmem:[%s6887_s23 + $0x68] sm:$0xf]  ;;  %v1212_v61 = vshll.u32 %v7536_v57, 16 }
  0xb8   : > { %v2557_v13 = vsel %vm2553_vm14, %v2524_v51, %v1785_v8  ;;  %v1783_v28 = vpop.permute.xlu0 %1782  ;;  %730 = vst.msk [vmem:[#allocation2 + $0xa0] sm:$0xf] %vm226_vm0, %v536_v14  ;;  %v539_v7 = vshrl.u32 %v308_v31, 16  ;;  %v941_v42 = vld [vmem:[#allocation2 + $0x84] sm:$0xe]  ;;  %v6026_v51 = vcombine.low %v940_v35, %v7473_v49  ;;  %v1210_v14 = vshrl.u32 %v7536_v57, 16 }
  0xb9   : > { %1800 = vrot.lane.b32.xlu1 %v1709_v20, %s6725_s9  ;;  %v2555_v45 = vsel %vm2553_vm14, %v2522_v58, %v1783_v28  ;;  %v2590_v41 = vsel %vm2586_vm15, %v2557_v13, %v7465_v39  ;;  %v1198_v20 = vshrl.u32 %v7496_v34, 16  ;;  %v1205_v39 = vshll.u32 %v7523_v30, 16  ;;  %v839_v63 = vld [vmem:[#allocation2 + $0x84] sm:$0xf] }
  0xba   : > { %v2588_v8 = vsel %vm2586_vm15, %v2555_v45, %v7455_v54  ;;  %1798 = vrot.lane.b32.xlu0 %v1697_v52, %s6725_s9  ;;  %v2220_v54 = vrot.slane %v2218_v16, 1  ;;  %v2623_v17 = vsel %vm2619_vm1, %v2590_v41, %v7429_v59  ;;  %v2208_v52 = vrot.slane %v2206_v23, 1  ;;  %v841_v16 = vld [vmem:[#allocation2 + $0x90] sm:$0xf]  ;;  %v7576_v45 = vld [vmem:[#allocation2 + $0x88] sm:$0xf] }
  0xbb   : > { %v7547_v9 = vpop.permute.xlu1 %1273  ;;  %v2621_v12 = vsel %vm2619_vm1, %v2588_v8, %v7438_v56  ;;  %v2204_v59 = vor.u32 %v2203_v19, %v2199_v50  ;;  %v1207_v29 = vrot.slane %v1205_v39, 1  ;;  %v2656_v58 = vsel %vm2652_vm10, %v2623_v17, %v2297_v44  ;;  %v309_v8 = vld [vmem:[%s6887_s23 + $0x6c] sm:$0xf]  ;;  %v813_v19 = vld [vmem:[#allocation2 + $0x78] sm:$0xe] }
  0xbc   : > { %v2295_v32 = vpop.permute.xlu0 %2294  ;;  %v1214_v13 = vrot.slane %v1212_v61, 1  ;;  %v1217_v28 = vshll.u32 %v7557_v10, 16  ;;  %v7582_v24 = vrot.slane %v539_v7, 7  ;;  %v542_v44 = vshll.u32 %v308_v31, 16  ;;  %v7611_v7 = vld [vmem:[%s6887_s23 + $0x70] sm:$0xf] }
  0xbd   : > { %1928 = vrot.lane.b32.xlu1 %v1891_v33, %s6723_s7  ;;  %v2654_v56 = vsel %vm2652_vm10, %v2621_v12, %v2295_v32  ;;  %v2221_v33 = vsel %vm1076_vm6, %v2216_v21, %v2220_v54  ;;  %v6027_v41 = vcombine.low %v941_v42, %v7468_v43  ;;  %v2209_v50 = vsel %vm1076_vm6, %v2204_v59, %v2208_v52  ;;  %v877_v54 = vld [vmem:[#allocation2 + $0x84] sm:$0xe]  ;;  %v734_v21 = vld [vmem:[#allocation2 + $0xa8] sm:$0xf] }
  0xbe   : > { %1926 = vrot.lane.b32.xlu0 %v7487_v18, %s6723_s7  ;;  %v2687_v2 = vsel %vm2685_vm3, %v2654_v56, %v7477_v62  ;;  %v1203_v62 = vor.u32 %v1202_v25, %v1198_v20  ;;  %v2398_v23 = vrot.slane %v6026_v51, 1  ;;  %v2399_v12 = vrot.slane %v7519_v26, 1 }
  0xbf   : > { %v7567_v6 = vpop.permute.xlu1 %1275  ;;  %6334 = vmatprep.mubr.msk.bf16.mxu0 %vm2745_vm2, %v2687_v2  ;;  %v5933_v35 = vcombine.low %v814_v37, %v7509_v40  ;;  %v7602_v31 = vcombine.low %v839_v63, %v7576_v45  ;;  %v1215_v39 = vor.u32 %v1214_v13, %v1210_v14  ;;  %v1219_v32 = vrot.slane %v1217_v28, 1  ;;  %v7615_v37 = vld [vmem:[#allocation2 + $0x8c] ss:$0 sps:$4 sm:$0x11]  }
  0xc0   : > { %v2425_v18 = vpop.permute.xlu0 %2424  ;;  %v1208_v43 = vsel %vm1076_vm6, %v1203_v62, %v1207_v29  ;;  %v544_v26 = vor.u32 %v542_v44, %v7582_v24  ;;  %v547_v40 = vshrl.u32 %v309_v8, 16  ;;  %v2401_v61 = vrot.slane %v6027_v41, 1  ;;  %v7623_v14 = vld [vmem:[#allocation2 + $0x98] ss:$0 sps:$4 sm:$0x11]  }
  0xc1   : > { %2040 = vrot.lane.b32.xlu1 %v7483_v4, %s6722_s27  ;;  %v2689_v49 = vsel %vm2685_vm3, %v2656_v58, %v2425_v18  ;;  %v2402_v17 = vrot.slane %v7502_v36, 1  ;;  %v5932_v56 = vcombine.low %v813_v19, %v7480_v55  ;;  %v2400_v2 = vsel %vm1349_vm5, %v2398_v23, %v2399_v12 }
  0xc2   : > { %2038 = vrot.lane.b32.xlu0 %v7490_v15, %s6722_s27  ;;  %6335 = vmatmul.mubr.msk.bf16.vlgmr.msra.gmra.mrb[0].mxu0 %vm2745_vm2, %v2689_v49  ;;  %v7599_v15 = vcombine.low %v841_v16, %v7580_v3  ;;  %v1383_v42 = vrot.slane %v5933_v35, 1  ;;  %v1384_v52 = vrot.slane %v7557_v10, 1  ;;  %v550_v51 = vshll.u32 %v309_v8, 16 }
  0xc3   : > { %v7588_v4 = vpop.permute.xlu1 %1404  ;;  %v1713_v36 = vshll.u32 %v7602_v31, 16  ;;  %v5980_v55 = vcombine.low %v877_v54, %v7576_v45  ;;  %v1220_v63 = vsel %vm1076_vm6, %v1215_v39, %v1219_v32  ;;  %v545_v58 = vrot.slane %v7582_v24, 4  ;;  %v738_v45 = vld [vmem:[#allocation2 + $0xb0] sm:$0x1]  ;;  %v878_v24 = vld [vmem:[#allocation2 + $0x90] sm:$0xe] }
  0xc4   : > { %v7594_v20 = vpop.permute.xlu0 %1402  ;;  %v1725_v29 = vshll.u32 %v7599_v15, 16  ;;  %v549_v10 = vrot.slane %v547_v40, 7  ;;  %v735_v18 = vsel %vm6898_vm7, %v544_v26, %v734_v21  ;;  %v2403_v13 = vsel %vm1349_vm5, %v2401_v61, %v2402_v17  ;;  %v904_v54 = vld [vmem:[#allocation2 + $0x90] sm:$0xf]  ;;  %v7645_v26 = vld [vmem:[#allocation2 + $0x94] sm:$0xf] }
  0xc5   : > { %2312 = vrot.lane.b32.xlu1 %v2221_v33, %s6726_s10  ;;  %v1380_v28 = vrot.slane %v5932_v56, 1  ;;  %v1381_v16 = vrot.slane %v7523_v30, 1  ;;  %736 = vst [vmem:[#allocation2 + $0xa8] sm:$0xf] %v735_v18  ;;  %v556_v49 = vshrl.u32 %v7611_v7, 16  ;;  %v1385_v33 = vsel %vm1349_vm5, %v1383_v42, %v1384_v52 }
  0xc6   : > { %2310 = vrot.lane.b32.xlu0 %v2209_v50, %s6726_s10  ;;  %v1711_v44 = vshrl.u32 %v7602_v31, 16  ;;  %v552_v41 = vor.u32 %v550_v51, %v549_v10  ;;  %v554_v8 = vrot.slane %v549_v10, 4  ;;  %v311_v50 = vld [vmem:[%s6887_s23 + $0x74] sm:$0xf]  ;;  %v1723_v12 = vshrl.u32 %v7599_v15, 16 }
  0xc7   : > { %v7606_v25 = vpop.permute.xlu1 %1516  ;;  %v1727_v30 = vrot.slane %v1725_v29, 1  ;;  %v1730_v35 = vshll.u32 %v7623_v14, 16  ;;  %v1718_v19 = vshll.u32 %v7615_v37, 16  ;;  %v1715_v39 = vrot.slane %v1713_v36, 1  ;;  %v7656_v42 = vld [vmem:[#allocation2 + $0xa0] sm:$0xf] }
  0xc8   : > { %v7617_v59 = vpop.permute.xlu0 %1514  ;;  %v1892_v32 = vrot.slane %v5980_v55, 1  ;;  %v553_v40 = vsel %vm6906_vm8, %v545_v58, %v552_v41  ;;  %v739_v61 = vsel %vm6925_vm9, %v554_v8, %v738_v45  ;;  %v1382_v56 = vsel %vm1349_vm5, %v1380_v28, %v1381_v16  ;;  %v779_v28 = vld [vmem:[#allocation2 + $0x90] sm:$0xf] }
  0xc9   : > { %1289 = vrot.lane.b32.xlu1 %v1208_v43, %s6720_s25  ;;  %v312_v43 = vld [vmem:[%s6887_s23 + $0x78] sm:$0xf]  ;;  %v5981_v21 = vcombine.low %v878_v24, %v7580_v3  ;;  %737 = vst.msk [vmem:[#allocation2 + $0xac] sm:$0xf] %vm226_vm0, %v553_v40  ;;  %740 = vst [vmem:[#allocation2 + $0xb0] sm:$0x1] %v739_v61  ;;  %v1728_v3 = vor.u32 %v1727_v30, %v1723_v12 }
  0xca   : > { %2438 = vrot.lane.b32.xlu0 %v2400_v2, %s6724_s8  ;;  %v906_v2 = vld [vmem:[#allocation2 + $0x9c] sm:$0xf]  ;;  %v558_v52 = vrot.slane %v556_v49, 7  ;;  %v559_v51 = vshll.u32 %v7611_v7, 16  ;;  %v1893_v29 = vrot.slane %v7615_v37, 1  ;;  %v564_v36 = vshrl.u32 %v311_v50, 16 }
  0xcb   : > { %v7630_v62 = vpop.permute.xlu1 %1788  ;;  %v567_v55 = vshll.u32 %v311_v50, 16  ;;  %v573_v58 = vshrl.u32 %v312_v43, 16  ;;  %v1732_v18 = vrot.slane %v1730_v35, 1  ;;  %v7668_v45 = vcombine.low %v906_v2, %v7656_v42  ;;  %v7670_v7 = vld [vmem:[#allocation2 + $0x94] sm:$0xf] }
  0xcc   : > { %v7638_v23 = vpop.permute.xlu0 %1786  ;;  %v561_v16 = vor.u32 %v559_v51, %v558_v52  ;;  %v562_v37 = vrot.slane %v558_v52, 4  ;;  %v566_v49 = vrot.slane %v564_v36, 7  ;;  %v1720_v8 = vrot.slane %v1718_v19, 1  ;;  %v745_v30 = vld [vmem:[#allocation2 + $0xbc] sm:$0x1] }
  0xcd   : > { %1291 = vrot.lane.b32.xlu1 %v1220_v63, %s6720_s25  ;;  %v741_v63 = vld [vmem:[#allocation2 + $0xb4] sm:$0xf]  ;;  %v7672_v24 = vrot.slane %v573_v58, 7  ;;  %v1895_v50 = vrot.slane %v5981_v21, 1  ;;  %v1896_v35 = vrot.slane %v7623_v14, 1  ;;  %v576_v61 = vshll.u32 %v312_v43, 16 }
  0xce   : > { %2440 = vrot.lane.b32.xlu0 %v2403_v13, %s6724_s8  ;;  %v7665_v13 = vcombine.low %v904_v54, %v7645_v26  ;;  %v742_v12 = vsel %vm6898_vm7, %v561_v16, %v741_v63  ;;  %v569_v54 = vor.u32 %v567_v55, %v566_v49  ;;  %v571_v40 = vrot.slane %v566_v49, 4  ;;  %v748_v2 = vld [vmem:[#allocation2 + $0xc0] sm:$0xf]  ;;  %v7692_v51 = vld [vmem:[#allocation2 + $0x98] ss:$0 sps:$4 sm:$0x11]  }
  0xcf   : > { %v7652_v17 = vpop.permute.xlu1 %1916  ;;  %743 = vst [vmem:[#allocation2 + $0xb4] sm:$0xf] %v742_v12  ;;  %v7689_v21 = vcombine.low %v779_v28, %v7670_v7  ;;  %v2237_v14 = vshll.u32 %v7668_v45, 16  ;;  %v578_v36 = vor.u32 %v576_v61, %v7672_v24  ;;  %v2460_v55 = vsel %vm2454_vm11, %v6975_v1, %v7547_v9  ;;  %v7706_v28 = vld [vmem:[#allocation2 + $0xa0] sm:$0xf] }
  0xd0   : > { %v7661_v10 = vpop.permute.xlu0 %1914  ;;  %v2225_v19 = vshll.u32 %v7665_v13, 16  ;;  %v570_v43 = vsel %vm6906_vm8, %v562_v37, %v569_v54  ;;  %v2493_v16 = vsel %vm2487_vm12, %v2460_v55, %v7594_v20  ;;  %v1897_v37 = vsel %vm1349_vm5, %v1895_v50, %v1896_v35  ;;  %v7714_v9 = vld [vmem:[#allocation2 + $0x98] ss:$0 sps:$4 sm:$0x11]  }
  0xd1   : > { %1420 = vrot.lane.b32.xlu1 %v1385_v33, %s6719_s24  ;;  %v1716_v33 = vor.u32 %v1715_v39, %v1711_v44  ;;  %v7683_v44 = vld [vmem:[#allocation2 + $0x90] sm:$0xe]  ;;  %v7686_v39 = vld [vmem:[#allocation2 + $0xa4] ss:$0 sps:$4 sm:$0x11]   ;;  %v2223_v20 = vshrl.u32 %v7665_v13, 16 }
  0xd2   : > { %1418 = vrot.lane.b32.xlu0 %v1382_v56, %s6719_s24  ;;  %v1733_v56 = vsel %vm1076_vm6, %v1728_v3, %v1732_v18  ;;  %v1894_v3 = vsel %vm1349_vm5, %v1892_v32, %v1893_v29  ;;  %v781_v18 = vld [vmem:[#allocation2 + $0x9c] sm:$0xf]  ;;  %744 = vst.msk [vmem:[#allocation2 + $0xb8] sm:$0xf] %vm226_vm0, %v570_v43  ;;  %v6028_v1 = vcombine.low %v7683_v44, %v7645_v26  ;;  %v2242_v49 = vshll.u32 %v7686_v39, 16 }
  0xd3   : > { %v7675_v41 = vpop.permute.xlu1 %2028  ;;  %v1721_v58 = vsel %vm1076_vm6, %v1716_v33, %v1720_v8  ;;  %v2526_v32 = vsel %vm2520_vm13, %v2493_v16, %v7617_v59  ;;  %v1224_v33 = vshll.u32 %v7689_v21, 16  ;;  %v2235_v22 = vshrl.u32 %v7668_v45, 16  ;;  %v7752_v43 = vld [vmem:[#allocation2 + $0xa4] ss:$0 sps:$4 sm:$0x11]  }
  0xd4   : > { %v2027_v52 = vpop.permute.xlu0 %2026  ;;  %v2559_v26 = vsel %vm2553_vm14, %v2526_v32, %v7638_v23  ;;  %v2239_v8 = vrot.slane %v2237_v14, 1  ;;  %v7728_v50 = vcombine.low %v781_v18, %v7706_v28  ;;  %v2462_v59 = vsel %vm2454_vm11, %v7018_v48, %v7567_v6  ;;  %v313_v48 = vld [vmem:[%s6887_s23 + $0x7c] sm:$0xf] }
  0xd5   : > { %1532 = vrot.lane.b32.xlu1 %v7599_v15, %s6721_s26  ;;  %v746_v15 = vsel %vm6925_vm9, %v571_v40, %v745_v30  ;;  %v2592_v12 = vsel %vm2586_vm15, %v2559_v26, %v7661_v10  ;;  %v2227_v35 = vrot.slane %v2225_v19, 1  ;;  %v2230_v23 = vshll.u32 %v7692_v51, 16 }
  0xd6   : > { %1530 = vrot.lane.b32.xlu0 %v7602_v31, %s6721_s26  ;;  %747 = vst [vmem:[#allocation2 + $0xbc] sm:$0x1] %v746_v15  ;;  %v749_v31 = vsel %vm6898_vm7, %v578_v36, %v748_v2  ;;  %v2495_v54 = vsel %vm2487_vm12, %v2462_v59, %v7588_v4  ;;  %v2625_v40 = vsel %vm2619_vm1, %v2592_v12, %v2027_v52  ;;  %v1222_v61 = vshrl.u32 %v7689_v21, 16 }
  0xd7   : > { %v2301_v63 = vpop.permute.xlu1 %2300  ;;  %750 = vst [vmem:[#allocation2 + $0xc0] sm:$0xf] %v749_v31  ;;  %v1229_v2 = vshll.u32 %v7714_v9, 16  ;;  %v2528_v6 = vsel %vm2520_vm13, %v2495_v54, %v7606_v25  ;;  %v2244_v44 = vrot.slane %v2242_v49, 1  ;;  %v1226_v19 = vrot.slane %v1224_v33, 1 }
  0xd8   : > { %v2299_v29 = vpop.permute.xlu0 %2298  ;;  %v2561_v4 = vsel %vm2553_vm14, %v2528_v6, %v7630_v62  ;;  %v2240_v14 = vor.u32 %v2239_v8, %v2235_v22  ;;  %v1236_v15 = vshll.u32 %v7728_v50, 16  ;;  %v2228_v55 = vor.u32 %v2227_v35, %v2223_v20  ;;  %v845_v22 = vld [vmem:[#allocation2 + $0xa8] sm:$0xf]  ;;  %v815_v35 = vld [vmem:[#allocation2 + $0x90] sm:$0xe] }
  0xd9   : > { %1804 = vrot.lane.b32.xlu1 %v1733_v56, %s6725_s9  ;;  %v2658_v10 = vsel %vm2652_vm10, %v2625_v40, %v2299_v29  ;;  %v2594_v25 = vsel %vm2586_vm15, %v2561_v4, %v7652_v17  ;;  %v2232_v18 = vrot.slane %v2230_v23, 1  ;;  %v1231_v16 = vrot.slane %v1229_v2, 1  ;;  %v943_v29 = vld [vmem:[#allocation2 + $0x9c] sm:$0xe]  ;;  %v7784_v40 = vld [vmem:[#allocation2 + $0xa0] sm:$0xf] }
  0xda   : > { %1802 = vrot.lane.b32.xlu0 %v1721_v58, %s6725_s9  ;;  %v581_v58 = vshrl.u32 %v313_v48, 16  ;;  %v2627_v62 = vsel %vm2619_vm1, %v2594_v25, %v7675_v41  ;;  %v1227_v17 = vor.u32 %v1226_v19, %v1222_v61  ;;  %v1234_v49 = vshrl.u32 %v7728_v50, 16  ;;  %v752_v4 = vld [vmem:[#allocation2 + $0xc8] sm:$0x1] }
  0xdb   : > { %v7736_v30 = vpop.permute.xlu1 %1277  ;;  %v2660_v31 = vsel %vm2652_vm10, %v2627_v62, %v2301_v63  ;;  %v2245_v33 = vsel %vm1076_vm6, %v2240_v14, %v2244_v44  ;;  %v1238_v41 = vrot.slane %v1236_v15, 1  ;;  %v1241_v26 = vshll.u32 %v7752_v43, 16  ;;  %v7776_v63 = vld [vmem:[#allocation2 + $0xac] sm:$0xf] }
  0xdc   : > { %v2427_v56 = vpop.permute.xlu0 %2426  ;;  %v584_v8 = vshll.u32 %v313_v48, 16  ;;  %v6029_v59 = vcombine.low %v943_v29, %v7656_v42  ;;  %v2233_v12 = vsel %vm1076_vm6, %v2228_v55, %v2232_v18  ;;  %v1232_v54 = vsel %vm1076_vm6, %v1227_v17, %v1231_v16  ;;  %v7807_v62 = vld [vmem:[#allocation2 + $0xb0] ss:$0 sps:$4 sm:$0x11]  }
  0xdd   : > { %1932 = vrot.lane.b32.xlu1 %v1897_v37, %s6723_s7  ;;  %v2691_v52 = vsel %vm2685_vm3, %v2658_v10, %v2427_v56  ;;  %v2404_v37 = vrot.slane %v6028_v1, 1  ;;  %v816_v1 = vld [vmem:[#allocation2 + $0x9c] sm:$0xe]  ;;  %v579_v61 = vrot.slane %v7672_v24, 4  ;;  %v1239_v2 = vor.u32 %v1238_v41, %v1234_v49  ;;  %v880_v41 = vld [vmem:[#allocation2 + $0xa8] sm:$0xe] }
  0xde   : > { %1930 = vrot.lane.b32.xlu0 %v1894_v3, %s6723_s7  ;;  %6338 = vmatprep.mubr.msk.bf16.mxu0 %vm2745_vm2, %v2691_v52  ;;  %v2405_v3 = vrot.slane %v7692_v51, 1  ;;  %v583_v51 = vrot.slane %v581_v58, 7  ;;  %v1243_v6 = vrot.slane %v1241_v26, 1  ;;  %v5935_v48 = vcombine.low %v816_v1, %v7706_v28 }
  0xdf   : > { %v7759_v36 = vpop.permute.xlu1 %1279  ;;  %v7789_v42 = vcombine.low %v845_v22, %v7776_v63  ;;  %v5934_v44 = vcombine.low %v815_v35, %v7670_v7  ;;  %v2407_v52 = vrot.slane %v6029_v59, 1  ;;  %v2408_v24 = vrot.slane %v7686_v39, 1  ;;  %v7826_v22 = vld [vmem:[#allocation2 + $0xb8] sm:$0xf]  ;;  %v908_v35 = vld [vmem:[#allocation2 + $0xa8] sm:$0xf] }
  0xe0   : > { %v2429_v32 = vpop.permute.xlu0 %2428  ;;  %v2406_v56 = vsel %vm1349_vm5, %v2404_v37, %v2405_v3  ;;  %v586_v19 = vor.u32 %v584_v8, %v583_v51  ;;  %v588_v28 = vrot.slane %v583_v51, 4  ;;  %v1390_v25 = vrot.slane %v7752_v43, 1  ;;  %v6551_v43 = vld [vmem:[#allocation2 + $0xa4] ss:$0 sps:$4 sm:$0x11]  }
  0xe1   : > { %2044 = vrot.lane.b32.xlu1 %v7668_v45, %s6722_s27  ;;  %v2693_v20 = vsel %vm2685_vm3, %v2660_v31, %v2429_v32  ;;  %v1244_v7 = vsel %vm1076_vm6, %v1239_v2, %v1243_v6  ;;  %v1389_v58 = vrot.slane %v5935_v48, 1  ;;  %v1749_v39 = vshll.u32 %v7789_v42, 16  ;;  %v879_v3 = vld [vmem:[#allocation2 + $0x9c] sm:$0xe]  ;;  %v783_v2 = vld [vmem:[#allocation2 + $0xa8] sm:$0xf] }
  0xe2   : > { %2042 = vrot.lane.b32.xlu0 %v7665_v13, %s6722_s27  ;;  %6339 = vmatmul.mubr.msk.bf16.gmra.mrb[4].mxu0 %vm2745_vm2, %v2693_v20  ;;  %v843_v13 = vld [vmem:[#allocation2 + $0x9c] sm:$0xf]  ;;  %v587_v55 = vsel %vm6906_vm8, %v579_v61, %v586_v19  ;;  %v753_v18 = vsel %vm6925_vm9, %v588_v28, %v752_v4  ;;  %v2409_v37 = vsel %vm1349_vm5, %v2407_v52, %v2408_v24  ;;  %v1386_v31 = vrot.slane %v5934_v44, 1  ;;  %v7838_v44 = vld [vmem:[#allocation2 + $0xac] sm:$0xf] }
  0xe3   : > { %v7774_v45 = vpop.permute.xlu1 %1408  ;;  %v7798_v14 = vcombine.low %v843_v13, %v7784_v40  ;;  %751 = vst.msk [vmem:[#allocation2 + $0xc4] sm:$0xf] %vm226_vm0, %v587_v55  ;;  %754 = vst [vmem:[#allocation2 + $0xc8] sm:$0x1] %v753_v18  ;;  %v1387_v32 = vrot.slane %v7714_v9, 1  ;;  %v1391_v60 = vsel %vm1349_vm5, %v1389_v58, %v1390_v25  ;;  %v1747_v49 = vshrl.u32 %v7789_v42, 16 }
  0xe4   : > { %v7780_v23 = vpop.permute.xlu0 %1406  ;;  %v1751_v20 = vrot.slane %v1749_v39, 1  ;;  %v1742_v1 = vshll.u32 %v6551_v43, 16  ;;  %v910_v9 = vld [vmem:[#allocation2 + $0xb4] sm:$0xf]  ;;  %v5983_v61 = vcombine.low %v880_v41, %v7776_v63  ;;  %v1899_v28 = vrot.slane %v6551_v43, 1 }
  0xe5   : > { %2316 = vrot.lane.b32.xlu1 %v2245_v33, %s6726_s10  ;;  %v1737_v29 = vshll.u32 %v7798_v14, 16  ;;  %v1754_v33 = vshll.u32 %v7807_v62, 16  ;;  %v1388_v51 = vsel %vm1349_vm5, %v1386_v31, %v1387_v32  ;;  %v1735_v8 = vshrl.u32 %v7798_v14, 16  ;;  %v785_v31 = vld [vmem:[#allocation2 + $0xb4] sm:$0xf] }
  0xe6   : > { %2314 = vrot.lane.b32.xlu0 %v2233_v12, %s6726_s10  ;;  %v5982_v12 = vcombine.low %v879_v3, %v7784_v40  ;;  %v1752_v6 = vor.u32 %v1751_v20, %v1747_v49  ;;  %v1744_v52 = vrot.slane %v1742_v1, 1  ;;  %v1901_v25 = vrot.slane %v5983_v61, 1  ;;  %v7864_v32 = vld [vmem:[#allocation2 + $0xb8] sm:$0xf] }
  0xe7   : > { %v7792_v10 = vpop.permute.xlu1 %1520  ;;  %v1739_v59 = vrot.slane %v1737_v29, 1  ;;  %v1756_v48 = vrot.slane %v1754_v33, 1  ;;  %v1902_v55 = vrot.slane %v7807_v62, 1  ;;  %v7852_v58 = vcombine.low %v783_v2, %v7838_v44  ;;  %v7871_v20 = vld [vmem:[#allocation2 + $0xb0] ss:$0 sps:$4 sm:$0x11]  }
  0xe8   : > { %v7800_v15 = vpop.permute.xlu0 %1518  ;;  %v1898_v24 = vrot.slane %v5982_v12, 1  ;;  %v2464_v43 = vsel %vm2454_vm11, %v7094_v47, %v7736_v30  ;;  %vm2975_vm0 = vcmask 60416   ;;  %vm2978_vm7 = vcmask 57344  }
  0xe9   : > { %1293 = vrot.lane.b32.xlu1 %v1232_v54, %s6720_s25  ;;  %v7831_v54 = vld [vmem:[#allocation2 + $0xac] sm:$0xf]  ;;  %v1740_v4 = vor.u32 %v1739_v59, %v1735_v8  ;;  %v1757_v39 = vsel %vm1076_vm6, %v1752_v6, %v1756_v48  ;;  %v2497_v29 = vsel %vm2487_vm12, %v2464_v43, %v7780_v23  ;;  %v1248_v23 = vshll.u32 %v7852_v58, 16  ;;  %v944_v48 = vld [vmem:[#allocation2 + $0xa8] sm:$0xe]  ;;  %vm8279_vm9 = vmand %vm2975_vm0, %vm639_vm4 }
  0xea   : > { %2442 = vrot.lane.b32.xlu0 %v2406_v56, %s6724_s8  ;;  %v7836_v56 = vcombine.low %v910_v9, %v7826_v22  ;;  %v7844_v40 = vcombine.low %v908_v35, %v7831_v54  ;;  %v2530_v47 = vsel %vm2520_vm13, %v2497_v29, %v7800_v15  ;;  %v2466_v15 = vsel %vm2454_vm11, %v7121_v5, %v7759_v36 }
  0xeb   : > { %v7814_v16 = vpop.permute.xlu1 %1792  ;;  %v1745_v3 = vsel %vm1076_vm6, %v1740_v4, %v1744_v52  ;;  %v1246_v2 = vshrl.u32 %v7852_v58, 16  ;;  %v1253_v6 = vshll.u32 %v7871_v20, 16  ;;  %v1250_v52 = vrot.slane %v1248_v23, 1  ;;  %2983 = vst.msk [vmem:[#allocation3 + $0x18] sm:$0xf] %vm2975_vm0, %v6718_v0 }
  0xec   : > { %v1791_v17 = vpop.permute.xlu0 %1790  ;;  %v2261_v18 = vshll.u32 %v7836_v56, 16  ;;  %v2249_v62 = vshll.u32 %v7844_v40, 16  ;;  %v2247_v49 = vshrl.u32 %v7844_v40, 16  ;;  %v2259_v1 = vshrl.u32 %v7836_v56, 16  ;;  %2976 = vst.msk [vmem:[#allocation3] sm:$0xf] %vm2975_vm0, %v6718_v0 }
  0xed   : > { %1295 = vrot.lane.b32.xlu1 %v1244_v7, %s6720_s25  ;;  %v7849_v7 = vld [vmem:[#allocation2 + $0xbc] ss:$0 sps:$4 sm:$0x11]   ;;  %v2563_v41 = vsel %vm2553_vm14, %v2530_v47, %v1791_v17  ;;  %v2499_v17 = vsel %vm2487_vm12, %v2466_v15, %v7774_v45  ;;  %v1255_v29 = vrot.slane %v1253_v6, 1  ;;  %2977 = vst.msk [vmem:[#allocation3 + $0x4] sm:$0xf] %vm2975_vm0, %v6718_v0 }
  0xee   : > { %2444 = vrot.lane.b32.xlu0 %v2409_v37, %s6724_s8  ;;  %v7856_v37 = vld [vmem:[#allocation2 + $0xb0] ss:$0 sps:$4 sm:$0x11]   ;;  %v2266_v33 = vshll.u32 %v7849_v7, 16  ;;  %v2263_v9 = vrot.slane %v2261_v18, 1  ;;  %v2251_v12 = vrot.slane %v2249_v62, 1  ;;  %v2532_v5 = vsel %vm2520_vm13, %v2499_v17, %v7792_v10 }
  0xef   : > { %v7824_v26 = vpop.permute.xlu1 %1920  ;;  %v2254_v35 = vshll.u32 %v7856_v37, 16  ;;  %v2565_v45 = vsel %vm2553_vm14, %v2532_v5, %v7814_v16  ;;  %v6030_v16 = vcombine.low %v944_v48, %v7831_v54  ;;  %v2414_v5 = vrot.slane %v7849_v7, 1  ;;  %2980 = vst.msk [vmem:[#allocation3 + $0xc] sm:$0xf] %vm2975_vm0, %v6718_v0  ;;  %2981 = vst.msk [vmem:[#allocation3 + $0x10] sm:$0xf] %vm2975_vm0, %v6718_v0 }
  0xf0   : > { %v1919_v13 = vpop.permute.xlu0 %1918  ;;  %v2268_v4 = vrot.slane %v2266_v33, 1  ;;  %v2598_v10 = vsel %vm2586_vm15, %v2565_v45, %v7824_v26  ;;  %v2252_v18 = vor.u32 %v2251_v12, %v2247_v49  ;;  %v1251_v26 = vor.u32 %v1250_v52, %v1246_v2  ;;  %v7937_v12 = vld [vmem:[#allocation2 + $0xb8] sm:$0xf]  ;;  %v7953_v45 = vld [vmem:[#allocation2 + $0xc8] ss:$0 sps:$4 sm:$0x11]  }
  0xf1   : > { %1424 = vrot.lane.b32.xlu1 %v1391_v60, %s6719_s24  ;;  %v1900_v60 = vsel %vm1349_vm5, %v1898_v24, %v1899_v28  ;;  %v2596_v8 = vsel %vm2586_vm15, %v2563_v41, %v1919_v13  ;;  %v7901_v24 = vld [vmem:[#allocation2 + $0xbc] ss:$0 sps:$4 sm:$0x11]   ;;  %v2256_v43 = vrot.slane %v2254_v35, 1  ;;  %v2410_v23 = vrot.slane %v6030_v16, 1 }
  0xf2   : > { %1422 = vrot.lane.b32.xlu0 %v1388_v51, %s6719_s24  ;;  %v7882_v51 = vcombine.low %v785_v31, %v7864_v32  ;;  %v2411_v41 = vrot.slane %v7856_v37, 1  ;;  %v1396_v52 = vrot.slane %v7901_v24, 1  ;;  %2984 = vst.msk [vmem:[#allocation3 + $0x1c] sm:$0xf] %vm2975_vm0, %v6718_v0  ;;  %2986 = vst.msk [vmem:[#allocation3 + $0x24] sm:$0xf] %vm2975_vm0, %v6718_v0 }
  0xf3   : > { %v7841_v19 = vpop.permute.xlu1 %2032  ;;  %v2257_v33 = vsel %vm1076_vm6, %v2252_v18, %v2256_v43  ;;  %2987 = vst.msk [vmem:[#allocation3 + $0x28] sm:$0xf] %vm2975_vm0, %v6718_v0  ;;  %2989 = vst.msk [vmem:[#allocation3 + $0x30] sm:$0xf] %vm2975_vm0, %v6718_v0  ;;  %vm5389_vm4 = vcmask 326656  }
  0xf4   : > { %v2031_v63 = vpop.permute.xlu0 %2030  ;;  %v2412_v6 = vsel %vm1349_vm5, %v2410_v23, %v2411_v41  ;;  %2990 = vst.msk [vmem:[#allocation3 + $0x34] sm:$0xf] %vm2975_vm0, %v6718_v0  ;;  %2992 = vst.msk [vmem:[#allocation3 + $0x3c] sm:$0xf] %vm2975_vm0, %v6718_v0 }
  0xf5   : > { %1536 = vrot.lane.b32.xlu1 %v7789_v42, %s6721_s26  ;;  %v2629_v61 = vsel %vm2619_vm1, %v2596_v8, %v2031_v63  ;;  %v2264_v63 = vor.u32 %v2263_v9, %v2259_v1  ;;  %v817_v9 = vld [vmem:[#allocation2 + $0xa8] sm:$0xe]  ;;  %v847_v8 = vld [vmem:[#allocation2 + $0xb4] sm:$0xf]  ;;  %2993 = vst.msk [vmem:[#allocation3 + $0x40] sm:$0xf] %vm2975_vm0, %v6718_v0 }
  0xf6   : > { %1534 = vrot.lane.b32.xlu0 %v7798_v14, %s6721_s26  ;;  %v1903_v14 = vsel %vm1349_vm5, %v1901_v25, %v1902_v55  ;;  %v1260_v25 = vshll.u32 %v7882_v51, 16  ;;  %2995 = vst.msk [vmem:[#allocation3 + $0x48] sm:$0xf] %vm2975_vm0, %v6718_v0  ;;  %2996 = vst.msk [vmem:[#allocation3 + $0x4c] sm:$0xf] %vm2975_vm0, %v6718_v0 }
  0xf7   : > { %v2305_v42 = vpop.permute.xlu1 %2304  ;;  %2998 = vst.msk [vmem:[#allocation3 + $0x54] sm:$0xf] %vm2975_vm0, %v6718_v0  ;;  %2999 = vst.msk [vmem:[#allocation3 + $0x58] sm:$0xf] %vm2975_vm0, %v6718_v0 }
  0xf8   : > { %v2303_v30 = vpop.permute.xlu0 %2302  ;;  %v1262_v49 = vrot.slane %v1260_v25, 1  ;;  %v1393_v25 = vrot.slane %v7871_v20, 1  ;;  %v882_v20 = vld [vmem:[#allocation2 + $0xc0] sm:$0xe]  ;;  %3001 = vst.msk [vmem:[#allocation3 + $0x60] sm:$0xf] %vm2975_vm0, %v6718_v0 }
  0xf9   : > { %1808 = vrot.lane.b32.xlu1 %v1757_v39, %s6725_s9  ;;  %v2662_v36 = vsel %vm2652_vm10, %v2629_v61, %v2303_v30  ;;  %v2631_v39 = vsel %vm2619_vm1, %v2598_v10, %v7841_v19  ;;  %v2269_v30 = vsel %vm1076_vm6, %v2264_v63, %v2268_v4  ;;  %v1258_v19 = vshrl.u32 %v7882_v51, 16  ;;  %v7960_v10 = vld [vmem:[#allocation2 + $0xbc] ss:$0 sps:$4 sm:$0x11]   ;;  %3002 = vst.msk [vmem:[#allocation3 + $0x64] sm:$0xf] %vm2975_vm0, %v6718_v0 }
  0xfa   : > { %1806 = vrot.lane.b32.xlu0 %v1745_v3, %s6725_s9  ;;  %v2664_v62 = vsel %vm2652_vm10, %v2631_v39, %v2305_v42  ;;  %v1265_v3 = vshll.u32 %v7901_v24, 16  ;;  %v849_v42 = vld [vmem:[#allocation2 + $0xc0] sm:$0xf]  ;;  %v914_v24 = vld [vmem:[#allocation2 + $0xcc] sm:$0xf] }
  0xfb   : > { %v7889_v59 = vpop.permute.xlu1 %1281  ;;  %v1263_v35 = vor.u32 %v1262_v49, %v1258_v19  ;;  %v881_v19 = vld [vmem:[#allocation2 + $0xb4] sm:$0xe]  ;;  %3004 = vst.msk [vmem:[#allocation3 + $0x6c] sm:$0xf] %vm2975_vm0, %v6718_v0  ;;  %3005 = vst.msk [vmem:[#allocation3 + $0x70] sm:$0xf] %vm2975_vm0, %v6718_v0 }
  0xfc   : > { %v2431_v13 = vpop.permute.xlu0 %2430  ;;  %v1267_v17 = vrot.slane %v1265_v3, 1  ;;  %3007 = vst.msk [vmem:[#allocation3 + $0x78] sm:$0xf] %vm2975_vm0, %v6718_v0  ;;  %3008 = vst.msk [vmem:[#allocation3 + $0x7c] sm:$0xf] %vm2975_vm0, %v6718_v0 }
  0xfd   : > { %1936 = vrot.lane.b32.xlu1 %v1903_v14, %s6723_s7  ;;  %v2695_v28 = vsel %vm2685_vm3, %v2662_v36, %v2431_v13  ;;  %v7928_v14 = vld [vmem:[#allocation2 + $0xc4] sm:$0xf]  ;;  %v5952_v36 = vcombine.low %v847_v8, %v7937_v12  ;;  %3010 = vst.msk [vmem:[#allocation3 + $0x84] sm:$0xf] %vm2975_vm0, %v6718_v0  ;;  %3011 = vst.msk [vmem:[#allocation3 + $0x88] sm:$0xf] %vm2975_vm0, %v6718_v0 }
  0xfe   : > { %1934 = vrot.lane.b32.xlu0 %v1900_v60, %s6723_s7  ;;  %6342 = vmatprep.mubr.msk.bf16.mxu0 %vm2745_vm2, %v2695_v28  ;;  %v945_v60 = vld [vmem:[#allocation2 + $0xb4] sm:$0xe]  ;;  %v5953_v2 = vcombine.low %v849_v42, %v7928_v14  ;;  %v912_v42 = vld [vmem:[#allocation2 + $0xc0] sm:$0xf]  ;;  %3013 = vst.msk [vmem:[#allocation3 + $0x90] sm:$0xf] %vm2975_vm0, %v6718_v0 }
  0xff   : > { %v7911_v55 = vpop.permute.xlu1 %1283  ;;  %v6031_v1 = vcombine.low %v945_v60, %v7826_v22  ;;  %v5936_v22 = vcombine.low %v817_v9, %v7838_v44  ;;  %v1761_v39 = vshll.u32 %v5952_v36, 16  ;;  %v1759_v60 = vshrl.u32 %v5952_v36, 16  ;;  %3014 = vst.msk [vmem:[#allocation3 + $0x94] sm:$0xf] %vm2975_vm0, %v6718_v0  ;;  %3016 = vst.msk [vmem:[#allocation3 + $0x9c] sm:$0xf] %vm2975_vm0, %v6718_v0 }
 0x100   : > { %v2433_v31 = vpop.permute.xlu0 %2432  ;;  %v1773_v28 = vshll.u32 %v5953_v2, 16  ;;  %v1771_v16 = vshrl.u32 %v5953_v2, 16  ;;  %3017 = vst.msk [vmem:[#allocation3 + $0xa0] sm:$0xf] %vm2975_vm0, %v6718_v0  ;;  %3019 = vst.msk [vmem:[#allocation3 + $0xa8] sm:$0xf] %vm2975_vm0, %v6718_v0 }
 0x101   : > { %2048 = vrot.lane.b32.xlu1 %v7836_v56, %s6722_s27  ;;  %v2697_v47 = vsel %vm2685_vm3, %v2664_v62, %v2433_v31  ;;  %v818_v56 = vld [vmem:[#allocation2 + $0xb4] sm:$0xe]  ;;  %v2413_v48 = vrot.slane %v6031_v1, 1  ;;  %v1392_v63 = vrot.slane %v5936_v22, 1  ;;  %v1778_v31 = vshll.u32 %v7953_v45, 16 }
 0x102   : > { %2046 = vrot.lane.b32.xlu0 %v7844_v40, %s6722_s27  ;;  %6343 = vmatmul.mubr.msk.bf16.gmra.mrb[8].mxu0 %vm2745_vm2, %v2697_v47  ;;  %v1256_v40 = vsel %vm1076_vm6, %v1251_v26, %v1255_v29  ;;  %v5937_v61 = vcombine.low %v818_v56, %v7864_v32  ;;  %v1268_v32 = vsel %vm1076_vm6, %v1263_v35, %v1267_v17  ;;  %v1775_v62 = vrot.slane %v1773_v28, 1  ;;  %v7967_v26 = vld [vmem:[#allocation2 + $0xd0] sm:$0xf] }
 0x103   : > { %v7926_v54 = vpop.permute.xlu1 %1412  ;;  %v2415_v7 = vsel %vm1349_vm5, %v2413_v48, %v2414_v5  ;;  %v1394_v3 = vsel %vm1349_vm5, %v1392_v63, %v1393_v25  ;;  %v1763_v47 = vrot.slane %v1761_v39, 1  ;;  %v7978_v56 = vcombine.low %v914_v24, %v7967_v26  ;;  %v7996_v5 = vld [vmem:[#allocation2 + $0xd4] ss:$0 sps:$4 sm:$0x11]   ;;  %3020 = vst.msk [vmem:[#allocation3 + $0xac] sm:$0xf] %vm2975_vm0, %v6718_v0 }
 0x104   : > { %v7933_v15 = vpop.permute.xlu0 %1410  ;;  %v1395_v4 = vrot.slane %v5937_v61, 1  ;;  %v1776_v23 = vor.u32 %v1775_v62, %v1771_v16  ;;  %v1780_v41 = vrot.slane %v1778_v31, 1  ;;  %v5985_v1 = vcombine.low %v882_v20, %v7928_v14  ;;  %3022 = vst.msk [vmem:[#allocation3 + $0xb4] sm:$0xf] %vm2975_vm0, %v6718_v0  ;;  %3023 = vst.msk [vmem:[#allocation3 + $0xb8] sm:$0xf] %vm2975_vm0, %v6718_v0 }
 0x105   : > { %2320 = vrot.lane.b32.xlu1 %v2269_v30, %s6726_s10  ;;  %v1766_v30 = vshll.u32 %v7960_v10, 16  ;;  %v1764_v8 = vor.u32 %v1763_v47, %v1759_v60  ;;  %v2285_v22 = vshll.u32 %v7978_v56, 16  ;;  %v1908_v48 = vrot.slane %v7953_v45, 1  ;;  %3025 = vst.msk [vmem:[#allocation3 + $0xc0] sm:$0xf] %vm2975_vm0, %v6718_v0 }
 0x106   : > { %2318 = vrot.lane.b32.xlu0 %v2257_v33, %s6726_s10  ;;  %v1397_v43 = vsel %vm1349_vm5, %v1395_v4, %v1396_v52  ;;  %v7980_v33 = vld [vmem:[#allocation2 + $0xc4] sm:$0xf]  ;;  %v1907_v14 = vrot.slane %v5985_v1, 1  ;;  %3026 = vst.msk [vmem:[#allocation3 + $0xc4] sm:$0xf] %vm2975_vm0, %v6718_v0  ;;  %v2290_v39 = vshll.u32 %v7996_v5, 16 }
 0x107   : > { %v7942_v37 = vpop.permute.xlu1 %1524  ;;  %v1768_v35 = vrot.slane %v1766_v30, 1  ;;  %v7988_v17 = vcombine.low %v912_v42, %v7980_v33  ;;  %3028 = vst.msk [vmem:[#allocation3 + $0xcc] sm:$0xf] %vm2975_vm0, %v6718_v0  ;;  %3029 = vst.msk [vmem:[#allocation3 + $0xd0] sm:$0xf] %vm2975_vm0, %v6718_v0  ;;  %v2287_v25 = vrot.slane %v2285_v22, 1 }
 0x108   : > { %v7948_v13 = vpop.permute.xlu0 %1522  ;;  %v947_v24 = vld [vmem:[#allocation2 + $0xcc] sm:$0xe]  ;;  %2985 = vst.msk [vmem:[#allocation3 + $0x20] sm:$0x1] %vm2978_vm7, %v6718_v0  ;;  %2979 = vst.msk [vmem:[#allocation3 + $0x8] sm:$0x1] %vm2978_vm7, %v6718_v0 }
 0x109   : > { %1297 = vrot.lane.b32.xlu1 %v1256_v40, %s6720_s25  ;;  %v5984_v40 = vcombine.low %v881_v19, %v7937_v12  ;;  %v2468_v12 = vsel %vm2454_vm11, %v7214_v11, %v7889_v59  ;;  %v1769_v59 = vsel %vm1076_vm6, %v1764_v8, %v1768_v35  ;;  %v2273_v52 = vshll.u32 %v7988_v17, 16  ;;  %2982 = vst.msk [vmem:[#allocation3 + $0x14] sm:$0x1] %vm2978_vm7, %v6718_v0  ;;  %v946_v20 = vld [vmem:[#allocation2 + $0xc0] sm:$0xe] }
 0x10a   : > { %2446 = vrot.lane.b32.xlu0 %v2412_v6, %s6724_s8  ;;  %v1781_v6 = vsel %vm1076_vm6, %v1776_v23, %v1780_v41  ;;  %v2501_v11 = vsel %vm2487_vm12, %v2468_v12, %v7933_v15  ;;  %v1909_v15 = vsel %vm1349_vm5, %v1907_v14, %v1908_v48  ;;  %2988 = vst.msk [vmem:[#allocation3 + $0x2c] sm:$0x1] %vm2978_vm7, %v6718_v0  ;;  %2991 = vst.msk [vmem:[#allocation3 + $0x38] sm:$0x1] %vm2978_vm7, %v6718_v0  ;;  %v3564_v42 = vld [vmem:[#allocation3] sm:$0xf] }
 0x10b   : > { %v7956_v44 = vpop.permute.xlu1 %1796  ;;  %v8004_v4 = vrot.slane %v5984_v40, 1  ;;  %v2534_v45 = vsel %vm2520_vm13, %v2501_v11, %v7948_v13  ;;  %2994 = vst.msk [vmem:[#allocation3 + $0x44] sm:$0x1] %vm2978_vm7, %v6718_v0  ;;  %2997 = vst.msk [vmem:[#allocation3 + $0x50] sm:$0x1] %vm2978_vm7, %v6718_v0  ;;  %v2470_v13 = vsel %vm2454_vm11, %v7241_v38, %v7911_v55  ;;  %v2271_v62 = vshrl.u32 %v7988_v17, 16 }
 0x10c   : > { %v7962_v18 = vpop.permute.xlu0 %1794  ;;  %3000 = vst.msk [vmem:[#allocation3 + $0x5c] sm:$0x1] %vm2978_vm7, %v6718_v0  ;;  %3003 = vst.msk [vmem:[#allocation3 + $0x68] sm:$0x1] %vm2978_vm7, %v6718_v0  ;;  %v2275_v55 = vrot.slane %v2273_v52, 1  ;;  %v6033_v47 = vcombine.low %v947_v24, %v7967_v26  ;;  %v6032_v1 = vcombine.low %v946_v20, %v7980_v33  ;;  %v2420_v14 = vrot.slane %v7996_v5, 1 }
 0x10d   : > { %1299 = vrot.lane.b32.xlu1 %v1268_v32, %s6720_s25  ;;  %v2567_v63 = vsel %vm2553_vm14, %v2534_v45, %v7962_v18  ;;  %3006 = vst.msk [vmem:[#allocation3 + $0x74] sm:$0x1] %vm2978_vm7, %v6718_v0  ;;  %3009 = vst.msk [vmem:[#allocation3 + $0x80] sm:$0x1] %vm2978_vm7, %v6718_v0  ;;  %v3565_v23 = vld [vmem:[#allocation3 + $0x4] sm:$0xf] }
 0x10e   : > { %2448 = vrot.lane.b32.xlu0 %v2415_v7, %s6724_s8  ;;  %v2283_v7 = vshrl.u32 %v7978_v56, 16  ;;  %3012 = vst.msk [vmem:[#allocation3 + $0x8c] sm:$0x1] %vm2978_vm7, %v6718_v0  ;;  %3015 = vst.msk [vmem:[#allocation3 + $0x98] sm:$0x1] %vm2978_vm7, %v6718_v0  ;;  %v8160_v26 = vcombine.low %v3564_v42, %v3565_v23  ;;  %v2276_v40 = vor.u32 %v2275_v55, %v2271_v62  ;;  %v2416_v12 = vrot.slane %v6032_v1, 1 }
 0x10f   : > { %v7970_v29 = vpop.permute.xlu1 %1924  ;;  %3018 = vst.msk [vmem:[#allocation3 + $0xa4] sm:$0x1] %vm2978_vm7, %v6718_v0  ;;  %3021 = vst.msk [vmem:[#allocation3 + $0xb0] sm:$0x1] %vm2978_vm7, %v6718_v0  ;;  %v3612_v52 = vld [vmem:[#allocation3] sm:$0xe] }
 0x110   : > { %v7974_v49 = vpop.permute.xlu0 %1922  ;;  %3024 = vst.msk [vmem:[#allocation3 + $0xbc] sm:$0x1] %vm2978_vm7, %v6718_v0  ;;  %3027 = vst.msk [vmem:[#allocation3 + $0xc8] sm:$0x1] %vm2978_vm7, %v6718_v0  ;;  %v2288_v19 = vor.u32 %v2287_v25, %v2283_v7  ;;  %v3888_v22 = vshll.u32 %v8160_v26, 16 }
 0x111   : > { %1428 = vrot.lane.b32.xlu1 %v1397_v43, %s6719_s24  ;;  %3030 = vst.msk [vmem:[#allocation3 + $0xd4] sm:$0x1] %vm2978_vm7, %v6718_v0  ;;  %v2600_v18 = vsel %vm2586_vm15, %v2567_v63, %v7974_v49  ;;  %v2503_v0 = vsel %vm2487_vm12, %v2470_v13, %v7926_v54  ;;  %v2292_v49 = vrot.slane %v2290_v39, 1  ;;  %v6578_v48 = vld [vmem:[#allocation3 + $0x8] ss:$0 sps:$4 sm:$0x11]  }
 0x112   : > { %1426 = vrot.lane.b32.xlu0 %v1394_v3, %s6719_s24  ;;  %v2536_v3 = vsel %vm2520_vm13, %v2503_v0, %v7942_v37  ;;  %v3893_v11 = vshll.u32 %v6578_v48, 16  ;;  %v4158_v24 = vrot.slane %v6578_v48, 1 }
 0x113   : > { %v7984_v9 = vpop.permute.xlu1 %2036  ;;  %v2569_v54 = vsel %vm2553_vm14, %v2536_v3, %v7956_v44  ;;  %v2293_v33 = vsel %vm1076_vm6, %v2288_v19, %v2292_v49 }
 0x114   : > { %v7990_v61 = vpop.permute.xlu0 %2034  ;;  %v2602_v41 = vsel %vm2586_vm15, %v2569_v54, %v7970_v29  ;;  %v2419_v29 = vrot.slane %v6033_v47, 1  ;;  %v3895_v7 = vrot.slane %v3893_v11, 1 }
 0x115   : > { %1540 = vrot.lane.b32.xlu1 %v5953_v2, %s6721_s26  ;;  %v1905_v2 = vrot.slane %v7960_v10, 1  ;;  %v2633_v38 = vsel %vm2619_vm1, %v2600_v18, %v7990_v61  ;;  %v2635_v44 = vsel %vm2619_vm1, %v2602_v41, %v7984_v9 }
 0x116   : > { %1538 = vrot.lane.b32.xlu0 %v5952_v36, %s6721_s26  ;;  %v8082_v36 = vld [vmem:[#allocation2 + $0xc8] ss:$0 sps:$4 sm:$0x11]   ;;  %v2421_v5 = vsel %vm1349_vm5, %v2419_v29, %v2420_v14 }
 0x117   : > { %v8002_v32 = vpop.permute.xlu1 %2308  ;;  %v1906_v16 = vsel %vm1349_vm5, %v8004_v4, %v1905_v2  ;;  %v2278_v31 = vshll.u32 %v8082_v36, 16  ;;  %v3886_v4 = vshrl.u32 %v8160_v26, 16  ;;  %v3890_v2 = vrot.slane %v3888_v22, 1 }
 0x118   : > { %v2307_v28 = vpop.permute.xlu0 %2306  ;;  %v2668_v35 = vsel %vm2652_vm10, %v2635_v44, %v8002_v32  ;;  %v2417_v32 = vrot.slane %v8082_v36, 1  ;;  %v6118_v36 = vcombine.low %v3612_v52, %v3565_v23 }
 0x119   : > { %1812 = vrot.lane.b32.xlu1 %v1781_v6, %s6725_s9  ;;  %v2666_v10 = vsel %vm2652_vm10, %v2633_v38, %v2307_v28  ;;  %v2280_v8 = vrot.slane %v2278_v31, 1  ;;  %v3891_v28 = vor.u32 %v3890_v2, %v3886_v4 }
 0x11a   : > { %1810 = vrot.lane.b32.xlu0 %v1769_v59, %s6725_s9  ;;  %v2418_v45 = vsel %vm1349_vm5, %v2416_v12, %v2417_v32  ;;  %v4157_v39 = vrot.slane %v6118_v36, 1 }
 0x11b   : > { %v8135_v43 = vpop.permute.xlu1 %1285  ;;  %v3896_v25 = vsel %vm1076_vm6, %v3891_v28, %v3895_v7 }
 0x11c   : > { %v2435_v60 = vpop.permute.xlu0 %2434  ;;  %v2472_v55 = vsel %vm2454_vm11, %v7334_v46, %v8135_v43 }
 0x11d   : > { %1940 = vrot.lane.b32.xlu1 %v1909_v15, %s6723_s7  ;;  %v2699_v30 = vsel %vm2685_vm3, %v2666_v10, %v2435_v60 }
 0x11e   : > { %1938 = vrot.lane.b32.xlu0 %v1906_v16, %s6723_s7  ;;  %6346 = vmatprep.mubr.msk.bf16.mxu0 %vm2745_vm2, %v2699_v30  ;;  %v4159_v16 = vsel %vm1349_vm5, %v4157_v39, %v4158_v24 }
 0x11f   : > { %v1288_v37 = vpop.permute.xlu1 %1287 }
 0x120   : > { %v2437_v61 = vpop.permute.xlu0 %2436  ;;  %v2474_v47 = vsel %vm2454_vm11, %v7368_v53, %v1288_v37 }
 0x121   : > { %2052 = vrot.lane.b32.xlu1 %v7978_v56, %s6722_s27  ;;  %v2701_v6 = vsel %vm2685_vm3, %v2668_v35, %v2437_v61  ;;  %v2281_v56 = vsel %vm1076_vm6, %v2276_v40, %v2280_v8 }
 0x122   : > { %2050 = vrot.lane.b32.xlu0 %v7988_v17, %s6722_s27  ;;  %6347 = vmatmul.mubr.msk.bf16.gmra.mrb[12].mxu0 %vm2745_vm2, %v2701_v6 }
 0x123   : > { %v1417_v9 = vpop.permute.xlu1 %1416 }
 0x124   : > { %v1415_v59 = vpop.permute.xlu0 %1414  ;;  %v2507_v19 = vsel %vm2487_vm12, %v2474_v47, %v1417_v9 }
 0x125   : > { %2324 = vrot.lane.b32.xlu1 %v2293_v33, %s6726_s10  ;;  %v2505_v20 = vsel %vm2487_vm12, %v2472_v55, %v1415_v59 }
 0x126   : > { %2322 = vrot.lane.b32.xlu0 %v2281_v56, %s6726_s10 }
 0x127   : > { %v1529_v17 = vpop.permute.xlu1 %1528 }
 0x128   : > { %v1527_v63 = vpop.permute.xlu0 %1526  ;;  %v2540_v46 = vsel %vm2520_vm13, %v2507_v19, %v1529_v17 }
 0x129   : > { %2452 = vrot.lane.b32.xlu1 %v2421_v5, %s6724_s8  ;;  %v2538_v3 = vsel %vm2520_vm13, %v2505_v20, %v1527_v63 }
 0x12a   : > { %2450 = vrot.lane.b32.xlu0 %v2418_v45, %s6724_s8 }
 0x12b   : > { %v1801_v15 = vpop.permute.xlu1 %1800 }
 0x12c   : > { %v1799_v13 = vpop.permute.xlu0 %1798  ;;  %v2573_v23 = vsel %vm2553_vm14, %v2540_v46, %v1801_v15 }
 0x12d   : > { %v2571_v60 = vsel %vm2553_vm14, %v2538_v3, %v1799_v13 }
 0x12e   : > { %4077 = vrot.lane.b32.xlu0 %v3896_v25, %s6719_s24 }
 0x12f   : > { %v1929_v18 = vpop.permute.xlu1 %1928 }
 0x130   : > { %v1927_v62 = vpop.permute.xlu0 %1926  ;;  %v2606_v1 = vsel %vm2586_vm15, %v2573_v23, %v1929_v18 }
 0x131   : > { %v2604_v54 = vsel %vm2586_vm15, %v2571_v60, %v1927_v62 }
 0x132   : > { %4205 = vrot.lane.b32.xlu0 %v4159_v16, %s6725_s9 }
 0x133   : > { %v2041_v0 = vpop.permute.xlu1 %2040 }
 0x134   : > { %v2039_v38 = vpop.permute.xlu0 %2038  ;;  %v2639_v37 = vsel %vm2619_vm1, %v2606_v1, %v2041_v0 }
 0x135   : > { %v2637_v49 = vsel %vm2619_vm1, %v2604_v54, %v2039_v38 }
 0x137   : > { %v2313_v31 = vpop.permute.xlu1 %2312 }
 0x138   : > { %v2311_v10 = vpop.permute.xlu0 %2310  ;;  %v2672_v44 = vsel %vm2652_vm10, %v2639_v37, %v2313_v31 }
 0x139   : > { %v2670_v43 = vsel %vm2652_vm10, %v2637_v49, %v2311_v10 }
 0x13b   : > { %v1290_v30 = vpop.permute.xlu1 %1289 }
 0x13c   : > { %v2439_v42 = vpop.permute.xlu0 %2438  ;;  %v2476_v32 = vsel %vm2454_vm11, %v7496_v34, %v1290_v30 }
 0x13d   : > { %v2703_v41 = vsel %vm2685_vm3, %v2670_v43, %v2439_v42 }
 0x13e   : > { %6350 = vmatprep.mubr.msk.bf16.mxu0 %vm2745_vm2, %v2703_v41 }
 0x13f   : > { %v1292_v53 = vpop.permute.xlu1 %1291 }
 0x140   : > { %v2441_v40 = vpop.permute.xlu0 %2440  ;;  %v2478_v5 = vsel %vm2454_vm11, %v7536_v57, %v1292_v53 }
 0x141   : > { %v2705_v8 = vsel %vm2685_vm3, %v2672_v44, %v2441_v40 }
 0x142   : > { %6351 = vmatmul.mubr.msk.bf16.gmra.mrb[16].mxu0 %vm2745_vm2, %v2705_v8 }
 0x143   : > { %v1421_v35 = vpop.permute.xlu1 %1420 }
 0x144   : > { %v1419_v61 = vpop.permute.xlu0 %1418  ;;  %v2511_v45 = vsel %vm2487_vm12, %v2478_v5, %v1421_v35 }
 0x145   : > { %v2509_v4 = vsel %vm2487_vm12, %v2476_v32, %v1419_v61 }
 0x147   : > { %v1533_v29 = vpop.permute.xlu1 %1532 }
 0x148   : > { %v1531_v22 = vpop.permute.xlu0 %1530  ;;  %v2544_v34 = vsel %vm2520_vm13, %v2511_v45, %v1533_v29 }
 0x149   : > { %v2542_v2 = vsel %vm2520_vm13, %v2509_v4, %v1531_v22 }
 0x14b   : > { %v1805_v6 = vpop.permute.xlu1 %1804 }
 0x14c   : > { %v1803_v33 = vpop.permute.xlu0 %1802  ;;  %v2577_v63 = vsel %vm2553_vm14, %v2544_v34, %v1805_v6 }
 0x14d   : > { %v2575_v59 = vsel %vm2553_vm14, %v2542_v2, %v1803_v33  ;;  %v8252_v2 = vld [vmem:[%s9454_s2] ss:$0 sm:$0xff] }
 0x14f   : > { %v1933_v14 = vpop.permute.xlu1 %1932 }
 0x150   : > { %v1931_v48 = vpop.permute.xlu0 %1930  ;;  %v2610_v25 = vsel %vm2586_vm15, %v2577_v63, %v1933_v14 }
 0x151   : > { %v2608_v52 = vsel %vm2586_vm15, %v2575_v59, %v1931_v48 }
 0x153   : > { %v2045_v9 = vpop.permute.xlu1 %2044 }
 0x154   : > { %v2043_v12 = vpop.permute.xlu0 %2042  ;;  %v2643_v39 = vsel %vm2619_vm1, %v2610_v25, %v2045_v9 }
 0x155   : > { %v2641_v28 = vsel %vm2619_vm1, %v2608_v52, %v2043_v12 }
 0x157   : > { %v2317_v56 = vpop.permute.xlu1 %2316 }
 0x158   : > { %v2315_v11 = vpop.permute.xlu0 %2314  ;;  %v2676_v24 = vsel %vm2652_vm10, %v2643_v39, %v2317_v56 }
 0x159   : > { %v2674_v7 = vsel %vm2652_vm10, %v2641_v28, %v2315_v11 }
 0x15b   : > { %v1294_v17 = vpop.permute.xlu1 %1293 }
 0x15c   : > { %v2443_v36 = vpop.permute.xlu0 %2442  ;;  %v2480_v47 = vsel %vm2454_vm11, %v7689_v21, %v1294_v17 }
 0x15d   : > { %v2707_v15 = vsel %vm2685_vm3, %v2674_v7, %v2443_v36 }
 0x15e   : > { %6354 = vmatprep.mubr.msk.bf16.mxu0 %vm2745_vm2, %v2707_v15 }
 0x15f   : > { %v1296_v57 = vpop.permute.xlu1 %1295 }
 0x160   : > { %v2445_v13 = vpop.permute.xlu0 %2444  ;;  %v2482_v43 = vsel %vm2454_vm11, %v7728_v50, %v1296_v57 }
 0x161   : > { %v2709_v18 = vsel %vm2685_vm3, %v2676_v24, %v2445_v13 }
 0x162   : > { %6355 = vmatmul.mubr.msk.bf16.gmra.mrb[20].mxu0 %vm2745_vm2, %v2709_v18 }
 0x163   : > { %v1425_v16 = vpop.permute.xlu1 %1424 }
 0x164   : > { %v1423_v62 = vpop.permute.xlu0 %1422  ;;  %v2515_v41 = vsel %vm2487_vm12, %v2482_v43, %v1425_v16 }
 0x165   : > { %v2513_v30 = vsel %vm2487_vm12, %v2480_v47, %v1423_v62 }
 0x167   : > { %v1537_v0 = vpop.permute.xlu1 %1536 }
 0x168   : > { %v1535_v38 = vpop.permute.xlu0 %1534  ;;  %v2548_v21 = vsel %vm2520_vm13, %v2515_v41, %v1537_v0 }
 0x169   : > { %v2546_v19 = vsel %vm2520_vm13, %v2513_v30, %v1535_v38 }
 0x16b   : > { %v1809_v55 = vpop.permute.xlu1 %1808 }
 0x16c   : > { %v1807_v31 = vpop.permute.xlu0 %1806  ;;  %v2581_v44 = vsel %vm2553_vm14, %v2548_v21, %v1809_v55 }
 0x16d   : > { %v2579_v46 = vsel %vm2553_vm14, %v2546_v19, %v1807_v31 }
 0x16f   : > { %v1937_v20 = vpop.permute.xlu1 %1936 }
 0x170   : > { %v1935_v3 = vpop.permute.xlu0 %1934  ;;  %v2614_v8 = vsel %vm2586_vm15, %v2581_v44, %v1937_v20 }
 0x171   : > { %v2612_v42 = vsel %vm2586_vm15, %v2579_v46, %v1935_v3 }
 0x173   : > { %v2049_v10 = vpop.permute.xlu1 %2048 }
 0x174   : > { %v2047_v60 = vpop.permute.xlu0 %2046  ;;  %v2647_v35 = vsel %vm2619_vm1, %v2614_v8, %v2049_v10 }
 0x175   : > { %v2645_v1 = vsel %vm2619_vm1, %v2612_v42, %v2047_v60 }
 0x177   : > { %v2321_v54 = vpop.permute.xlu1 %2320 }
 0x178   : > { %v2319_v49 = vpop.permute.xlu0 %2318  ;;  %v2680_v61 = vsel %vm2652_vm10, %v2647_v35, %v2321_v54  ;;  %v3450_v35 = vld [vmem:[#allocation3 + $0xc] sm:$0xf] }
 0x179   : > { %v2678_v53 = vsel %vm2652_vm10, %v2645_v1, %v2319_v49 }
 0x17b   : > { %v1298_v23 = vpop.permute.xlu1 %1297 }
 0x17c   : > { %v2447_v37 = vpop.permute.xlu0 %2446  ;;  %v2484_v52 = vsel %vm2454_vm11, %v7852_v58, %v1298_v23 }
 0x17d   : > { %v2711_v40 = vsel %vm2685_vm3, %v2678_v53, %v2447_v37  ;;  %v3459_v37 = vld [vmem:[#allocation3 + $0x18] sm:$0xf] }
 0x17e   : > { %6358 = vmatprep.mubr.msk.bf16.mxu0 %vm2745_vm2, %v2711_v40 }
 0x17f   : > { %v1300_v50 = vpop.permute.xlu1 %1299 }
 0x180   : > { %v2449_v29 = vpop.permute.xlu0 %2448  ;;  %v2486_v59 = vsel %vm2454_vm11, %v7882_v51, %v1300_v50  ;;  %vm9467_vm11 = vsmask.f32 256 }
 0x181   : > { %v2713_v22 = vsel %vm2685_vm3, %v2680_v61, %v2449_v29 }
 0x182   : > { %6359 = vmatmul.mubr.msk.bf16.gmra.mrb[24].mxu0 %vm2745_vm2, %v2713_v22 }
 0x183   : > { %v1429_v6 = vpop.permute.xlu1 %1428 }
 0x184   : > { %v1427_v33 = vpop.permute.xlu0 %1426  ;;  %v2519_v17 = vsel %vm2487_vm12, %v2486_v59, %v1429_v6 }
 0x185   : > { %v2517_v7 = vsel %vm2487_vm12, %v2484_v52, %v1427_v33  ;;  %v3463_v33 = vld [vmem:[#allocation3 + $0x20] sm:$0x1] }
 0x187   : > { %v1541_v14 = vpop.permute.xlu1 %1540 }
 0x188   : > { %v1539_v48 = vpop.permute.xlu0 %1538  ;;  %v2552_v36 = vsel %vm2520_vm13, %v2519_v17, %v1541_v14 }
 0x189   : > { %v2550_v25 = vsel %vm2520_vm13, %v2517_v7, %v1539_v48  ;;  %vm8286_vm13 = vmand %vm2978_vm7, %vm9467_vm11  ;;  %vm5488_vm7 = vcmask 523264   ;;  %vm5564_vm11 = vcmask 588800  }
 0x18b   : > { %v1813_v9 = vpop.permute.xlu1 %1812 }
 0x18c   : > { %v1811_v12 = vpop.permute.xlu0 %1810  ;;  %v2585_v51 = vsel %vm2553_vm14, %v2552_v36, %v1813_v9 }
 0x18d   : > { %v2583_v13 = vsel %vm2553_vm14, %v2550_v25, %v1811_v12 }
 0x18f   : > { %v1941_v32 = vpop.permute.xlu1 %1940 }
 0x190   : > { %v1939_v56 = vpop.permute.xlu0 %1938  ;;  %v2618_v18 = vsel %vm2586_vm15, %v2585_v51, %v1941_v32 }
 0x191   : > { %v2616_v0 = vsel %vm2586_vm15, %v2583_v13, %v1939_v56  ;;  %vm5422_vm15 = vcmask 392192  }
 0x193   : > { %v2053_v4 = vpop.permute.xlu1 %2052 }
 0x194   : > { %v2051_v11 = vpop.permute.xlu0 %2050  ;;  %v2651_v38 = vsel %vm2619_vm1, %v2618_v18, %v2053_v4  ;;  %v3456_v4 = vld [vmem:[#allocation3 + $0x14] sm:$0x1] }
 0x195   : > { %v6336_v5 = vpop.f32.mrb[0].mxu0  ;;  %v2649_v3 = vsel %vm2619_vm1, %v2616_v0, %v2051_v11 }
 0x196   : > { %v2825_v45 = vadd.f32 %v6336_v5, %v8252_v2  ;;  %v2816_v28 = vpop.f32.mrb[1].mxu0 }
 0x197   : > { %v2325_v34 = vpop.permute.xlu1 %2324  ;;  %v2817_v63 = vadd.f32 %v8252_v2, %v2816_v28  ;;  %v6337_v15 = vpop.f32.mrb[2].mxu0 }
 0x198   : > { %v2945_v57 = vmax.f32 %v2825_v45, 0.0  ;;  %v2828_v58 = vadd.f32 %v6337_v15, %v8252_v2  ;;  %v2819_v39 = vpop.f32.mrb[3].mxu0  ;;  %v2323_v24 = vpop.permute.xlu0 %2322  ;;  %v2684_v60 = vsel %vm2652_vm10, %v2651_v38, %v2325_v34 }
 0x199   : > { %v2943_v16 = vmax.f32 %v2817_v63, 0.0  ;;  %v2820_v62 = vadd.f32 %v8252_v2, %v2819_v39  ;;  %v2682_v19 = vsel %vm2652_vm10, %v2649_v3, %v2323_v24  ;;  %vm5455_vm10 = vcmask 457728  }
 0x19a   : > { %v6258_v55 = vpack.c.bf16 %v2945_v57, %v2945_v57  ;;  %v2946_v31 = vmax.f32 %v2828_v58, 0.0 }
 0x19b   : > { %v2453_v20 = vpop.permute.xlu1 %2452  ;;  %v6256_v10 = vpack.c.bf16 %v2943_v16, %v2943_v16  ;;  %v2944_v47 = vmax.f32 %v2820_v62, 0.0 }
 0x19c   : > { %v3145_v54 = vshrl.u32 %v6258_v55, 16  ;;  %v6259_v30 = vpack.c.bf16 %v2946_v31, %v2946_v31  ;;  %v2717_v49 = vsel %vm2685_vm3, %v2684_v60, %v2453_v20  ;;  %v2451_v46 = vpop.permute.xlu0 %2450  ;;  %v3148_v1 = vshll.u32 %v6258_v55, 16 }
 0x19d   : > { %v3128_v43 = vshrl.u32 %v6256_v10, 16  ;;  %v6257_v42 = vpack.c.bf16 %v2944_v47, %v2944_v47  ;;  %v2715_v23 = vsel %vm2685_vm3, %v2682_v19, %v2451_v46  ;;  %v3131_v40 = vshll.u32 %v6256_v10, 16 }
 0x19e   : > { %v3147_v41 = vrot.slane %v3145_v54, 7  ;;  %v3153_v21 = vshrl.u32 %v6259_v30, 16  ;;  %6362 = vmatprep.mubr.msk.bf16.mxu0 %vm2745_vm2, %v2715_v23  ;;  %v3156_v29 = vshll.u32 %v6259_v30, 16 }
 0x19f   : > { %v3130_v44 = vrot.slane %v3128_v43, 7  ;;  %v3136_v8 = vshrl.u32 %v6257_v42, 16  ;;  %6363 = vmatmul.mubr.msk.bf16.gmra.mrb[28].mxu0 %vm2745_vm2, %v2717_v49  ;;  %v3139_v48 = vshll.u32 %v6257_v42, 16  ;;  %vm5597_vm2 = vcmask 1043456  }
 0x1a0   : > { %v3150_v50 = vor.u32 %v3148_v1, %v3147_v41  ;;  %v3155_v61 = vrot.slane %v3153_v21, 7  ;;  %v3151_v9 = vrot.slane %v3147_v41, 4 }
 0x1a1   : > { %v3133_v22 = vor.u32 %v3131_v40, %v3130_v44  ;;  %v3138_v14 = vrot.slane %v3136_v8, 7  ;;  %v3134_v11 = vrot.slane %v3130_v44, 4 }
 0x1a2   : > { %v3460_v12 = vsel %vm8279_vm9, %v3150_v50, %v3459_v37  ;;  %v3158_v32 = vor.u32 %v3156_v29, %v3155_v61  ;;  %v3160_v56 = vrot.slane %v3155_v61, 4 }
 0x1a3   : > { %3461 = vst [vmem:[#allocation3 + $0x18] sm:$0xf] %v3460_v12  ;;  %v3451_v59 = vsel %vm8279_vm9, %v3133_v22, %v3450_v35  ;;  %v3141_v5 = vor.u32 %v3139_v48, %v3138_v14  ;;  %v3143_v52 = vrot.slane %v3138_v14, 4 }
 0x1a4   : > { %3452 = vst [vmem:[#allocation3 + $0xc] sm:$0xf] %v3451_v59  ;;  %v3159_v17 = vsel %vm6906_vm8, %v3151_v9, %v3158_v32  ;;  %v3464_v45 = vsel %vm8286_vm13, %v3160_v56, %v3463_v33 }
 0x1a5   : > { %3462 = vst.msk [vmem:[#allocation3 + $0x1c] sm:$0xf] %vm2975_vm0, %v3159_v17  ;;  %3465 = vst [vmem:[#allocation3 + $0x20] sm:$0x1] %v3464_v45  ;;  %v3142_v28 = vsel %vm6906_vm8, %v3134_v11, %v3141_v5  ;;  %v3457_v34 = vsel %vm8286_vm13, %v3143_v52, %v3456_v4 }
 0x1a6   : > { %3453 = vst.msk [vmem:[#allocation3 + $0x10] sm:$0xf] %vm2975_vm0, %v3142_v28  ;;  %3458 = vst [vmem:[#allocation3 + $0x14] sm:$0x1] %v3457_v34 }
 0x1aa   : > { %v3630_v7 = vld [vmem:[#allocation3 + $0x18] sm:$0xf] }
 0x1ab   : > { %v3693_v36 = vld [vmem:[#allocation3 + $0x18] sm:$0xf]  ;;  %v3613_v51 = vld [vmem:[#allocation3 + $0xc] sm:$0xe] }
 0x1ac   : > { %v3677_v63 = vld [vmem:[#allocation3 + $0x18] sm:$0xe]  ;;  %v3631_v15 = vld [vmem:[#allocation3 + $0x1c] sm:$0xf]  ;;  %v3628_v13 = vld [vmem:[#allocation3 + $0xc] sm:$0xf] }
 0x1ad   : > { %v3694_v25 = vld [vmem:[#allocation3 + $0x1c] sm:$0xf]  ;;  %v6135_v57 = vcombine.low %v3630_v7, %v3631_v15  ;;  %v6582_v39 = vld [vmem:[#allocation3 + $0x20] ss:$0 sps:$4 sm:$0x11]   ;;  %v6167_v24 = vcombine.low %v3677_v63, %v3631_v15 }
 0x1ae   : > { %v8304_v58 = vcombine.low %v3693_v36, %v3694_v25  ;;  %v8306_v18 = vld [vmem:[#allocation3 + $0x10] sm:$0xf]  ;;  %v4673_v0 = vrot.slane %v6582_v39, 1  ;;  %v8311_v38 = vld [vmem:[#allocation3 + $0x14] ss:$0 sps:$4 sm:$0x11]  }
 0x1af   : > { %v3567_v16 = vld [vmem:[#allocation3 + $0x10] sm:$0xf]  ;;  %4319 = vrot.lane.b32.xlu1 %v6135_v57, %s6722_s27  ;;  %v4672_v62 = vrot.slane %v6167_v24, 1  ;;  %v8314_v31 = vcombine.low %v3628_v13, %v8306_v18  ;;  %v3566_v20 = vld [vmem:[#allocation3 + $0xc] sm:$0xf]  ;;  %v4410_v60 = vshrl.u32 %v6135_v57, 16 }
 0x1b0   : > { %4829 = vrot.lane.b32.xlu0 %v8304_v58, %s6727_s15  ;;  %v6119_v55 = vcombine.low %v3613_v51, %v3567_v16  ;;  %v3741_v3 = vld [vmem:[#allocation3 + $0x18] sm:$0xe]  ;;  %v8316_v10 = vld [vmem:[#allocation3 + $0x20] ss:$0 sps:$4 sm:$0x11]   ;;  %v4161_v30 = vrot.slane %v8311_v38, 1  ;;  %v8326_v1 = vcombine.low %v3566_v20, %v3567_v16 }
 0x1b1   : > { %v4674_v47 = vsel %vm1349_vm5, %v4672_v62, %v4673_v0  ;;  %v6214_v19 = vcombine.low %v3741_v3, %v3694_v25  ;;  %v3568_v49 = vld [vmem:[#allocation3 + $0x18] sm:$0xf]  ;;  %v3569_v46 = vld [vmem:[#allocation3 + $0x1c] sm:$0xf]  ;;  %v5182_v43 = vrot.slane %v8316_v10, 1  ;;  %v4412_v42 = vshll.u32 %v6135_v57, 16 }
 0x1b2   : > { %v4160_v54 = vrot.slane %v6119_v55, 1  ;;  %v4417_v23 = vshll.u32 %v6582_v39, 16  ;;  %v8321_v41 = vcombine.low %v3568_v49, %v3569_v46  ;;  %v3614_v37 = vld [vmem:[#allocation3 + $0x18] sm:$0xe]  ;;  %v3676_v48 = vld [vmem:[#allocation3 + $0xc] sm:$0xe] }
 0x1b3   : > { %4719 = vrot.lane.b32.xlu1 %v4674_v47, %s6728_s16  ;;  %v5181_v21 = vrot.slane %v6214_v19, 1  ;;  %v6590_v44 = vld [vmem:[#allocation3 + $0x20] ss:$0 sps:$4 sm:$0x11]   ;;  %v4414_v8 = vrot.slane %v4412_v42, 1  ;;  %v6120_v35 = vcombine.low %v3614_v37, %v3569_v46  ;;  %v6166_v11 = vcombine.low %v3676_v48, %v8306_v18 }
 0x1b4   : > { %4317 = vrot.lane.b32.xlu0 %v8314_v31, %s6722_s27  ;;  %v4162_v40 = vsel %vm1349_vm5, %v4160_v54, %v4161_v30  ;;  %v4419_v50 = vrot.slane %v4417_v23, 1  ;;  %v4164_v22 = vrot.slane %v6590_v44, 1  ;;  %v3912_v33 = vshll.u32 %v8321_v41, 16  ;;  %v8332_v4 = vld [vmem:[#allocation3 + $0x14] ss:$0 sps:$4 sm:$0x11]  }
 0x1b5   : > { %v6340_v61 = vpop.f32.mrb[4].mxu0  ;;  %v5183_v29 = vsel %vm1349_vm5, %v5181_v21, %v5182_v43  ;;  %v3917_v14 = vshll.u32 %v6590_v44, 16  ;;  %v4415_v32 = vor.u32 %v4414_v8, %v4410_v60  ;;  %v4163_v56 = vrot.slane %v6120_v35, 1  ;;  %v3473_v21 = vld [vmem:[#allocation3 + $0x30] sm:$0xf] }
 0x1b6   : > { %v2841_v9 = vadd.f32 %v6340_v61, %v8252_v2  ;;  %v2832_v12 = vpop.f32.mrb[5].mxu0  ;;  %v3910_v52 = vshrl.u32 %v8321_v41, 16  ;;  %v3914_v17 = vrot.slane %v3912_v33, 1  ;;  %v4669_v57 = vrot.slane %v6166_v11, 1  ;;  %v3466_v35 = vld [vmem:[#allocation3 + $0x24] sm:$0xf] }
 0x1b7   : > { %v2833_v59 = vadd.f32 %v8252_v2, %v2832_v12  ;;  %4207 = vrot.lane.b32.xlu1 %v4162_v40, %s6725_s9  ;;  %v6341_v5 = vpop.f32.mrb[6].mxu0  ;;  %v3919_v45 = vrot.slane %v3917_v14, 1  ;;  %v4420_v36 = vsel %vm1076_vm6, %v4415_v32, %v4419_v50  ;;  %v4165_v63 = vsel %vm1349_vm5, %v4163_v56, %v4164_v22  ;;  %v3477_v14 = vld [vmem:[#allocation3 + $0x38] sm:$0x1]  ;;  %v3470_v11 = vld [vmem:[#allocation3 + $0x2c] sm:$0x1] }
 0x1b8   : > { %5229 = vrot.lane.b32.xlu0 %v5183_v29, %s6729_s17  ;;  %v2949_v28 = vmax.f32 %v2841_v9, 0.0  ;;  %v2844_v34 = vadd.f32 %v6341_v5, %v8252_v2  ;;  %v2835_v7 = vpop.f32.mrb[7].mxu0  ;;  %v3915_v51 = vor.u32 %v3914_v17, %v3910_v52  ;;  %v4670_v13 = vrot.slane %v8332_v4, 1 }
 0x1b9   : > { %v2947_v15 = vmax.f32 %v2833_v59, 0.0  ;;  %v2836_v25 = vadd.f32 %v8252_v2, %v2835_v7  ;;  %v3900_v18 = vshll.u32 %v8326_v1, 16  ;;  %v3898_v0 = vshrl.u32 %v8326_v1, 16 }
 0x1ba   : > { %v6262_v39 = vpack.c.bf16 %v2949_v28, %v2949_v28  ;;  %v2950_v24 = vmax.f32 %v2844_v34, 0.0  ;;  %v3905_v55 = vshll.u32 %v8311_v38, 16  ;;  %v3920_v47 = vsel %vm1076_vm6, %v3915_v51, %v3919_v45 }
 0x1bb   : > { %v6260_v16 = vpack.c.bf16 %v2947_v15, %v2947_v15  ;;  %v2948_v62 = vmax.f32 %v2836_v25, 0.0  ;;  %4591 = vrot.lane.b32.xlu1 %v4420_v36, %s6724_s8  ;;  %v4671_v19 = vsel %vm1349_vm5, %v4669_v57, %v4670_v13  ;;  %v3902_v49 = vrot.slane %v3900_v18, 1 }
 0x1bc   : > { %4209 = vrot.lane.b32.xlu0 %v4165_v63, %s6725_s9  ;;  %v3179_v20 = vshrl.u32 %v6262_v39, 16  ;;  %v3182_v3 = vshll.u32 %v6262_v39, 16  ;;  %v6263_v60 = vpack.c.bf16 %v2950_v24, %v2950_v24  ;;  %v3907_v40 = vrot.slane %v3905_v55, 1 }
 0x1bd   : > { %v3162_v54 = vshrl.u32 %v6260_v16, 16  ;;  %v6261_v30 = vpack.c.bf16 %v2948_v62, %v2948_v62  ;;  %v3165_v43 = vshll.u32 %v6260_v16, 16  ;;  %v3903_v38 = vor.u32 %v3902_v49, %v3898_v0 }
 0x1be   : > { %v3181_v46 = vrot.slane %v3179_v20, 7  ;;  %v3187_v42 = vshrl.u32 %v6263_v60, 16  ;;  %v3190_v23 = vshll.u32 %v6263_v60, 16  ;;  %v4912_v59 = vshll.u32 %v8304_v58, 16 }
 0x1bf   : > { %v3164_v37 = vrot.slane %v3162_v54, 7  ;;  %v3170_v44 = vshrl.u32 %v6261_v30, 16  ;;  %4081 = vrot.lane.b32.xlu1 %v3920_v47, %s6719_s24  ;;  %v3173_v29 = vshll.u32 %v6261_v30, 16  ;;  %v3908_v9 = vsel %vm1076_vm6, %v3903_v38, %v3907_v40 }
 0x1c0   : > { %4717 = vrot.lane.b32.xlu0 %v4671_v19, %s6728_s16  ;;  %v3184_v8 = vor.u32 %v3182_v3, %v3181_v46  ;;  %v3185_v50 = vrot.slane %v3181_v46, 4  ;;  %v3189_v61 = vrot.slane %v3187_v42, 7  ;;  %v4917_v45 = vshll.u32 %v8316_v10, 16 }
 0x1c1   : > { %v3167_v22 = vor.u32 %v3165_v43, %v3164_v37  ;;  %v3168_v33 = vrot.slane %v3164_v37, 4  ;;  %v3172_v48 = vrot.slane %v3170_v44, 7  ;;  %v4910_v7 = vshrl.u32 %v8304_v58, 16 }
 0x1c2   : > { %v3474_v12 = vsel %vm8279_vm9, %v3184_v8, %v3473_v21  ;;  %v3192_v32 = vor.u32 %v3190_v23, %v3189_v61  ;;  %v3194_v56 = vrot.slane %v3189_v61, 4  ;;  %v4914_v36 = vrot.slane %v4912_v59, 1  ;;  %v6653_v59 = vld [vmem:[%s9455_s3] sm:$0xff]  }
 0x1c3   : > { %3475 = vst [vmem:[#allocation3 + $0x30] sm:$0xf] %v3474_v12  ;;  %v3467_v5 = vsel %vm8279_vm9, %v3167_v22, %v3466_v35  ;;  %v3175_v52 = vor.u32 %v3173_v29, %v3172_v48  ;;  %v3177_v17 = vrot.slane %v3172_v48, 4  ;;  %4079 = vrot.lane.b32.xlu1 %v3908_v9, %s6719_s24  ;;  %v4400_v10 = vshll.u32 %v8314_v31, 16  ;;  %6366 = vmatprep.subr.bf16.mxu1 %v6653_v59 }
 0x1c4   : > { %3468 = vst [vmem:[#allocation3 + $0x24] sm:$0xf] %v3467_v5  ;;  %v3193_v28 = vsel %vm6906_vm8, %v3185_v50, %v3192_v32  ;;  %v3478_v34 = vsel %vm8286_vm13, %v3194_v56, %v3477_v14  ;;  %v4915_v25 = vor.u32 %v4914_v36, %v4910_v7  ;;  %v4919_v51 = vrot.slane %v4917_v45, 1  ;;  %6367 = vmatpush3.bf16.msra.mxu1 %v6653_v59 }
 0x1c5   : > { %3476 = vst.msk [vmem:[#allocation3 + $0x34] sm:$0xf] %vm2975_vm0, %v3193_v28  ;;  %3479 = vst [vmem:[#allocation3 + $0x38] sm:$0x1] %v3478_v34  ;;  %v3176_v63 = vsel %vm6906_vm8, %v3168_v33, %v3175_v52  ;;  %v3471_v15 = vsel %vm8286_vm13, %v3177_v17, %v3470_v11  ;;  %v4405_v57 = vshll.u32 %v8332_v4, 16  ;;  %v4398_v58 = vshrl.u32 %v8314_v31, 16 }
 0x1c6   : > { %3469 = vst.msk [vmem:[#allocation3 + $0x28] sm:$0xf] %vm2975_vm0, %v3176_v63  ;;  %3472 = vst [vmem:[#allocation3 + $0x2c] sm:$0x1] %v3471_v15  ;;  %v4402_v39 = vrot.slane %v4400_v10, 1  ;;  %v4920_v24 = vsel %vm1076_vm6, %v4915_v25, %v4919_v51 }
 0x1c7   : > { %5101 = vrot.lane.b32.xlu0 %v4920_v24, %s6730_s20  ;;  %v4407_v18 = vrot.slane %v4405_v57, 1 }
 0x1c8   : > { %v4403_v13 = vor.u32 %v4402_v39, %v4398_v58 }
 0x1ca   : > { %v3634_v16 = vld [vmem:[#allocation3 + $0x30] sm:$0xf]  ;;  %v4408_v20 = vsel %vm1076_vm6, %v4403_v13, %v4407_v18 }
 0x1cb   : > { %v3697_v62 = vld [vmem:[#allocation3 + $0x30] sm:$0xf]  ;;  %4589 = vrot.lane.b32.xlu0 %v4408_v20, %s6724_s8  ;;  %v3695_v19 = vld [vmem:[#allocation3 + $0x24] sm:$0xf] }
 0x1cc   : > { %v3679_v0 = vld [vmem:[#allocation3 + $0x30] sm:$0xe]  ;;  %v3635_v3 = vld [vmem:[#allocation3 + $0x34] sm:$0xf]  ;;  %v3632_v43 = vld [vmem:[#allocation3 + $0x24] sm:$0xf] }
 0x1cd   : > { %v3743_v55 = vld [vmem:[#allocation3 + $0x30] sm:$0xe]  ;;  %v3698_v60 = vld [vmem:[#allocation3 + $0x34] sm:$0xf]  ;;  %v8379_v4 = vcombine.low %v3634_v16, %v3635_v3  ;;  %v3696_v47 = vld [vmem:[#allocation3 + $0x28] sm:$0xf]  ;;  %v6169_v54 = vcombine.low %v3679_v0, %v3635_v3 }
 0x1ce   : > { %v8381_v31 = vcombine.low %v3697_v62, %v3698_v60  ;;  %v6216_v30 = vcombine.low %v3743_v55, %v3698_v60  ;;  %v6597_v49 = vld [vmem:[#allocation3 + $0x38] ss:$0 sps:$4 sm:$0x11]   ;;  %v8387_v42 = vld [vmem:[#allocation3 + $0x28] sm:$0xf]  ;;  %v8392_v8 = vcombine.low %v3695_v19, %v3696_v47  ;;  %v6654_v0 = vld [vmem:[%s9455_s3 + $0x8] sm:$0xff]  }
 0x1cf   : > { %v8383_v46 = vld [vmem:[#allocation3 + $0x38] ss:$0 sps:$4 sm:$0x11]   ;;  %4323 = vrot.lane.b32.xlu1 %v8379_v4, %s6722_s27  ;;  %v3571_v23 = vld [vmem:[#allocation3 + $0x28] sm:$0xf]  ;;  %v4678_v21 = vrot.slane %v6169_v54, 1  ;;  %v8398_v33 = vcombine.low %v3632_v43, %v8387_v42  ;;  %6368 = vmatprep.subr.bf16.mxu1 %v6654_v0 }
 0x1d0   : > { %v4679_v37 = vrot.slane %v6597_v49, 1  ;;  %v5187_v44 = vrot.slane %v6216_v30, 1  ;;  %v5188_v38 = vrot.slane %v8383_v46, 1  ;;  %v3615_v40 = vld [vmem:[#allocation3 + $0x24] sm:$0xe]  ;;  %4833 = vrot.lane.b32.xlu0 %v8381_v31, %s6727_s15  ;;  %v4434_v22 = vshrl.u32 %v8379_v4, 16  ;;  %6369 = vmatpush3.bf16.msra.mxu1 %v6654_v0 }
 0x1d1   : > { %v8394_v50 = vld [vmem:[#allocation3 + $0x2c] ss:$0 sps:$4 sm:$0x11]   ;;  %v6121_v35 = vcombine.low %v3615_v40, %v3571_v23  ;;  %v3570_v61 = vld [vmem:[#allocation3 + $0x24] sm:$0xf]  ;;  %v4436_v17 = vshll.u32 %v8379_v4, 16 }
 0x1d2   : > { %v3572_v29 = vld [vmem:[#allocation3 + $0x30] sm:$0xf]  ;;  %v3573_v14 = vld [vmem:[#allocation3 + $0x34] sm:$0xf]  ;;  %v4167_v12 = vrot.slane %v8394_v50, 1  ;;  %v4680_v5 = vsel %vm1349_vm5, %v4678_v21, %v4679_v37  ;;  %v8409_v52 = vcombine.low %v3570_v61, %v3571_v23  ;;  %v4441_v45 = vshll.u32 %v6597_v49, 16 }
 0x1d3   : > { %v3616_v48 = vld [vmem:[#allocation3 + $0x30] sm:$0xe]  ;;  %4831 = vrot.lane.b32.xlu1 %v8392_v8, %s6727_s15  ;;  %v4166_v9 = vrot.slane %v6121_v35, 1  ;;  %v8403_v32 = vcombine.low %v3572_v29, %v3573_v14  ;;  %v6604_v56 = vld [vmem:[#allocation3 + $0x38] ss:$0 sps:$4 sm:$0x11]   ;;  %v5189_v7 = vsel %vm1349_vm5, %v5187_v44, %v5188_v38 }
 0x1d4   : > { %v6122_v11 = vcombine.low %v3616_v48, %v3573_v14  ;;  %v3742_v28 = vld [vmem:[#allocation3 + $0x24] sm:$0xe]  ;;  %4321 = vrot.lane.b32.xlu0 %v8398_v33, %s6722_s27  ;;  %v4170_v63 = vrot.slane %v6604_v56, 1  ;;  %v8415_v15 = vld [vmem:[#allocation3 + $0x2c] ss:$0 sps:$4 sm:$0x11]  }
 0x1d5   : > { %v6344_v34 = vpop.f32.mrb[8].mxu0  ;;  %v6215_v10 = vcombine.low %v3742_v28, %v3696_v47  ;;  %v4168_v57 = vsel %vm1349_vm5, %v4166_v9, %v4167_v12  ;;  %v4438_v58 = vrot.slane %v4436_v17, 1  ;;  %v4443_v39 = vrot.slane %v4441_v45, 1  ;;  %v6657_v49 = vld [vmem:[%s9455_s3 + $0x10] sm:$0xff]   ;;  %v3678_v44 = vld [vmem:[#allocation3 + $0x24] sm:$0xe] }
 0x1d6   : > { %v4169_v36 = vrot.slane %v6122_v11, 1  ;;  %v2857_v25 = vadd.f32 %v6344_v34, %v8252_v2  ;;  %v2848_v51 = vpop.f32.mrb[9].mxu0  ;;  %v5185_v16 = vrot.slane %v8415_v15, 1  ;;  %v3934_v62 = vshrl.u32 %v8403_v32, 16  ;;  %6370 = vmatprep.subr.bf16.mxu1 %v6657_v49  ;;  %v6660_v12 = vld [vmem:[%s9455_s3 + $0x18] sm:$0xff]  }
 0x1d7   : > { %v2849_v24 = vadd.f32 %v8252_v2, %v2848_v51  ;;  %4723 = vrot.lane.b32.xlu1 %v4680_v5, %s6728_s16  ;;  %v6345_v13 = vpop.f32.mrb[10].mxu0  ;;  %v5184_v18 = vrot.slane %v6215_v10, 1  ;;  %v4439_v60 = vor.u32 %v4438_v58, %v4434_v22  ;;  %v3936_v4 = vshll.u32 %v8403_v32, 16  ;;  %v8438_v9 = vld [vmem:[#allocation3 + $0x2c] ss:$0 sps:$4 sm:$0x11]   ;;  %6371 = vmatpush3.bf16.msra.mxu1 %v6657_v49 }
 0x1d8   : > { %v2953_v55 = vmax.f32 %v2857_v25, 0.0  ;;  %v2860_v20 = vadd.f32 %v6345_v13, %v8252_v2  ;;  %v2851_v3 = vpop.f32.mrb[11].mxu0  ;;  %5233 = vrot.lane.b32.xlu0 %v5189_v7, %s6729_s17  ;;  %v4171_v30 = vsel %vm1349_vm5, %v4169_v36, %v4170_v63  ;;  %v3941_v19 = vshll.u32 %v6604_v56, 16  ;;  %v3487_v34 = vld [vmem:[#allocation3 + $0x48] sm:$0xf]  ;;  %6372 = vmatprep.subr.bf16.mxu1 %v6660_v12 }
 0x1d9   : > { %v2951_v47 = vmax.f32 %v2849_v24, 0.0  ;;  %v2852_v54 = vadd.f32 %v8252_v2, %v2851_v3  ;;  %v5186_v21 = vsel %vm1349_vm5, %v5184_v18, %v5185_v16  ;;  %v3938_v37 = vrot.slane %v3936_v4, 1  ;;  %v3491_v18 = vld [vmem:[#allocation3 + $0x50] sm:$0x1]  ;;  %v3484_v3 = vld [vmem:[#allocation3 + $0x44] sm:$0x1] }
 0x1da   : > { %v6266_v43 = vpack.c.bf16 %v2953_v55, %v2953_v55  ;;  %v2954_v23 = vmax.f32 %v2860_v20, 0.0  ;;  %v4444_v35 = vsel %vm1076_vm6, %v4439_v60, %v4443_v39  ;;  %v6168_v61 = vcombine.low %v3678_v44, %v8387_v42 }
 0x1db   : > { %v6264_v38 = vpack.c.bf16 %v2951_v47, %v2951_v47  ;;  %v2952_v40 = vmax.f32 %v2852_v54, 0.0  ;;  %4211 = vrot.lane.b32.xlu1 %v4168_v57, %s6725_s9  ;;  %v3939_v14 = vor.u32 %v3938_v37, %v3934_v62  ;;  %v3943_v48 = vrot.slane %v3941_v19, 1  ;;  %v3480_v57 = vld [vmem:[#allocation3 + $0x3c] sm:$0xf]  ;;  %6373 = vmatpush3.bf16.msra.mxu1 %v6660_v12 }
 0x1dc   : > { %v3213_v29 = vshrl.u32 %v6266_v43, 16  ;;  %v6267_v22 = vpack.c.bf16 %v2954_v23, %v2954_v23  ;;  %v3216_v56 = vshll.u32 %v6266_v43, 16  ;;  %4213 = vrot.lane.b32.xlu0 %v4171_v30, %s6725_s9  ;;  %v4675_v28 = vrot.slane %v6168_v61, 1 }
 0x1dd   : > { %v3196_v11 = vshrl.u32 %v6264_v38, 16  ;;  %v3199_v59 = vshll.u32 %v6264_v38, 16  ;;  %v6265_v5 = vpack.c.bf16 %v2952_v40, %v2952_v40  ;;  %v3944_v10 = vsel %vm1076_vm6, %v3939_v14, %v3943_v48 }
 0x1de   : > { %v3215_v17 = vrot.slane %v3213_v29, 7  ;;  %v3221_v45 = vshrl.u32 %v6267_v22, 16  ;;  %v3224_v42 = vshll.u32 %v6267_v22, 16  ;;  %v4676_v39 = vrot.slane %v8438_v9, 1 }
 0x1df   : > { %v3198_v7 = vrot.slane %v3196_v11, 7  ;;  %v3204_v36 = vshrl.u32 %v6265_v5, 16  ;;  %v3207_v63 = vshll.u32 %v6265_v5, 16  ;;  %4595 = vrot.lane.b32.xlu1 %v4444_v35, %s6724_s8  ;;  %v4922_v62 = vshrl.u32 %v8392_v8, 16 }
 0x1e0   : > { %v3218_v25 = vor.u32 %v3216_v56, %v3215_v17  ;;  %v3219_v51 = vrot.slane %v3215_v17, 4  ;;  %v3223_v58 = vrot.slane %v3221_v45, 7  ;;  %5231 = vrot.lane.b32.xlu0 %v5186_v21, %s6729_s17  ;;  %v4924_v60 = vshll.u32 %v8392_v8, 16 }
 0x1e1   : > { %v3201_v24 = vor.u32 %v3199_v59, %v3198_v7  ;;  %v3202_v13 = vrot.slane %v3198_v7, 4  ;;  %v3206_v16 = vrot.slane %v3204_v36, 7  ;;  %v4929_v30 = vshll.u32 %v8415_v15, 16 }
 0x1e2   : > { %v3488_v0 = vsel %vm8279_vm9, %v3218_v25, %v3487_v34  ;;  %v3226_v55 = vor.u32 %v3224_v42, %v3223_v58  ;;  %v3228_v20 = vrot.slane %v3223_v58, 4  ;;  %v4677_v8 = vsel %vm1349_vm5, %v4675_v28, %v4676_v39 }
 0x1e3   : > { %3489 = vst [vmem:[#allocation3 + $0x48] sm:$0xf] %v3488_v0  ;;  %v3481_v4 = vsel %vm8279_vm9, %v3201_v24, %v3480_v57  ;;  %v3209_v47 = vor.u32 %v3207_v63, %v3206_v16  ;;  %v3211_v54 = vrot.slane %v3206_v16, 4  ;;  %4085 = vrot.lane.b32.xlu1 %v3944_v10, %s6719_s24  ;;  %v4926_v43 = vrot.slane %v4924_v60, 1 }
 0x1e4   : > { %3482 = vst [vmem:[#allocation3 + $0x3c] sm:$0xf] %v3481_v4  ;;  %v3227_v19 = vsel %vm6906_vm8, %v3219_v51, %v3226_v55  ;;  %v3492_v49 = vsel %vm8286_vm13, %v3228_v20, %v3491_v18  ;;  %4721 = vrot.lane.b32.xlu0 %v4677_v8, %s6728_s16  ;;  %v4934_v15 = vshrl.u32 %v8381_v31, 16  ;;  %v4936_v37 = vshll.u32 %v8381_v31, 16  ;;  %v6664_v31 = vld [vmem:[%s9455_s3 + $0x20] ss:$0 sps:$4 sm:$0xff]  }
 0x1e5   : > { %3490 = vst.msk [vmem:[#allocation3 + $0x4c] sm:$0xf] %vm2975_vm0, %v3227_v19  ;;  %3493 = vst [vmem:[#allocation3 + $0x50] sm:$0x1] %v3492_v49  ;;  %v3210_v23 = vsel %vm6906_vm8, %v3202_v13, %v3209_v47  ;;  %v3485_v21 = vsel %vm8286_vm13, %v3211_v54, %v3484_v3  ;;  %v4927_v44 = vor.u32 %v4926_v43, %v4922_v62  ;;  %v4931_v38 = vrot.slane %v4929_v30, 1 }
 0x1e6   : > { %3483 = vst.msk [vmem:[#allocation3 + $0x40] sm:$0xf] %vm2975_vm0, %v3210_v23  ;;  %3486 = vst [vmem:[#allocation3 + $0x44] sm:$0x1] %v3485_v21  ;;  %v4941_v40 = vshll.u32 %v8383_v46, 16  ;;  %v3924_v35 = vshll.u32 %v8409_v52, 16  ;;  %6409 = vmatprep.subr.msk.bf16.mxu1 %vm5597_vm2, %v6664_v31 }
 0x1e7   : > { %v4938_v61 = vrot.slane %v4936_v37, 1  ;;  %v3922_v29 = vshrl.u32 %v8409_v52, 16  ;;  %v3929_v22 = vshll.u32 %v8394_v50, 16  ;;  %v4424_v14 = vshll.u32 %v8398_v33, 16 }
 0x1e8   : > { %v4932_v48 = vsel %vm1076_vm6, %v4927_v44, %v4931_v38  ;;  %v3926_v12 = vrot.slane %v3924_v35, 1  ;;  %v4422_v56 = vshrl.u32 %v8398_v33, 16  ;;  %v4429_v46 = vshll.u32 %v8438_v9, 16 }
 0x1e9   : > { %5103 = vrot.lane.b32.xlu1 %v4932_v48, %s6730_s20  ;;  %v4939_v11 = vor.u32 %v4938_v61, %v4934_v15  ;;  %v4943_v59 = vrot.slane %v4941_v40, 1  ;;  %v4426_v5 = vrot.slane %v4424_v14, 1  ;;  %v3931_v17 = vrot.slane %v3929_v22, 1 }
 0x1ea   : > { %v3927_v50 = vor.u32 %v3926_v12, %v3922_v29  ;;  %v5599_v45 = vsel %vm5597_vm2, %v6664_v31, 0  ;;  %v4431_v34 = vrot.slane %v4429_v46, 1  ;;  %v3638_v7 = vld [vmem:[#allocation3 + $0x48] sm:$0xf] }
 0x1eb   : > { %v4944_v42 = vsel %vm1076_vm6, %v4939_v11, %v4943_v59  ;;  %v4427_v28 = vor.u32 %v4426_v5, %v4422_v56  ;;  %v3681_v36 = vld [vmem:[#allocation3 + $0x48] sm:$0xe]  ;;  %6375 = vmatpush3.bf16.msra.mxu1 %v5599_v45  ;;  %v3699_v51 = vld [vmem:[#allocation3 + $0x3c] sm:$0xf] }
 0x1ec   : > { %5105 = vrot.lane.b32.xlu0 %v4944_v42, %s6730_s20  ;;  %v3932_v33 = vsel %vm1076_vm6, %v3927_v50, %v3931_v17  ;;  %v3639_v9 = vld [vmem:[#allocation3 + $0x4c] sm:$0xf]  ;;  %v3701_v25 = vld [vmem:[#allocation3 + $0x48] sm:$0xf]  ;;  %v3636_v60 = vld [vmem:[#allocation3 + $0x3c] sm:$0xf] }
 0x1ed   : > { %v3702_v63 = vld [vmem:[#allocation3 + $0x4c] sm:$0xf]  ;;  %4083 = vrot.lane.b32.xlu1 %v3932_v33, %s6719_s24  ;;  %v6139_v10 = vcombine.low %v3638_v7, %v3639_v9  ;;  %v8486_v57 = vld [vmem:[#allocation3 + $0x40] sm:$0xf]  ;;  %v6171_v58 = vcombine.low %v3681_v36, %v3639_v9  ;;  %v3745_v13 = vld [vmem:[#allocation3 + $0x48] sm:$0xe]  ;;  %v4432_v18 = vsel %vm1076_vm6, %v4427_v28, %v4431_v34 }
 0x1ee   : > { %v8488_v39 = vld [vmem:[#allocation3 + $0x40] sm:$0xf]  ;;  %v6612_v24 = vld [vmem:[#allocation3 + $0x50] ss:$0 sps:$4 sm:$0x11]   ;;  %v6218_v0 = vcombine.low %v3745_v13, %v3702_v63  ;;  %v8494_v20 = vcombine.low %v3701_v25, %v3702_v63  ;;  %v8497_v3 = vcombine.low %v3699_v51, %v8486_v57 }
 0x1ef   : > { %v4684_v16 = vrot.slane %v6171_v58, 1  ;;  %v8491_v62 = vld [vmem:[#allocation3 + $0x50] ss:$0 sps:$4 sm:$0x11]   ;;  %v3575_v55 = vld [vmem:[#allocation3 + $0x40] sm:$0xf]  ;;  %v8504_v37 = vcombine.low %v3636_v60, %v8488_v39 }
 0x1f0   : > { %4593 = vrot.lane.b32.xlu0 %v4432_v18, %s6724_s8  ;;  %v4685_v4 = vrot.slane %v6612_v24, 1  ;;  %v3617_v47 = vld [vmem:[#allocation3 + $0x3c] sm:$0xe]  ;;  %v4458_v54 = vshrl.u32 %v6139_v10, 16  ;;  %v5193_v30 = vrot.slane %v6218_v0, 1  ;;  %v5194_v19 = vrot.slane %v8491_v62, 1 }
 0x1f1   : > { %4327 = vrot.lane.b32.xlu1 %v6139_v10, %s6722_s27  ;;  %v8501_v49 = vld [vmem:[#allocation3 + $0x44] ss:$0 sps:$4 sm:$0x11]   ;;  %v6123_v8 = vcombine.low %v3617_v47, %v3575_v55  ;;  %v4460_v43 = vshll.u32 %v6139_v10, 16  ;;  %v3574_v23 = vld [vmem:[#allocation3 + $0x3c] sm:$0xf] }
 0x1f2   : > { %v3576_v21 = vld [vmem:[#allocation3 + $0x48] sm:$0xf]  ;;  %v3577_v15 = vld [vmem:[#allocation3 + $0x4c] sm:$0xf]  ;;  %v4173_v38 = vrot.slane %v8501_v49, 1  ;;  %v4465_v14 = vshll.u32 %v6612_v24, 16  ;;  %v4686_v48 = vsel %vm1349_vm5, %v4684_v16, %v4685_v4  ;;  %v5195_v12 = vsel %vm1349_vm5, %v5193_v30, %v5194_v19 }
 0x1f3   : > { %v4172_v44 = vrot.slane %v6123_v8, 1  ;;  %v3618_v40 = vld [vmem:[#allocation3 + $0x48] sm:$0xe]  ;;  %v8509_v35 = vcombine.low %v3576_v21, %v3577_v15  ;;  %v6619_v61 = vld [vmem:[#allocation3 + $0x50] ss:$0 sps:$4 sm:$0x11]   ;;  %v8515_v56 = vcombine.low %v3574_v23, %v3575_v55 }
 0x1f4   : > { %4837 = vrot.lane.b32.xlu0 %v8494_v20, %s6727_s15  ;;  %v6124_v29 = vcombine.low %v3618_v40, %v3577_v15  ;;  %v4462_v22 = vrot.slane %v4460_v43, 1  ;;  %v3744_v46 = vld [vmem:[#allocation3 + $0x3c] sm:$0xe]  ;;  %v4946_v11 = vshrl.u32 %v8497_v3, 16  ;;  %v4176_v45 = vrot.slane %v6619_v61, 1 }
 0x1f5   : > { %4835 = vrot.lane.b32.xlu1 %v8497_v3, %s6727_s15  ;;  %v6348_v31 = vpop.f32.mrb[12].mxu0  ;;  %v4174_v50 = vsel %vm1349_vm5, %v4172_v44, %v4173_v38  ;;  %v8520_v42 = vld [vmem:[#allocation3 + $0x44] ss:$0 sps:$4 sm:$0x11]   ;;  %v4467_v36 = vrot.slane %v4465_v14, 1  ;;  %v6217_v33 = vcombine.low %v3744_v46, %v8486_v57  ;;  %v3958_v51 = vshrl.u32 %v8509_v35, 16 }
 0x1f6   : > { %v2873_v59 = vadd.f32 %v6348_v31, %v8252_v2  ;;  %v2864_v5 = vpop.f32.mrb[13].mxu0  ;;  %v4175_v17 = vrot.slane %v6124_v29, 1  ;;  %v4463_v7 = vor.u32 %v4462_v22, %v4458_v54  ;;  %v5191_v25 = vrot.slane %v8520_v42, 1  ;;  %v3680_v30 = vld [vmem:[#allocation3 + $0x3c] sm:$0xe] }
 0x1f7   : > { %v2865_v28 = vadd.f32 %v8252_v2, %v2864_v5  ;;  %v6349_v34 = vpop.f32.mrb[14].mxu0  ;;  %v5190_v18 = vrot.slane %v6217_v33, 1  ;;  %v3960_v0 = vshll.u32 %v8509_v35, 16  ;;  %v3965_v55 = vshll.u32 %v6619_v61, 16  ;;  %v3501_v14 = vld [vmem:[#allocation3 + $0x60] sm:$0xf] }
 0x1f8   : > { %4325 = vrot.lane.b32.xlu0 %v8504_v37, %s6722_s27  ;;  %v2957_v9 = vmax.f32 %v2873_v59, 0.0  ;;  %v2876_v63 = vadd.f32 %v6349_v34, %v8252_v2  ;;  %v2867_v10 = vpop.f32.mrb[15].mxu0  ;;  %v4177_v13 = vsel %vm1349_vm5, %v4175_v17, %v4176_v45  ;;  %v4468_v47 = vsel %vm1076_vm6, %v4463_v7, %v4467_v36  ;;  %v8538_v38 = vld [vmem:[#allocation3 + $0x44] ss:$0 sps:$4 sm:$0x11]  }
 0x1f9   : > { %v2955_v58 = vmax.f32 %v2865_v28, 0.0  ;;  %4727 = vrot.lane.b32.xlu1 %v4686_v48, %s6728_s16  ;;  %v2868_v24 = vadd.f32 %v8252_v2, %v2867_v10  ;;  %v5192_v54 = vsel %vm1349_vm5, %v5190_v18, %v5191_v25  ;;  %v3962_v2 = vrot.slane %v3960_v0, 1  ;;  %v3498_v10 = vld [vmem:[#allocation3 + $0x5c] sm:$0x1] }
 0x1fa   : > { %v6270_v57 = vpack.c.bf16 %v2957_v9, %v2957_v9  ;;  %v2958_v16 = vmax.f32 %v2876_v63, 0.0  ;;  %v6170_v43 = vcombine.low %v3680_v30, %v8488_v39  ;;  %v3967_v22 = vrot.slane %v3965_v55, 1  ;;  %v3494_v39 = vld [vmem:[#allocation3 + $0x54] sm:$0xf] }
 0x1fb   : > { %v6268_v60 = vpack.c.bf16 %v2955_v58, %v2955_v58  ;;  %v2956_v4 = vmax.f32 %v2868_v24, 0.0  ;;  %v3963_v29 = vor.u32 %v3962_v2, %v3958_v51  ;;  %v4682_v36 = vrot.slane %v8538_v38, 1 }
 0x1fc   : > { %v3247_v19 = vshrl.u32 %v6270_v57, 16  ;;  %v6271_v8 = vpack.c.bf16 %v2958_v16, %v2958_v16  ;;  %5237 = vrot.lane.b32.xlu0 %v5195_v12, %s6729_s17  ;;  %v3250_v23 = vshll.u32 %v6270_v57, 16  ;;  %v4681_v45 = vrot.slane %v6170_v43, 1 }
 0x1fd   : > { %v3230_v21 = vshrl.u32 %v6268_v60, 16  ;;  %v3233_v15 = vshll.u32 %v6268_v60, 16  ;;  %v6269_v44 = vpack.c.bf16 %v2956_v4, %v2956_v4  ;;  %4215 = vrot.lane.b32.xlu1 %v4174_v50, %s6725_s9  ;;  %v3505_v50 = vld [vmem:[#allocation3 + $0x68] sm:$0x1]  ;;  %v3968_v7 = vsel %vm1076_vm6, %v3963_v29, %v3967_v22 }
 0x1fe   : > { %v3249_v40 = vrot.slane %v3247_v19, 7  ;;  %v3255_v61 = vshrl.u32 %v6271_v8, 16  ;;  %v3258_v48 = vshll.u32 %v6271_v8, 16  ;;  %v4948_v25 = vshll.u32 %v8497_v3, 16 }
 0x1ff   : > { %v3232_v31 = vrot.slane %v3230_v21, 7  ;;  %v3238_v46 = vshrl.u32 %v6269_v44, 16  ;;  %v3241_v12 = vshll.u32 %v6269_v44, 16  ;;  %v4953_v0 = vshll.u32 %v8520_v42, 16 }
 0x200   : > { %v3252_v59 = vor.u32 %v3250_v23, %v3249_v40  ;;  %v3253_v5 = vrot.slane %v3249_v40, 4  ;;  %v3257_v17 = vrot.slane %v3255_v61, 7  ;;  %4217 = vrot.lane.b32.xlu0 %v4177_v13, %s6725_s9  ;;  %v4950_v16 = vrot.slane %v4948_v25, 1 }
 0x201   : > { %v3235_v28 = vor.u32 %v3233_v15, %v3232_v31  ;;  %v3240_v34 = vrot.slane %v3238_v46, 7  ;;  %4599 = vrot.lane.b32.xlu1 %v4468_v47, %s6724_s8  ;;  %v3236_v51 = vrot.slane %v3232_v31, 4  ;;  %v4960_v4 = vshll.u32 %v8494_v20, 16 }
 0x202   : > { %v3502_v33 = vsel %vm8279_vm9, %v3252_v59, %v3501_v14  ;;  %v3260_v9 = vor.u32 %v3258_v48, %v3257_v17  ;;  %v3262_v63 = vrot.slane %v3257_v17, 4  ;;  %v4683_v47 = vsel %vm1349_vm5, %v4681_v45, %v4682_v36 }
 0x203   : > { %3503 = vst [vmem:[#allocation3 + $0x60] sm:$0xf] %v3502_v33  ;;  %v3495_v58 = vsel %vm8279_vm9, %v3235_v28, %v3494_v39  ;;  %v3243_v24 = vor.u32 %v3241_v12, %v3240_v34  ;;  %v3245_v13 = vrot.slane %v3240_v34, 4  ;;  %v4951_v42 = vor.u32 %v4950_v16, %v4946_v11 }
 0x204   : > { %3496 = vst [vmem:[#allocation3 + $0x54] sm:$0xf] %v3495_v58  ;;  %v3261_v18 = vsel %vm6906_vm8, %v3253_v5, %v3260_v9  ;;  %v3506_v57 = vsel %vm8286_vm13, %v3262_v63, %v3505_v50  ;;  %5235 = vrot.lane.b32.xlu0 %v5192_v54, %s6729_s17  ;;  %v4955_v54 = vrot.slane %v4953_v0, 1  ;;  %v4965_v30 = vshll.u32 %v8491_v62, 16 }
 0x205   : > { %3504 = vst.msk [vmem:[#allocation3 + $0x64] sm:$0xf] %vm2975_vm0, %v3261_v18  ;;  %3507 = vst [vmem:[#allocation3 + $0x68] sm:$0x1] %v3506_v57  ;;  %v3244_v55 = vsel %vm6906_vm8, %v3236_v51, %v3243_v24  ;;  %v3499_v60 = vsel %vm8286_vm13, %v3245_v13, %v3498_v10  ;;  %4089 = vrot.lane.b32.xlu1 %v3968_v7, %s6719_s24  ;;  %v4958_v19 = vshrl.u32 %v8494_v20, 16  ;;  %v4962_v8 = vrot.slane %v4960_v4, 1 }
 0x206   : > { %3497 = vst.msk [vmem:[#allocation3 + $0x58] sm:$0xf] %vm2975_vm0, %v3244_v55  ;;  %3500 = vst [vmem:[#allocation3 + $0x5c] sm:$0x1] %v3499_v60  ;;  %v3948_v2 = vshll.u32 %v8515_v56, 16  ;;  %v3953_v43 = vshll.u32 %v8501_v49, 16  ;;  %v4956_v23 = vsel %vm1076_vm6, %v4951_v42, %v4955_v54 }
 0x207   : > { %v4448_v21 = vshll.u32 %v8504_v37, 16  ;;  %v4453_v15 = vshll.u32 %v8538_v38, 16  ;;  %v4963_v3 = vor.u32 %v4962_v8, %v4958_v19  ;;  %v4967_v11 = vrot.slane %v4965_v30, 1 }
 0x208   : > { %4725 = vrot.lane.b32.xlu0 %v4683_v47, %s6728_s16  ;;  %v3946_v62 = vshrl.u32 %v8515_v56, 16  ;;  %v3950_v20 = vrot.slane %v3948_v2, 1  ;;  %v4446_v44 = vshrl.u32 %v8504_v37, 16  ;;  %v3955_v29 = vrot.slane %v3953_v43, 1 }
 0x209   : > { %5107 = vrot.lane.b32.xlu1 %v4956_v23, %s6730_s20  ;;  %v4450_v40 = vrot.slane %v4448_v21, 1  ;;  %v4968_v49 = vsel %vm1076_vm6, %v4963_v3, %v4967_v11  ;;  %v4455_v22 = vrot.slane %v4453_v15, 1  ;;  %v8608_v3 = vpop.permute.xlu0 %4077 }
 0x20a   : > { %v3951_v61 = vor.u32 %v3950_v20, %v3946_v62  ;;  %v3642_v14 = vld [vmem:[#allocation3 + $0x60] sm:$0xf] }
 0x20b   : > { %v3683_v31 = vld [vmem:[#allocation3 + $0x60] sm:$0xe]  ;;  %v4451_v38 = vor.u32 %v4450_v40, %v4446_v44  ;;  %v3703_v34 = vld [vmem:[#allocation3 + $0x54] sm:$0xf]  ;;  %v8617_v44 = vld [vmem:[%s9454_s2] ss:$0 sm:$0xff] }
 0x20c   : > { %5109 = vrot.lane.b32.xlu0 %v4968_v49, %s6730_s20  ;;  %v3643_v48 = vld [vmem:[#allocation3 + $0x64] sm:$0xf]  ;;  %v3956_v12 = vsel %vm1076_vm6, %v3951_v61, %v3955_v29  ;;  %v3705_v5 = vld [vmem:[#allocation3 + $0x60] sm:$0xf]  ;;  %v3640_v63 = vld [vmem:[#allocation3 + $0x54] sm:$0xf] }
 0x20d   : > { %v3706_v46 = vld [vmem:[#allocation3 + $0x64] sm:$0xf]  ;;  %v6141_v59 = vcombine.low %v3642_v14, %v3643_v48  ;;  %v8580_v39 = vld [vmem:[#allocation3 + $0x58] sm:$0xf]  ;;  %v6173_v37 = vcombine.low %v3683_v31, %v3643_v48  ;;  %4087 = vrot.lane.b32.xlu1 %v3956_v12, %s6719_s24  ;;  %v3747_v28 = vld [vmem:[#allocation3 + $0x60] sm:$0xe]  ;;  %v4456_v50 = vsel %vm1076_vm6, %v4451_v38, %v4455_v22 }
 0x20e   : > { %v8583_v17 = vld [vmem:[#allocation3 + $0x58] sm:$0xf]  ;;  %v6627_v45 = vld [vmem:[#allocation3 + $0x68] ss:$0 sps:$4 sm:$0x11]   ;;  %v6220_v36 = vcombine.low %v3747_v28, %v3706_v46  ;;  %v8589_v9 = vcombine.low %v3705_v5, %v3706_v46  ;;  %v8596_v16 = vcombine.low %v3703_v34, %v8580_v39 }
 0x20f   : > { %v8586_v7 = vld [vmem:[#allocation3 + $0x68] ss:$0 sps:$4 sm:$0x11]   ;;  %v3579_v33 = vld [vmem:[#allocation3 + $0x58] sm:$0xf]  ;;  %v4690_v10 = vrot.slane %v6173_v37, 1  ;;  %v8599_v4 = vcombine.low %v3640_v63, %v8583_v17 }
 0x210   : > { %4597 = vrot.lane.b32.xlu0 %v4456_v50, %s6724_s8  ;;  %v4691_v25 = vrot.slane %v6627_v45, 1  ;;  %v3619_v51 = vld [vmem:[#allocation3 + $0x54] sm:$0xe]  ;;  %v5199_v58 = vrot.slane %v6220_v36, 1  ;;  %v5200_v24 = vrot.slane %v8586_v7, 1  ;;  %v4484_v57 = vshll.u32 %v6141_v59, 16 }
 0x211   : > { %v8592_v13 = vld [vmem:[#allocation3 + $0x5c] ss:$0 sps:$4 sm:$0x11]   ;;  %v6125_v18 = vcombine.low %v3619_v51, %v3579_v33  ;;  %4331 = vrot.lane.b32.xlu1 %v6141_v59, %s6722_s27  ;;  %v3578_v0 = vld [vmem:[#allocation3 + $0x54] sm:$0xf]  ;;  %v4489_v43 = vshll.u32 %v6627_v45, 16 }
 0x212   : > { %v3580_v55 = vld [vmem:[#allocation3 + $0x60] sm:$0xf]  ;;  %v3581_v60 = vld [vmem:[#allocation3 + $0x64] sm:$0xf]  ;;  %v4179_v42 = vrot.slane %v8592_v13, 1  ;;  %v4486_v2 = vrot.slane %v4484_v57, 1  ;;  %v4692_v21 = vsel %vm1349_vm5, %v4690_v10, %v4691_v25  ;;  %v5201_v15 = vsel %vm1349_vm5, %v5199_v58, %v5200_v24 }
 0x213   : > { %v4178_v47 = vrot.slane %v6125_v18, 1  ;;  %v3620_v54 = vld [vmem:[#allocation3 + $0x60] sm:$0xe]  ;;  %v8604_v30 = vcombine.low %v3580_v55, %v3581_v60  ;;  %v6634_v19 = vld [vmem:[#allocation3 + $0x68] ss:$0 sps:$4 sm:$0x11]   ;;  %v8610_v11 = vcombine.low %v3578_v0, %v3579_v33  ;;  %v8635_v18 = vpop.permute.xlu0 %4205 }
 0x214   : > { %4841 = vrot.lane.b32.xlu0 %v8589_v9, %s6727_s15  ;;  %v6126_v8 = vcombine.low %v3620_v54, %v3581_v60  ;;  %v4482_v62 = vshrl.u32 %v6141_v59, 16  ;;  %v3746_v20 = vld [vmem:[#allocation3 + $0x54] sm:$0xe]  ;;  %v8621_v22 = vld [vmem:[#allocation3 + $0x5c] ss:$0 sps:$4 sm:$0x11]  }
 0x215   : > { %v6352_v23 = vpop.f32.mrb[16].mxu0  ;;  %4839 = vrot.lane.b32.xlu1 %v8596_v16, %s6727_s15  ;;  %v4180_v61 = vsel %vm1349_vm5, %v4178_v47, %v4179_v42  ;;  %v4970_v14 = vshrl.u32 %v8596_v16, 16  ;;  %v4182_v48 = vrot.slane %v6634_v19, 1  ;;  %v6219_v12 = vcombine.low %v3746_v20, %v8580_v39  ;;  %v3682_v0 = vld [vmem:[#allocation3 + $0x54] sm:$0xe] }
 0x216   : > { %v2889_v40 = vadd.f32 %v8617_v44, %v6352_v23  ;;  %v2880_v49 = vpop.f32.mrb[17].mxu0  ;;  %v4181_v29 = vrot.slane %v6126_v8, 1  ;;  %v4487_v46 = vor.u32 %v4486_v2, %v4482_v62  ;;  %v4491_v45 = vrot.slane %v4489_v43, 1  ;;  %v8641_v43 = vld [vmem:[#allocation3 + $0x5c] ss:$0 sps:$4 sm:$0x11]  }
 0x217   : > { %v2881_v31 = vadd.f32 %v8617_v44, %v2880_v49  ;;  %v6353_v38 = vpop.f32.mrb[18].mxu0  ;;  %v3982_v28 = vshrl.u32 %v8604_v30, 16  ;;  %v5196_v36 = vrot.slane %v6219_v12, 1  ;;  %v5197_v33 = vrot.slane %v8621_v22, 1 }
 0x218   : > { %4329 = vrot.lane.b32.xlu0 %v8599_v4, %s6722_s27  ;;  %v2961_v59 = vmax.f32 %v2889_v40, 0.0  ;;  %v2892_v5 = vadd.f32 %v8617_v44, %v6353_v38  ;;  %v2883_v37 = vpop.f32.mrb[19].mxu0  ;;  %v3984_v10 = vshll.u32 %v8604_v30, 16  ;;  %v3989_v25 = vshll.u32 %v6634_v19, 16  ;;  %v3515_v40 = vld [vmem:[#allocation3 + $0x78] sm:$0xf] }
 0x219   : > { %v2959_v50 = vmax.f32 %v2881_v31, 0.0  ;;  %v2884_v34 = vadd.f32 %v8617_v44, %v2883_v37  ;;  %4731 = vrot.lane.b32.xlu1 %v4692_v21, %s6728_s16  ;;  %v4183_v24 = vsel %vm1349_vm5, %v4181_v29, %v4182_v48  ;;  %v4492_v57 = vsel %vm1076_vm6, %v4487_v46, %v4491_v45  ;;  %v3519_v37 = vld [vmem:[#allocation3 + $0x80] sm:$0x1] }
 0x21a   : > { %v6274_v63 = vpack.c.bf16 %v2961_v59, %v2961_v59  ;;  %v2962_v39 = vmax.f32 %v2892_v5, 0.0  ;;  %v3986_v47 = vrot.slane %v3984_v10, 1  ;;  %v6172_v42 = vcombine.low %v3682_v0, %v8583_v17  ;;  %v3508_v17 = vld [vmem:[#allocation3 + $0x6c] sm:$0xf] }
 0x21b   : > { %v6272_v51 = vpack.c.bf16 %v2959_v50, %v2959_v50  ;;  %v2960_v58 = vmax.f32 %v2884_v34, 0.0  ;;  %v5198_v19 = vsel %vm1349_vm5, %v5196_v36, %v5197_v33  ;;  %v3991_v20 = vrot.slane %v3989_v25, 1 }
 0x21c   : > { %v3281_v55 = vshrl.u32 %v6274_v63, 16  ;;  %v6275_v60 = vpack.c.bf16 %v2962_v39, %v2962_v39  ;;  %5241 = vrot.lane.b32.xlu0 %v5201_v15, %s6729_s17  ;;  %v3284_v54 = vshll.u32 %v6274_v63, 16  ;;  %v3987_v31 = vor.u32 %v3986_v47, %v3982_v28  ;;  %v3512_v63 = vld [vmem:[#allocation3 + $0x74] sm:$0x1] }
 0x21d   : > { %v3264_v8 = vshrl.u32 %v6272_v51, 16  ;;  %v6273_v2 = vpack.c.bf16 %v2960_v58, %v2960_v58  ;;  %v3267_v21 = vshll.u32 %v6272_v51, 16  ;;  %4219 = vrot.lane.b32.xlu1 %v4180_v61, %s6725_s9  ;;  %v4687_v12 = vrot.slane %v6172_v42, 1 }
 0x21e   : > { %v3283_v23 = vrot.slane %v3281_v55, 7  ;;  %v3289_v62 = vshrl.u32 %v6275_v60, 16  ;;  %v3292_v29 = vshll.u32 %v6275_v60, 16  ;;  %v4688_v34 = vrot.slane %v8641_v43, 1 }
 0x21f   : > { %v3266_v49 = vrot.slane %v3264_v8, 7  ;;  %v3272_v15 = vshrl.u32 %v6273_v2, 16  ;;  %v3275_v46 = vshll.u32 %v6273_v2, 16  ;;  %v4972_v39 = vshll.u32 %v8596_v16, 16 }
 0x220   : > { %v3286_v38 = vor.u32 %v3284_v54, %v3283_v23  ;;  %v3291_v48 = vrot.slane %v3289_v62, 7  ;;  %4221 = vrot.lane.b32.xlu0 %v4183_v24, %s6725_s9  ;;  %v3287_v59 = vrot.slane %v3283_v23, 4  ;;  %v3992_v42 = vsel %vm1076_vm6, %v3987_v31, %v3991_v20 }
 0x221   : > { %v3269_v5 = vor.u32 %v3267_v21, %v3266_v49  ;;  %v3274_v45 = vrot.slane %v3272_v15, 7  ;;  %v8645_v50 = vpop.permute.xlu1 %4319  ;;  %4603 = vrot.lane.b32.xlu1 %v4492_v57, %s6724_s8  ;;  %v3270_v10 = vrot.slane %v3266_v49, 4  ;;  %v4974_v55 = vrot.slane %v4972_v39, 1 }
 0x222   : > { %v8647_v61 = vpop.permute.xlu0 %4829  ;;  %v3516_v28 = vsel %vm8279_vm9, %v3286_v38, %v3515_v40  ;;  %v3294_v36 = vor.u32 %v3292_v29, %v3291_v48  ;;  %v3296_v33 = vrot.slane %v3291_v48, 4  ;;  %v4977_v57 = vshll.u32 %v8621_v22, 16 }
 0x223   : > { %3517 = vst [vmem:[#allocation3 + $0x78] sm:$0xf] %v3516_v28  ;;  %v3509_v25 = vsel %vm8279_vm9, %v3269_v5, %v3508_v17  ;;  %v3277_v51 = vor.u32 %v3275_v46, %v3274_v45  ;;  %v3279_v58 = vrot.slane %v3274_v45, 4  ;;  %v4984_v2 = vshll.u32 %v8589_v9, 16 }
 0x224   : > { %3510 = vst [vmem:[#allocation3 + $0x6c] sm:$0xf] %v3509_v25  ;;  %v3295_v24 = vsel %vm6906_vm8, %v3287_v59, %v3294_v36  ;;  %v3520_v0 = vsel %vm8286_vm13, %v3296_v33, %v3519_v37  ;;  %5239 = vrot.lane.b32.xlu0 %v5198_v19, %s6729_s17  ;;  %v4689_v22 = vsel %vm1349_vm5, %v4687_v12, %v4688_v34  ;;  %v4979_v23 = vrot.slane %v4977_v57, 1 }
 0x225   : > { %3518 = vst.msk [vmem:[#allocation3 + $0x7c] sm:$0xf] %vm2975_vm0, %v3295_v24  ;;  %3521 = vst [vmem:[#allocation3 + $0x80] sm:$0x1] %v3520_v0  ;;  %v3278_v60 = vsel %vm6906_vm8, %v3270_v10, %v3277_v51  ;;  %v3513_v47 = vsel %vm8286_vm13, %v3279_v58, %v3512_v63  ;;  %v8668_v54 = vpop.permute.xlu1 %4719  ;;  %4093 = vrot.lane.b32.xlu1 %v3992_v42, %s6719_s24  ;;  %v4975_v19 = vor.u32 %v4974_v55, %v4970_v14 }
 0x226   : > { %v8670_v8 = vpop.permute.xlu0 %4317  ;;  %3511 = vst.msk [vmem:[#allocation3 + $0x70] sm:$0xf] %vm2975_vm0, %v3278_v60  ;;  %3514 = vst [vmem:[#allocation3 + $0x74] sm:$0x1] %v3513_v47  ;;  %v4989_v21 = vshll.u32 %v8586_v7, 16  ;;  %v4982_v62 = vshrl.u32 %v8589_v9, 16  ;;  %v5262_v5 = vsel %vm2487_vm12, %v8160_v26, %v8608_v3 }
 0x227   : > { %v4986_v20 = vrot.slane %v4984_v2, 1  ;;  %v3972_v40 = vshll.u32 %v8610_v11, 16  ;;  %v3977_v49 = vshll.u32 %v8592_v13, 16  ;;  %v4980_v29 = vsel %vm1076_vm6, %v4975_v19, %v4979_v23 }
 0x228   : > { %4729 = vrot.lane.b32.xlu0 %v4689_v22, %s6728_s16  ;;  %v3970_v15 = vshrl.u32 %v8610_v11, 16  ;;  %v4472_v31 = vshll.u32 %v8599_v4, 16  ;;  %v4991_v14 = vrot.slane %v4989_v21, 1  ;;  %v4477_v17 = vshll.u32 %v8641_v43, 16 }
 0x229   : > { %v4987_v16 = vor.u32 %v4986_v20, %v4982_v62  ;;  %v8686_v38 = vpop.permute.xlu1 %4207  ;;  %v3974_v9 = vrot.slane %v3972_v40, 1  ;;  %5111 = vrot.lane.b32.xlu1 %v4980_v29, %s6730_s20  ;;  %v4470_v13 = vshrl.u32 %v8599_v4, 16  ;;  %v3979_v59 = vrot.slane %v3977_v49, 1 }
 0x22a   : > { %v8688_v7 = vpop.permute.xlu0 %5229  ;;  %v4474_v48 = vrot.slane %v4472_v31, 1  ;;  %v3646_v45 = vld [vmem:[#allocation3 + $0x78] sm:$0xf]  ;;  %v4479_v28 = vrot.slane %v4477_v17, 1  ;;  %v5294_v3 = vsel %vm2553_vm14, %v5262_v5, %v8635_v18 }
 0x22b   : > { %v4992_v46 = vsel %vm1076_vm6, %v4987_v16, %v4991_v14  ;;  %v3975_v12 = vor.u32 %v3974_v9, %v3970_v15  ;;  %v3709_v4 = vld [vmem:[#allocation3 + $0x78] sm:$0xf]  ;;  %v3707_v18 = vld [vmem:[#allocation3 + $0x6c] sm:$0xf]  ;;  %v8727_v15 = vsel %vm2619_vm1, %v5294_v3, %v8670_v8 }
 0x22c   : > { %5113 = vrot.lane.b32.xlu0 %v4992_v46, %s6730_s20  ;;  %v4475_v37 = vor.u32 %v4474_v48, %v4470_v13  ;;  %v3647_v34 = vld [vmem:[#allocation3 + $0x7c] sm:$0xf]  ;;  %v3685_v63 = vld [vmem:[#allocation3 + $0x78] sm:$0xe]  ;;  %v3644_v19 = vld [vmem:[#allocation3 + $0x6c] sm:$0xf] }
 0x22d   : > { %v3980_v43 = vsel %vm1076_vm6, %v3975_v12, %v3979_v59  ;;  %v8699_v36 = vpop.permute.xlu1 %4591  ;;  %v3710_v33 = vld [vmem:[#allocation3 + $0x7c] sm:$0xf]  ;;  %v6143_v10 = vcombine.low %v3646_v45, %v3647_v34  ;;  %v8704_v25 = vld [vmem:[#allocation3 + $0x80] ss:$0 sps:$4 sm:$0x11]   ;;  %v6175_v26 = vcombine.low %v3685_v63, %v3647_v34 }
 0x22e   : > { %4091 = vrot.lane.b32.xlu1 %v3980_v43, %s6719_s24  ;;  %v8702_v39 = vpop.permute.xlu0 %4209  ;;  %v4480_v51 = vsel %vm1076_vm6, %v4475_v37, %v4479_v28  ;;  %v8709_v58 = vld [vmem:[#allocation3 + $0x70] sm:$0xf]  ;;  %v3749_v0 = vld [vmem:[#allocation3 + $0x78] sm:$0xe]  ;;  %v8716_v57 = vcombine.low %v3709_v4, %v3710_v33  ;;  %v4697_v47 = vrot.slane %v8704_v25, 1  ;;  %v4513_v28 = vshll.u32 %v8704_v25, 16 }
 0x22f   : > { %v8711_v24 = vld [vmem:[#allocation3 + $0x70] sm:$0xf]  ;;  %v8713_v55 = vld [vmem:[#allocation3 + $0x80] ss:$0 sps:$4 sm:$0x11]   ;;  %v4696_v60 = vrot.slane %v6175_v26, 1  ;;  %v6222_v42 = vcombine.low %v3749_v0, %v3710_v33  ;;  %v8735_v13 = vcombine.low %v3707_v18, %v8709_v58 }
 0x230   : > { %4601 = vrot.lane.b32.xlu0 %v4480_v51, %s6724_s8  ;;  %v3583_v2 = vld [vmem:[#allocation3 + $0x70] sm:$0xf]  ;;  %v3621_v23 = vld [vmem:[#allocation3 + $0x6c] sm:$0xe]  ;;  %v5206_v20 = vrot.slane %v8713_v55, 1  ;;  %v4506_v29 = vshrl.u32 %v6143_v10, 16  ;;  %v8738_v48 = vcombine.low %v3644_v19, %v8711_v24 }
 0x231   : > { %v8719_v22 = vpop.permute.xlu1 %4081  ;;  %v8721_v21 = vld [vmem:[#allocation3 + $0x74] ss:$0 sps:$4 sm:$0x11]   ;;  %v5205_v62 = vrot.slane %v6222_v42, 1  ;;  %v6127_v40 = vcombine.low %v3621_v23, %v3583_v2  ;;  %v3582_v49 = vld [vmem:[#allocation3 + $0x6c] sm:$0xf]  ;;  %v4698_v46 = vsel %vm1349_vm5, %v4696_v60, %v4697_v47 }
 0x232   : > { %4335 = vrot.lane.b32.xlu1 %v6143_v10, %s6722_s27  ;;  %v4185_v31 = vrot.slane %v8721_v21, 1  ;;  %v3584_v16 = vld [vmem:[#allocation3 + $0x78] sm:$0xf]  ;;  %v3585_v14 = vld [vmem:[#allocation3 + $0x7c] sm:$0xf]  ;;  %v4508_v9 = vshll.u32 %v6143_v10, 16  ;;  %v8732_v17 = vpop.permute.xlu0 %4717  ;;  %v8743_v45 = vcombine.low %v3582_v49, %v3583_v2 }
 0x233   : > { %v4184_v8 = vrot.slane %v6127_v40, 1  ;;  %v3622_v12 = vld [vmem:[#allocation3 + $0x78] sm:$0xe]  ;;  %v8741_v59 = vld [vmem:[#allocation3 + $0x80] ss:$0 sps:$4 sm:$0x11]   ;;  %v5207_v63 = vsel %vm1349_vm5, %v5205_v62, %v5206_v20  ;;  %v8750_v10 = vcombine.low %v3584_v16, %v3585_v14 }
 0x234   : > { %4845 = vrot.lane.b32.xlu0 %v8716_v57, %s6727_s15  ;;  %v6128_v34 = vcombine.low %v3622_v12, %v3585_v14  ;;  %v4510_v43 = vrot.slane %v4508_v9, 1  ;;  %v4188_v26 = vrot.slane %v8741_v59, 1  ;;  %v8758_v47 = vld [vmem:[#allocation3 + $0x74] ss:$0 sps:$4 sm:$0x11]   ;;  %v4515_v23 = vrot.slane %v4513_v28, 1 }
 0x235   : > { %v4080_v5 = vpop.permute.xlu1 %4079  ;;  %v6356_v37 = vpop.f32.mrb[20].mxu0  ;;  %v4186_v19 = vsel %vm1349_vm5, %v4184_v8, %v4185_v31  ;;  %v5203_v9 = vrot.slane %v8758_v47, 1 }
 0x236   : > { %4843 = vrot.lane.b32.xlu1 %v8735_v13, %s6727_s15  ;;  %v2905_v4 = vadd.f32 %v8617_v44, %v6356_v37  ;;  %v2896_v33 = vpop.f32.mrb[21].mxu0  ;;  %v8755_v3 = vsel %vm2487_vm12, %v8326_v1, %v4080_v5  ;;  %v4187_v0 = vrot.slane %v6128_v34, 1  ;;  %v4511_v60 = vor.u32 %v4510_v43, %v4506_v29  ;;  %v3748_v1 = vld [vmem:[#allocation3 + $0x6c] sm:$0xe] }
 0x237   : > { %v2897_v51 = vadd.f32 %v8617_v44, %v2896_v33  ;;  %v6357_v25 = vpop.f32.mrb[22].mxu0  ;;  %v6221_v49 = vcombine.low %v3748_v1, %v8709_v58  ;;  %v4006_v37 = vshrl.u32 %v8750_v10, 16  ;;  %v4008_v58 = vshll.u32 %v8750_v10, 16 }
 0x238   : > { %4333 = vrot.lane.b32.xlu0 %v8738_v48, %s6722_s27  ;;  %v2965_v42 = vmax.f32 %v2905_v4, 0.0  ;;  %v2908_v2 = vadd.f32 %v8617_v44, %v6357_v25  ;;  %v2899_v18 = vpop.f32.mrb[23].mxu0  ;;  %v4189_v40 = vsel %vm1349_vm5, %v4187_v0, %v4188_v26  ;;  %v4516_v14 = vsel %vm1076_vm6, %v4511_v60, %v4515_v23 }
 0x239   : > { %v2963_v62 = vmax.f32 %v2897_v51, 0.0  ;;  %v2900_v20 = vadd.f32 %v8617_v44, %v2899_v18  ;;  %v5102_v31 = vpop.permute.xlu0 %5101  ;;  %v5202_v5 = vrot.slane %v6221_v49, 1  ;;  %v4010_v60 = vrot.slane %v4008_v58, 1  ;;  %v3522_v49 = vld [vmem:[#allocation3 + $0x84] sm:$0xf] }
 0x23a   : > { %v6278_v29 = vpack.c.bf16 %v2965_v42, %v2965_v42  ;;  %4735 = vrot.lane.b32.xlu1 %v4698_v46, %s6728_s16  ;;  %v2966_v16 = vmax.f32 %v2908_v2, 0.0  ;;  %v3529_v42 = vld [vmem:[#allocation3 + $0x90] sm:$0xf]  ;;  %v3526_v58 = vld [vmem:[#allocation3 + $0x8c] sm:$0x1] }
 0x23b   : > { %v6276_v8 = vpack.c.bf16 %v2963_v62, %v2963_v62  ;;  %v2964_v12 = vmax.f32 %v2900_v20, 0.0  ;;  %v5204_v26 = vsel %vm1349_vm5, %v5202_v5, %v5203_v9 }
 0x23c   : > { %v3315_v34 = vshrl.u32 %v6278_v29, 16  ;;  %v3318_v43 = vshll.u32 %v6278_v29, 16  ;;  %v6279_v28 = vpack.c.bf16 %v2966_v16, %v2966_v16  ;;  %5245 = vrot.lane.b32.xlu0 %v5207_v63, %s6729_s17  ;;  %v4013_v63 = vshll.u32 %v8741_v59, 16 }
 0x23d   : > { %v3298_v46 = vshrl.u32 %v6276_v8, 16  ;;  %v3301_v4 = vshll.u32 %v6276_v8, 16  ;;  %v6277_v33 = vpack.c.bf16 %v2964_v12, %v2964_v12  ;;  %v4590_v1 = vpop.permute.xlu0 %4589 }
 0x23e   : > { %v3317_v51 = vrot.slane %v3315_v34, 7  ;;  %v3323_v25 = vshrl.u32 %v6279_v28, 16  ;;  %v3326_v0 = vshll.u32 %v6279_v28, 16  ;;  %4223 = vrot.lane.b32.xlu1 %v4186_v19, %s6725_s9  ;;  %v5358_v16 = vsel %vm2685_vm3, %v8727_v15, %v4590_v1  ;;  %v3533_v19 = vld [vmem:[#allocation3 + $0x98] sm:$0x1] }
 0x23f   : > { %v3300_v2 = vrot.slane %v3298_v46, 7  ;;  %v3306_v18 = vshrl.u32 %v6277_v33, 16  ;;  %v3309_v23 = vshll.u32 %v6277_v33, 16  ;;  %v5391_v5 = vsel %vm5389_vm4, %v5358_v16, %v8732_v17 }
 0x240   : > { %v3320_v62 = vor.u32 %v3318_v43, %v3317_v51  ;;  %v3321_v20 = vrot.slane %v3317_v51, 4  ;;  %v3325_v29 = vrot.slane %v3323_v25, 7  ;;  %4225 = vrot.lane.b32.xlu0 %v4189_v40, %s6725_s9  ;;  %v5424_v15 = vsel %vm5422_vm15, %v5391_v5, %v8647_v61  ;;  %v8788_v40 = vld [vmem:[#allocation3 + $0x74] ss:$0 sps:$4 sm:$0x11]  }
 0x241   : > { %v3303_v9 = vor.u32 %v3301_v4, %v3300_v2  ;;  %v3304_v8 = vrot.slane %v3300_v2, 4  ;;  %v3308_v12 = vrot.slane %v3306_v18, 7  ;;  %v8781_v34 = vpop.permute.xlu1 %4323  ;;  %v5457_v33 = vsel %vm5455_vm10, %v5424_v15, %v5102_v31 }
 0x242   : > { %v3530_v59 = vsel %vm8279_vm9, %v3320_v62, %v3529_v42  ;;  %v3328_v43 = vor.u32 %v3326_v0, %v3325_v29  ;;  %v3330_v28 = vrot.slane %v3325_v29, 4  ;;  %4607 = vrot.lane.b32.xlu1 %v4516_v14, %s6724_s8  ;;  %v8793_v51 = vpop.permute.xlu0 %4833  ;;  %v5490_v61 = vsel %vm5488_vm7, %v5457_v33, %v8688_v7  ;;  %v3684_v42 = vld [vmem:[#allocation3 + $0x6c] sm:$0xe] }
 0x243   : > { %3531 = vst [vmem:[#allocation3 + $0x90] sm:$0xf] %v3530_v59  ;;  %v3523_v46 = vsel %vm8279_vm9, %v3303_v9, %v3522_v49  ;;  %v3311_v17 = vor.u32 %v3309_v23, %v3308_v12  ;;  %v3313_v4 = vrot.slane %v3308_v12, 4  ;;  %v4011_v0 = vor.u32 %v4010_v60, %v4006_v37  ;;  %6376 = vmatprep.mubr.msk.bf16.mxu1 %vm5564_vm11, %v5490_v61 }
 0x244   : > { %3524 = vst [vmem:[#allocation3 + $0x84] sm:$0xf] %v3523_v46  ;;  %v3329_v25 = vsel %vm6906_vm8, %v3321_v20, %v3328_v43  ;;  %v3534_v14 = vsel %vm8286_vm13, %v3330_v28, %v3533_v19  ;;  %5243 = vrot.lane.b32.xlu0 %v5204_v26, %s6729_s17  ;;  %v4015_v18 = vrot.slane %v4013_v63, 1  ;;  %v6174_v23 = vcombine.low %v3684_v42, %v8711_v24 }
 0x245   : > { %3532 = vst.msk [vmem:[#allocation3 + $0x94] sm:$0xf] %vm2975_vm0, %v3329_v25  ;;  %3535 = vst [vmem:[#allocation3 + $0x98] sm:$0x1] %v3534_v14  ;;  %v3312_v31 = vsel %vm6906_vm8, %v3304_v8, %v3311_v17  ;;  %v3527_v2 = vsel %vm8286_vm13, %v3313_v4, %v3526_v58  ;;  %v8809_v26 = vpop.permute.xlu1 %4831  ;;  %v5296_v7 = vsel %vm2553_vm14, %v8755_v3, %v8686_v38  ;;  %v4694_v37 = vrot.slane %v8788_v40, 1 }
 0x246   : > { %3525 = vst.msk [vmem:[#allocation3 + $0x88] sm:$0xf] %vm2975_vm0, %v3312_v31  ;;  %3528 = vst [vmem:[#allocation3 + $0x8c] sm:$0x1] %v3527_v2  ;;  %v4996_v60 = vshll.u32 %v8735_v13, 16  ;;  %v5001_v1 = vshll.u32 %v8758_v47, 16  ;;  %v4016_v62 = vsel %vm1076_vm6, %v4011_v0, %v4015_v18  ;;  %v4322_v20 = vpop.permute.xlu0 %4321  ;;  %v5328_v38 = vsel %vm2619_vm1, %v5296_v7, %v8645_v50 }
 0x247   : > { %v4693_v63 = vrot.slane %v6174_v23, 1  ;;  %4097 = vrot.lane.b32.xlu1 %v4016_v62, %s6719_s24  ;;  %v4994_v24 = vshrl.u32 %v8735_v13, 16  ;;  %v5008_v29 = vshll.u32 %v8716_v57, 16  ;;  %v5013_v16 = vshll.u32 %v8713_v55, 16 }
 0x248   : > { %v4998_v49 = vrot.slane %v4996_v60, 1  ;;  %v5003_v8 = vrot.slane %v5001_v1, 1  ;;  %v3996_v19 = vshll.u32 %v8743_v45, 16  ;;  %v4001_v13 = vshll.u32 %v8721_v21, 16 }
 0x249   : > { %v4695_v3 = vsel %vm1349_vm5, %v4693_v63, %v4694_v37  ;;  %v8826_v9 = vpop.permute.xlu1 %4723  ;;  %v5006_v12 = vshrl.u32 %v8716_v57, 16  ;;  %v5010_v5 = vrot.slane %v5008_v29, 1  ;;  %v4496_v59 = vshll.u32 %v8738_v48, 16 }
 0x24a   : > { %4733 = vrot.lane.b32.xlu0 %v4695_v3, %s6728_s16  ;;  %v4999_v47 = vor.u32 %v4998_v49, %v4994_v24  ;;  %v8832_v50 = vpop.permute.xlu0 %5233  ;;  %v4501_v43 = vshll.u32 %v8788_v40, 16  ;;  %v5266_v55 = vsel %vm2487_vm12, %v8321_v41, %v8719_v22  ;;  %v3994_v58 = vshrl.u32 %v8743_v45, 16  ;;  %v3650_v22 = vld [vmem:[#allocation3 + $0x90] sm:$0xf] }
 0x24b   : > { %v3998_v15 = vrot.slane %v3996_v19, 1  ;;  %v5011_v21 = vor.u32 %v5010_v5, %v5006_v12  ;;  %v5015_v57 = vrot.slane %v5013_v16, 1  ;;  %v4494_v46 = vshrl.u32 %v8738_v48, 16  ;;  %v3687_v18 = vld [vmem:[#allocation3 + $0x90] sm:$0xe] }
 0x24c   : > { %v5004_v28 = vsel %vm1076_vm6, %v4999_v47, %v5003_v8  ;;  %v4498_v17 = vrot.slane %v4496_v59, 1  ;;  %v3651_v33 = vld [vmem:[#allocation3 + $0x94] sm:$0xf]  ;;  %v5360_v40 = vsel %vm2685_vm3, %v5328_v38, %v8699_v36  ;;  %v4003_v41 = vrot.slane %v4001_v13, 1  ;;  %v3750_v60 = vld [vmem:[#allocation3 + $0x84] sm:$0xe] }
 0x24d   : > { %5115 = vrot.lane.b32.xlu1 %v5004_v28, %s6730_s20  ;;  %v8843_v4 = vpop.permute.xlu1 %4211  ;;  %v3999_v25 = vor.u32 %v3998_v15, %v3994_v58  ;;  %v3712_v14 = vld [vmem:[#allocation3 + $0x88] sm:$0xf]  ;;  %v5016_v61 = vsel %vm1076_vm6, %v5011_v21, %v5015_v57  ;;  %v4503_v42 = vrot.slane %v4501_v43, 1  ;;  %v8850_v2 = vld [vmem:[#allocation3 + $0x94] sm:$0xf]  ;;  %v5298_v7 = vsel %vm2553_vm14, %v5266_v55, %v8702_v39 }
 0x24e   : > { %v4499_v0 = vor.u32 %v4498_v17, %v4494_v46  ;;  %v8848_v31 = vpop.permute.xlu0 %4213  ;;  %v3649_v48 = vld [vmem:[#allocation3 + $0x88] sm:$0xf]  ;;  %v8852_v23 = vld [vmem:[#allocation3 + $0x98] ss:$0 sps:$4 sm:$0x11]   ;;  %5117 = vrot.lane.b32.xlu0 %v5016_v61, %s6730_s20  ;;  %v6177_v37 = vcombine.low %v3687_v18, %v3651_v33  ;;  %v5393_v62 = vsel %vm5389_vm4, %v5360_v40, %v8668_v54  ;;  %v6145_v63 = vcombine.low %v3650_v22, %v3651_v33 }
 0x24f   : > { %v4004_v36 = vsel %vm1076_vm6, %v3999_v25, %v4003_v41  ;;  %v3587_v1 = vld [vmem:[#allocation3 + $0x88] sm:$0xf]  ;;  %v3713_v24 = vld [vmem:[#allocation3 + $0x90] sm:$0xf]  ;;  %v3711_v38 = vld [vmem:[#allocation3 + $0x84] sm:$0xf]  ;;  %v6223_v29 = vcombine.low %v3750_v60, %v3712_v14  ;;  %v5426_v16 = vsel %vm5422_vm15, %v5393_v62, %v8809_v26  ;;  %v8869_v47 = vsel %vm2619_vm1, %v5298_v7, %v4322_v20 }
 0x250   : > { %v4703_v3 = vrot.slane %v8852_v23, 1  ;;  %v8864_v39 = vld [vmem:[#allocation3 + $0x8c] ss:$0 sps:$4 sm:$0x11]   ;;  %v4702_v8 = vrot.slane %v6177_v37, 1  ;;  %v4504_v13 = vsel %vm1076_vm6, %v4499_v0, %v4503_v42  ;;  %v8877_v28 = vcombine.low %v3713_v24, %v8850_v2 }
 0x251   : > { %4095 = vrot.lane.b32.xlu1 %v4004_v36, %s6719_s24  ;;  %v8861_v49 = vpop.permute.xlu1 %4595  ;;  %v3623_v54 = vld [vmem:[#allocation3 + $0x84] sm:$0xe]  ;;  %v8871_v19 = vld [vmem:[#allocation3 + $0x8c] ss:$0 sps:$4 sm:$0x11]   ;;  %v5208_v59 = vrot.slane %v6223_v29, 1  ;;  %v8879_v26 = vcombine.low %v3711_v38, %v3712_v14 }
 0x252   : > { %v5232_v12 = vpop.permute.xlu0 %5231  ;;  %v3648_v5 = vld [vmem:[#allocation3 + $0x84] sm:$0xf]  ;;  %v5209_v43 = vrot.slane %v8864_v39, 1  ;;  %v6129_v55 = vcombine.low %v3623_v54, %v3587_v1  ;;  %4605 = vrot.lane.b32.xlu0 %v4504_v13, %s6724_s8  ;;  %v4191_v58 = vrot.slane %v8871_v19, 1  ;;  %v4530_v40 = vshrl.u32 %v6145_v63, 16 }
 0x253   : > { %v8881_v20 = vcombine.low %v3648_v5, %v3649_v48  ;;  %v3686_v15 = vld [vmem:[#allocation3 + $0x84] sm:$0xe]  ;;  %v8884_v21 = vld [vmem:[#allocation3 + $0x8c] ss:$0 sps:$4 sm:$0x11]   ;;  %v4532_v25 = vshll.u32 %v6145_v63, 16  ;;  %v4704_v14 = vsel %vm1349_vm5, %v4702_v8, %v4703_v3 }
 0x254   : > { %v4190_v17 = vrot.slane %v6129_v55, 1  ;;  %v6176_v33 = vcombine.low %v3686_v15, %v3649_v48  ;;  %v3586_v61 = vld [vmem:[#allocation3 + $0x84] sm:$0xf]  ;;  %v4700_v0 = vrot.slane %v8884_v21, 1  ;;  %v4537_v42 = vshll.u32 %v8852_v23, 16 }
 0x255   : > { %4339 = vrot.lane.b32.xlu1 %v6145_v63, %s6722_s27  ;;  %v8887_v57 = vpop.permute.xlu1 %4085  ;;  %v6360_v46 = vpop.f32.mrb[24].mxu0  ;;  %v8894_v36 = vcombine.low %v3586_v61, %v3587_v1  ;;  %v4534_v60 = vrot.slane %v4532_v25, 1  ;;  %v5210_v24 = vsel %vm1349_vm5, %v5208_v59, %v5209_v43  ;;  %v4518_v55 = vshrl.u32 %v8881_v20, 16 }
 0x256   : > { %v2921_v41 = vadd.f32 %v8617_v44, %v6360_v46  ;;  %v2912_v22 = vpop.f32.mrb[25].mxu0  ;;  %v4699_v37 = vrot.slane %v6176_v33, 1  ;;  %4849 = vrot.lane.b32.xlu0 %v8877_v28, %s6727_s15  ;;  %v8898_v62 = vpop.permute.xlu0 %4721  ;;  %v4192_v23 = vsel %vm1349_vm5, %v4190_v17, %v4191_v58  ;;  %v4539_v8 = vrot.slane %v4537_v42, 1 }
 0x257   : > { %v2913_v18 = vadd.f32 %v8617_v44, %v2912_v22  ;;  %v6361_v7 = vpop.f32.mrb[26].mxu0  ;;  %v4535_v29 = vor.u32 %v4534_v60, %v4530_v40  ;;  %v4520_v43 = vshll.u32 %v8881_v20, 16  ;;  %v4525_v58 = vshll.u32 %v8884_v21, 16 }
 0x258   : > { %v2969_v48 = vmax.f32 %v2921_v41, 0.0  ;;  %v2924_v63 = vadd.f32 %v8617_v44, %v6361_v7  ;;  %v2915_v38 = vpop.f32.mrb[27].mxu0  ;;  %v4701_v5 = vsel %vm1349_vm5, %v4699_v37, %v4700_v0 }
 0x259   : > { %4847 = vrot.lane.b32.xlu1 %v8879_v26, %s6727_s15  ;;  %v2967_v1 = vmax.f32 %v2913_v18, 0.0  ;;  %v2916_v3 = vadd.f32 %v8617_v44, %v2915_v38  ;;  %v4540_v40 = vsel %vm1076_vm6, %v4535_v29, %v4539_v8 }
 0x25a   : > { %v6282_v54 = vpack.c.bf16 %v2969_v48, %v2969_v48  ;;  %v2970_v13 = vmax.f32 %v2924_v63, 0.0  ;;  %4337 = vrot.lane.b32.xlu0 %v8881_v20, %s6722_s27  ;;  %v3543_v20 = vld [vmem:[#allocation3 + $0xa8] sm:$0xf]  ;;  %v4522_v63 = vrot.slane %v4520_v43, 1 }
 0x25b   : > { %v6280_v15 = vpack.c.bf16 %v2967_v1, %v2967_v1  ;;  %v2968_v46 = vmax.f32 %v2916_v3, 0.0  ;;  %v5104_v59 = vpop.permute.xlu1 %5103  ;;  %v3536_v1 = vld [vmem:[#allocation3 + $0x9c] sm:$0xf] }
 0x25c   : > { %v3349_v17 = vshrl.u32 %v6282_v54, 16  ;;  %v6283_v44 = vpack.c.bf16 %v2970_v13, %v2970_v13  ;;  %v5459_v33 = vsel %vm5455_vm10, %v5426_v16, %v5104_v59  ;;  %v3352_v25 = vshll.u32 %v6282_v54, 16  ;;  %v3547_v13 = vld [vmem:[#allocation3 + $0xb0] sm:$0x1] }
 0x25d   : > { %v3332_v41 = vshrl.u32 %v6280_v15, 16  ;;  %4739 = vrot.lane.b32.xlu1 %v4704_v14, %s6728_s16  ;;  %v6281_v22 = vpack.c.bf16 %v2968_v46, %v2968_v46  ;;  %v5492_v61 = vsel %vm5488_vm7, %v5459_v33, %v5232_v12  ;;  %v3335_v42 = vshll.u32 %v6280_v15, 16 }
 0x25e   : > { %v3351_v0 = vrot.slane %v3349_v17, 7  ;;  %v3357_v18 = vshrl.u32 %v6283_v44, 16  ;;  %v3360_v21 = vshll.u32 %v6283_v44, 16  ;;  %v5106_v7 = vpop.permute.xlu0 %5105  ;;  %6377 = vmatmul.mubr.msk.bf16.vlgmr.msra.gmra.mrb[0].mxu1 %vm5564_vm11, %v5492_v61  ;;  %5247 = vrot.lane.b32.xlu0 %v5210_v24, %s6729_s17  ;;  %v4527_v14 = vrot.slane %v4525_v58, 1  ;;  %v3540_v17 = vld [vmem:[#allocation3 + $0xa4] sm:$0x1] }
 0x25f   : > { %v3334_v37 = vrot.slane %v3332_v41, 7  ;;  %v3340_v60 = vshrl.u32 %v6281_v22, 16  ;;  %v3343_v16 = vshll.u32 %v6281_v22, 16  ;;  %v4084_v48 = vpop.permute.xlu1 %4083  ;;  %v8931_v41 = vld [vmem:[#allocation3 + $0x98] ss:$0 sps:$4 sm:$0x11]  }
 0x260   : > { %v3354_v38 = vor.u32 %v3352_v25, %v3351_v0  ;;  %v3359_v3 = vrot.slane %v3357_v18, 7  ;;  %v5268_v12 = vsel %vm2487_vm12, %v8409_v52, %v4084_v48  ;;  %v3355_v29 = vrot.slane %v3351_v0, 4 }
 0x261   : > { %v3337_v8 = vor.u32 %v3335_v42, %v3334_v37  ;;  %v3338_v54 = vrot.slane %v3334_v37, 4  ;;  %v3342_v15 = vrot.slane %v3340_v60, 7  ;;  %4227 = vrot.lane.b32.xlu1 %v4192_v23, %s6725_s9  ;;  %v5300_v24 = vsel %vm2553_vm14, %v5268_v12, %v8843_v4  ;;  %v8967_v12 = vld [vmem:[#allocation3 + $0x98] ss:$0 sps:$4 sm:$0x11]  }
 0x262   : > { %v3544_v46 = vsel %vm8279_vm9, %v3354_v38, %v3543_v20  ;;  %v3362_v59 = vor.u32 %v3360_v21, %v3359_v3  ;;  %v3364_v43 = vrot.slane %v3359_v3, 4  ;;  %v4594_v44 = vpop.permute.xlu0 %4593  ;;  %4737 = vrot.lane.b32.xlu0 %v4701_v5, %s6728_s16  ;;  %v4523_v0 = vor.u32 %v4522_v63, %v4518_v55  ;;  %v3589_v3 = vld [vmem:[#allocation3 + $0x94] sm:$0xf] }
 0x263   : > { %3545 = vst [vmem:[#allocation3 + $0xa8] sm:$0xf] %v3544_v46  ;;  %v3537_v52 = vsel %vm8279_vm9, %v3337_v8, %v3536_v1  ;;  %v3345_v58 = vor.u32 %v3343_v16, %v3342_v15  ;;  %v3347_v33 = vrot.slane %v3342_v15, 4  ;;  %v5362_v25 = vsel %vm2685_vm3, %v8869_v47, %v4594_v44  ;;  %v8929_v23 = vpop.permute.xlu1 %4327 }
 0x264   : > { %3538 = vst [vmem:[#allocation3 + $0x9c] sm:$0xf] %v3537_v52  ;;  %v3363_v22 = vsel %vm6906_vm8, %v3355_v29, %v3362_v59  ;;  %v3548_v4 = vsel %vm8286_vm13, %v3364_v43, %v3547_v13  ;;  %v5395_v61 = vsel %vm5389_vm4, %v5362_v25, %v8898_v62  ;;  %v5020_v5 = vshll.u32 %v8879_v26, 16  ;;  %v3588_v59 = vld [vmem:[#allocation3 + $0x90] sm:$0xf] }
 0x265   : > { %3546 = vst.msk [vmem:[#allocation3 + $0xac] sm:$0xf] %vm2975_vm0, %v3363_v22  ;;  %3549 = vst [vmem:[#allocation3 + $0xb0] sm:$0x1] %v3548_v4  ;;  %v3346_v47 = vsel %vm6906_vm8, %v3338_v54, %v3345_v58  ;;  %v3541_v42 = vsel %vm8286_vm13, %v3347_v33, %v3540_v17  ;;  %v5428_v18 = vsel %vm5422_vm15, %v5395_v61, %v8793_v51  ;;  %4611 = vrot.lane.b32.xlu1 %v4540_v40, %s6724_s8  ;;  %v3751_v54 = vld [vmem:[#allocation3 + $0x90] sm:$0xe] }
 0x266   : > { %3539 = vst.msk [vmem:[#allocation3 + $0xa0] sm:$0xf] %vm2975_vm0, %v3346_v47  ;;  %3542 = vst [vmem:[#allocation3 + $0xa4] sm:$0x1] %v3541_v42  ;;  %v5332_v62 = vsel %vm2619_vm1, %v5300_v24, %v8781_v34  ;;  %v8952_v55 = vpop.permute.xlu0 %4837  ;;  %v5018_v21 = vshrl.u32 %v8879_v26, 16  ;;  %v5025_v20 = vshll.u32 %v8864_v39, 16  ;;  %v4528_v51 = vsel %vm1076_vm6, %v4523_v0, %v4527_v14 }
 0x267   : > { %v5032_v37 = vshll.u32 %v8877_v28, 16  ;;  %v5022_v60 = vrot.slane %v5020_v5, 1  ;;  %v5037_v40 = vshll.u32 %v8931_v41, 16  ;;  %v5461_v16 = vsel %vm5455_vm10, %v5428_v18, %v5106_v7  ;;  %v4836_v48 = vpop.permute.xlu1 %4835  ;;  %4609 = vrot.lane.b32.xlu0 %v4528_v51, %s6724_s8  ;;  %v3624_v43 = vld [vmem:[#allocation3 + $0x90] sm:$0xe] }
 0x268   : > { %v5030_v34 = vshrl.u32 %v8877_v28, 16  ;;  %v5494_v26 = vsel %vm5488_vm7, %v5461_v16, %v8832_v50  ;;  %v5027_v39 = vrot.slane %v5025_v20, 1  ;;  %v5364_v1 = vsel %vm2685_vm3, %v5332_v62, %v8861_v49 }
 0x269   : > { %v5034_v63 = vrot.slane %v5032_v37, 1  ;;  %v5023_v38 = vor.u32 %v5022_v60, %v5018_v21  ;;  %6380 = vmatprep.mubr.msk.bf16.mxu1 %vm5564_vm11, %v5494_v26  ;;  %v5039_v14 = vrot.slane %v5037_v40, 1  ;;  %v4020_v28 = vshll.u32 %v8894_v36, 16 }
 0x26a   : > { %v8969_v29 = vpop.permute.xlu0 %4325  ;;  %v4025_v8 = vshll.u32 %v8871_v19, 16  ;;  %v5270_v50 = vsel %vm2487_vm12, %v8403_v32, %v8887_v57  ;;  %v4018_v49 = vshrl.u32 %v8894_v36, 16  ;;  %v6224_v15 = vcombine.low %v3751_v54, %v8850_v2 }
 0x26b   : > { %v5035_v7 = vor.u32 %v5034_v63, %v5030_v34  ;;  %v5028_v13 = vsel %vm1076_vm6, %v5023_v38, %v5027_v39  ;;  %v8979_v46 = vpop.permute.xlu1 %4727  ;;  %v4022_v19 = vrot.slane %v4020_v28, 1  ;;  %v5212_v24 = vrot.slane %v8931_v41, 1  ;;  %v3715_v32 = vld [vmem:[#allocation3 + $0x9c] sm:$0xf] }
 0x26c   : > { %5119 = vrot.lane.b32.xlu1 %v5028_v13, %s6730_s20  ;;  %v8984_v44 = vcombine.low %v3588_v59, %v3589_v3  ;;  %v3752_v57 = vld [vmem:[#allocation3 + $0x9c] sm:$0xe]  ;;  %v5397_v2 = vsel %vm5389_vm4, %v5364_v1, %v8826_v9  ;;  %v5211_v52 = vrot.slane %v6224_v15, 1  ;;  %v4037_v58 = vshll.u32 %v8967_v12, 16 }
 0x26d   : > { %v5040_v17 = vsel %vm1076_vm6, %v5035_v7, %v5039_v14  ;;  %v3716_v33 = vld [vmem:[#allocation3 + $0xa0] sm:$0xf]  ;;  %v6130_v25 = vcombine.low %v3624_v43, %v3589_v3  ;;  %v4023_v22 = vor.u32 %v4022_v19, %v4018_v49  ;;  %v4027_v4 = vrot.slane %v4025_v8, 1  ;;  %v6673_v47 = vld [vmem:[#allocation3 + $0xa4] ss:$0 sps:$4 sm:$0x11]  }
 0x26e   : > { %5121 = vrot.lane.b32.xlu0 %v5040_v17, %s6730_s20  ;;  %v8990_v61 = vpop.permute.xlu0 %5237  ;;  %v4032_v41 = vshll.u32 %v8984_v44, 16  ;;  %v6193_v0 = vcombine.low %v3715_v32, %v3716_v33  ;;  %v8994_v42 = vsel %vm5422_vm15, %v5397_v2, %v4836_v48  ;;  %v8998_v18 = vsel %vm2553_vm14, %v5270_v50, %v8848_v31  ;;  %v3590_v21 = vld [vmem:[#allocation3 + $0x9c] sm:$0xf]  ;;  %v9003_v20 = vld [vmem:[#allocation3 + $0xa0] sm:$0xf] }
 0x26f   : > { %v4030_v9 = vshrl.u32 %v8984_v44, 16  ;;  %v9001_v5 = vpop.permute.xlu1 %4215  ;;  %v6225_v62 = vcombine.low %v3752_v57, %v3716_v33  ;;  %v4028_v37 = vsel %vm1076_vm6, %v4023_v22, %v4027_v4  ;;  %v5213_v51 = vsel %vm1349_vm5, %v5211_v52, %v5212_v24  ;;  %v9007_v16 = vld [vmem:[#allocation3 + $0xa4] ss:$0 sps:$4 sm:$0x11]   ;;  %v9011_v26 = vld [vmem:[#allocation3 + $0xa0] sm:$0xf] }
 0x270   : > { %v4034_v60 = vrot.slane %v4032_v41, 1  ;;  %v5215_v40 = vrot.slane %v6673_v47, 1  ;;  %4099 = vrot.lane.b32.xlu1 %v4028_v37, %s6719_s24  ;;  %v4039_v31 = vrot.slane %v4037_v58, 1  ;;  %v5044_v34 = vshll.u32 %v6193_v0, 16  ;;  %v6709_v8 = vld [vmem:[%s9454_s2] ss:$0 sm:$0xff] }
 0x271   : > { %v5214_v48 = vrot.slane %v6225_v62, 1  ;;  %v4193_v63 = vrot.slane %v6130_v25, 1  ;;  %v5042_v3 = vshrl.u32 %v6193_v0, 16  ;;  %v5049_v7 = vshll.u32 %v6673_v47, 16  ;;  %v3652_v59 = vld [vmem:[#allocation3 + $0x9c] sm:$0xf] }
 0x272   : > { %5249 = vrot.lane.b32.xlu0 %v5213_v51, %s6729_s17  ;;  %v4035_v38 = vor.u32 %v4034_v60, %v4030_v9  ;;  %v9013_v39 = vpop.permute.xlu0 %4217  ;;  %v6364_v1 = vpop.f32.mrb[28].mxu0  ;;  %v9016_v14 = vcombine.low %v3590_v21, %v9003_v20  ;;  %v5046_v49 = vrot.slane %v5044_v34, 1  ;;  %v4194_v15 = vrot.slane %v8967_v12, 1  ;;  %v3625_v57 = vld [vmem:[#allocation3 + $0x9c] sm:$0xe] }
 0x273   : > { %v9018_v28 = vpop.permute.xlu1 %4599  ;;  %v2937_v54 = vadd.f32 %v6709_v8, %v6364_v1  ;;  %v2928_v50 = vpop.f32.mrb[29].mxu0  ;;  %v5216_v13 = vsel %vm1349_vm5, %v5214_v48, %v5215_v40  ;;  %v4049_v24 = vshll.u32 %v9007_v16, 16  ;;  %v9028_v32 = vcombine.low %v3652_v59, %v9011_v26  ;;  %v9078_v27 = vld [vmem:[#allocation3 + $0xb0] ss:$0 sps:$4 sm:$0x11]  }
 0x274   : > { %v4040_v43 = vsel %vm1076_vm6, %v4035_v38, %v4039_v31  ;;  %v2929_v17 = vadd.f32 %v6709_v8, %v2928_v50  ;;  %v6365_v19 = vpop.f32.mrb[30].mxu0  ;;  %v5047_v33 = vor.u32 %v5046_v49, %v5042_v3  ;;  %v4044_v12 = vshll.u32 %v9016_v14, 16  ;;  %v3557_v49 = vld [vmem:[#allocation3 + $0xc0] sm:$0xf] }
 0x275   : > { %4101 = vrot.lane.b32.xlu1 %v4040_v43, %s6719_s24  ;;  %v2973_v2 = vmax.f32 %v2937_v54, 0.0  ;;  %v2940_v52 = vadd.f32 %v6709_v8, %v6365_v19  ;;  %v2931_v58 = vpop.f32.mrb[31].mxu0  ;;  %v5051_v41 = vrot.slane %v5049_v7, 1  ;;  %v6131_v47 = vcombine.low %v3625_v57, %v9003_v20 }
 0x276   : > { %5251 = vrot.lane.b32.xlu0 %v5216_v13, %s6729_s17  ;;  %v5236_v25 = vpop.permute.xlu0 %5235  ;;  %v2971_v22 = vmax.f32 %v2929_v17, 0.0  ;;  %v2932_v4 = vadd.f32 %v6709_v8, %v2931_v58  ;;  %v4042_v37 = vshrl.u32 %v9016_v14, 16  ;;  %v4046_v51 = vrot.slane %v4044_v12, 1  ;;  %v3550_v17 = vld [vmem:[#allocation3 + $0xb4] sm:$0xf] }
 0x277   : > { %v6286_v9 = vpack.c.bf16 %v2973_v2, %v2973_v2  ;;  %v2974_v62 = vmax.f32 %v2940_v52, 0.0  ;;  %v9034_v21 = vpop.permute.xlu1 %4089  ;;  %v4195_v31 = vsel %vm1349_vm5, %v4193_v63, %v4194_v15  ;;  %v4051_v48 = vrot.slane %v4049_v24, 1  ;;  %v9049_v12 = vld [vmem:[#allocation3 + $0xa4] ss:$0 sps:$4 sm:$0x11]  }
 0x278   : > { %v6284_v60 = vpack.c.bf16 %v2971_v22, %v2971_v22  ;;  %v2972_v40 = vmax.f32 %v2932_v4, 0.0  ;;  %v5052_v1 = vsel %vm1076_vm6, %v5047_v33, %v5051_v41  ;;  %v4047_v20 = vor.u32 %v4046_v51, %v4042_v37  ;;  %v3561_v4 = vld [vmem:[#allocation3 + $0xc8] sm:$0x1] }
 0x279   : > { %4851 = vrot.lane.b32.xlu1 %v6193_v0, %s6727_s15  ;;  %v3383_v34 = vshrl.u32 %v6286_v9, 16  ;;  %v6287_v38 = vpack.c.bf16 %v2974_v62, %v2974_v62  ;;  %v3386_v3 = vshll.u32 %v6286_v9, 16  ;;  %v4196_v50 = vrot.slane %v6131_v47, 1 }
 0x27a   : > { %4229 = vrot.lane.b32.xlu0 %v4195_v31, %s6725_s9  ;;  %v3366_v7 = vshrl.u32 %v6284_v60, 16  ;;  %v6285_v8 = vpack.c.bf16 %v2972_v40, %v2972_v40  ;;  %v4726_v54 = vpop.permute.xlu0 %4725  ;;  %v3369_v59 = vshll.u32 %v6284_v60, 16  ;;  %v4197_v15 = vrot.slane %v9007_v16, 1  ;;  %v3554_v60 = vld [vmem:[#allocation3 + $0xbc] sm:$0x1] }
 0x27b   : > { %v3385_v13 = vrot.slane %v3383_v34, 7  ;;  %v3391_v43 = vshrl.u32 %v6287_v38, 16  ;;  %v5108_v63 = vpop.permute.xlu1 %5107  ;;  %v3394_v19 = vshll.u32 %v6287_v38, 16  ;;  %v4052_v58 = vsel %vm1076_vm6, %v4047_v20, %v4051_v48  ;;  %v9057_v38 = vld [vmem:[#allocation3 + $0xac] sm:$0xf] }
 0x27c   : > { %v3368_v0 = vrot.slane %v3366_v7, 7  ;;  %v3374_v24 = vshrl.u32 %v6285_v8, 16  ;;  %v5463_v57 = vsel %vm5455_vm10, %v8994_v42, %v5108_v63  ;;  %v3377_v47 = vshll.u32 %v6285_v8, 16 }
 0x27d   : > { %v3388_v2 = vor.u32 %v3386_v3, %v3385_v13  ;;  %v3393_v52 = vrot.slane %v3391_v43, 7  ;;  %5123 = vrot.lane.b32.xlu1 %v5052_v1, %s6730_s20  ;;  %v5496_v33 = vsel %vm5488_vm7, %v5463_v57, %v5236_v25  ;;  %v3389_v16 = vrot.slane %v3385_v13, 4  ;;  %v9084_v57 = vld [vmem:[#allocation3 + $0xac] sm:$0xf] }
 0x27e   : > { %4341 = vrot.lane.b32.xlu0 %v9028_v32, %s6722_s27  ;;  %v3371_v22 = vor.u32 %v3369_v59, %v3368_v0  ;;  %v3376_v41 = vrot.slane %v3374_v24, 7  ;;  %v5110_v9 = vpop.permute.xlu0 %5109  ;;  %6381 = vmatmul.mubr.msk.bf16.gmra.mrb[4].mxu1 %vm5564_vm11, %v5496_v33  ;;  %v3372_v62 = vrot.slane %v3368_v0, 4  ;;  %v4544_v34 = vshll.u32 %v9028_v32, 16  ;;  %v3688_v0 = vld [vmem:[#allocation3 + $0x9c] sm:$0xe] }
 0x27f   : > { %v3558_v42 = vsel %vm8279_vm9, %v3388_v2, %v3557_v49  ;;  %v3396_v37 = vor.u32 %v3394_v19, %v3393_v52  ;;  %v3398_v51 = vrot.slane %v3393_v52, 4  ;;  %v4088_v48 = vpop.permute.xlu1 %4087  ;;  %v5334_v1 = vsel %vm2619_vm1, %v8998_v18, %v8969_v29  ;;  %v3654_v49 = vld [vmem:[#allocation3 + $0xa8] sm:$0xf] }
 0x280   : > { %3559 = vst [vmem:[#allocation3 + $0xc0] sm:$0xf] %v3558_v42  ;;  %v3551_v25 = vsel %vm8279_vm9, %v3371_v22, %v3550_v17  ;;  %v3379_v40 = vor.u32 %v3377_v47, %v3376_v41  ;;  %v3381_v31 = vrot.slane %v3376_v41, 4  ;;  %v4549_v53 = vshll.u32 %v9049_v12, 16  ;;  %v3717_v33 = vld [vmem:[#allocation3 + $0xa8] sm:$0xf] }
 0x281   : > { %3552 = vst [vmem:[#allocation3 + $0xb4] sm:$0xf] %v3551_v25  ;;  %v3397_v20 = vsel %vm6906_vm8, %v3389_v16, %v3396_v37  ;;  %v3562_v3 = vsel %vm8286_vm13, %v3398_v51, %v3561_v4  ;;  %4103 = vrot.lane.b32.xlu1 %v4052_v58, %s6719_s24  ;;  %v4542_v8 = vshrl.u32 %v9028_v32, 16  ;;  %v4546_v13 = vrot.slane %v4544_v34, 1  ;;  %v3689_v41 = vld [vmem:[#allocation3 + $0xa8] sm:$0xe] }
 0x282   : > { %3560 = vst.msk [vmem:[#allocation3 + $0xc4] sm:$0xf] %vm2975_vm0, %v3397_v20  ;;  %3563 = vst [vmem:[#allocation3 + $0xc8] sm:$0x1] %v3562_v3  ;;  %v3380_v7 = vsel %vm6906_vm8, %v3372_v62, %v3379_v40  ;;  %v3555_v29 = vsel %vm8286_vm13, %v3381_v31, %v3554_v60  ;;  %v4598_v18 = vpop.permute.xlu0 %4597  ;;  %v4198_v43 = vsel %vm1349_vm5, %v4196_v50, %v4197_v15  ;;  %v4551_v19 = vrot.slane %v4549_v53, 1 }
 0x283   : > { %3553 = vst.msk [vmem:[#allocation3 + $0xb8] sm:$0xf] %vm2975_vm0, %v3380_v7  ;;  %3556 = vst [vmem:[#allocation3 + $0xbc] sm:$0x1] %v3555_v29  ;;  %v5366_v59 = vsel %vm2685_vm3, %v5334_v1, %v4598_v18  ;;  %v6147_v63 = vcombine.low %v3654_v49, %v9057_v38  ;;  %v4547_v17 = vor.u32 %v4546_v13, %v4542_v8  ;;  %v9081_v24 = vpop.permute.xlu1 %4331  ;;  %v3753_v34 = vld [vmem:[#allocation3 + $0xa8] sm:$0xe] }
 0x284   : > { %v5399_v6 = vsel %vm5389_vm4, %v5366_v59, %v4726_v54  ;;  %v6178_v32 = vcombine.low %v3688_v0, %v9011_v26  ;;  %v4706_v54 = vrot.slane %v9049_v12, 1  ;;  %v6194_v22 = vcombine.low %v3717_v33, %v9084_v57  ;;  %v9102_v47 = vld [vmem:[#allocation3 + $0xb0] ss:$0 sps:$4 sm:$0x11]   ;;  %v3593_v7 = vld [vmem:[#allocation3 + $0xac] sm:$0xf] }
 0x285   : > { %v5432_v2 = vsel %vm5422_vm15, %v5399_v6, %v8952_v55  ;;  %4231 = vrot.lane.b32.xlu1 %v4198_v43, %s6725_s9  ;;  %v4552_v50 = vsel %vm1076_vm6, %v4547_v17, %v4551_v19  ;;  %v4556_v16 = vshll.u32 %v6147_v63, 16  ;;  %v4561_v55 = vshll.u32 %v9078_v27, 16 }
 0x286   : > { %v9090_v15 = vpop.permute.xlu0 %4841  ;;  %v4705_v52 = vrot.slane %v6178_v32, 1  ;;  %v5465_v58 = vsel %vm5455_vm10, %v5432_v2, %v5110_v9  ;;  %4613 = vrot.lane.b32.xlu0 %v4552_v50, %s6724_s8  ;;  %v4554_v12 = vshrl.u32 %v6147_v63, 16  ;;  %v6179_v42 = vcombine.low %v3689_v41, %v9057_v38 }
 0x287   : > { %v5498_v26 = vsel %vm5488_vm7, %v5465_v58, %v8990_v61  ;;  %v9100_v4 = vpop.permute.xlu1 %4839  ;;  %v4558_v9 = vrot.slane %v4556_v16, 1  ;;  %v5056_v37 = vshll.u32 %v6194_v22, 16  ;;  %v4563_v40 = vrot.slane %v4561_v55, 1  ;;  %v6691_v55 = vld [vmem:[#allocation3 + $0xb0] ss:$0 sps:$4 sm:$0x11]  }
 0x288   : > { %6384 = vmatprep.mubr.msk.bf16.mxu1 %vm5564_vm11, %v5498_v26  ;;  %v4707_v61 = vsel %vm1349_vm5, %v4705_v52, %v4706_v54  ;;  %v3719_v51 = vld [vmem:[#allocation3 + $0xb4] sm:$0xf]  ;;  %v5272_v1 = vsel %vm2487_vm12, %v8515_v56, %v4088_v48  ;;  %v5054_v3 = vshrl.u32 %v6194_v22, 16  ;;  %v5061_v53 = vshll.u32 %v9102_v47, 16  ;;  %v3592_v48 = vld [vmem:[#allocation3 + $0xa8] sm:$0xf] }
 0x289   : > { %4343 = vrot.lane.b32.xlu1 %v6147_v63, %s6722_s27  ;;  %v4559_v25 = vor.u32 %v4558_v9, %v4554_v12  ;;  %v5058_v38 = vrot.slane %v5056_v37, 1  ;;  %v4708_v18 = vrot.slane %v6179_v42, 1  ;;  %v4709_v8 = vrot.slane %v9078_v27, 1  ;;  %v3754_v2 = vld [vmem:[#allocation3 + $0xb4] sm:$0xe] }
 0x28a   : > { %v9107_v62 = vpop.permute.xlu0 %4329  ;;  %v3720_v60 = vld [vmem:[#allocation3 + $0xb8] sm:$0xf]  ;;  %4741 = vrot.lane.b32.xlu0 %v4707_v61, %s6728_s16  ;;  %v6688_v13 = vld [vmem:[#allocation3 + $0xbc] ss:$0 sps:$4 sm:$0x11]   ;;  %v6226_v56 = vcombine.low %v3753_v34, %v9084_v57  ;;  %v9122_v0 = vcombine.low %v3592_v48, %v3593_v7  ;;  %v5304_v27 = vsel %vm2553_vm14, %v5272_v1, %v9001_v5  ;;  %v5063_v17 = vrot.slane %v5061_v53, 1 }
 0x28b   : > { %v6195_v31 = vcombine.low %v3719_v51, %v3720_v60  ;;  %v9112_v20 = vpop.permute.xlu1 %4731  ;;  %v4564_v29 = vsel %vm1076_vm6, %v4559_v25, %v4563_v40  ;;  %v5059_v43 = vor.u32 %v5058_v38, %v5054_v3  ;;  %v9124_v6 = vld [vmem:[#allocation3 + $0xb8] sm:$0xf]  ;;  %v5218_v32 = vrot.slane %v9102_v47, 1  ;;  %v3594_v58 = vld [vmem:[#allocation3 + $0xb4] sm:$0xf] }
 0x28c   : > { %v4710_v50 = vsel %vm1349_vm5, %v4708_v18, %v4709_v8  ;;  %v5073_v52 = vshll.u32 %v6688_v13, 16  ;;  %v4056_v54 = vshll.u32 %v9122_v0, 16  ;;  %v5217_v5 = vrot.slane %v6226_v56, 1  ;;  %v9141_v47 = vld [vmem:[#allocation3 + $0xb8] sm:$0xf] }
 0x28d   : > { %v5068_v49 = vshll.u32 %v6195_v31, 16  ;;  %4615 = vrot.lane.b32.xlu1 %v4564_v29, %s6724_s8  ;;  %v5066_v57 = vshrl.u32 %v6195_v31, 16  ;;  %v5064_v33 = vsel %vm1076_vm6, %v5059_v43, %v5063_v17  ;;  %v6227_v16 = vcombine.low %v3754_v2, %v3720_v60  ;;  %v3626_v42 = vld [vmem:[#allocation3 + $0xa8] sm:$0xe]  ;;  %v3656_v25 = vld [vmem:[#allocation3 + $0xb4] sm:$0xf] }
 0x28e   : > { %v9118_v59 = vpop.permute.xlu0 %5241  ;;  %4853 = vrot.lane.b32.xlu0 %v6194_v22, %s6727_s15  ;;  %v9138_v22 = vcombine.low %v3594_v58, %v9124_v6  ;;  %v5336_v12 = vsel %vm2619_vm1, %v5304_v27, %v8929_v23  ;;  %v5221_v61 = vrot.slane %v6688_v13, 1  ;;  %v5075_v37 = vrot.slane %v5073_v52, 1  ;;  %v9154_v18 = vld [vmem:[#allocation3 + $0xbc] ss:$0 sps:$4 sm:$0x11]  }
 0x28f   : > { %v5070_v63 = vrot.slane %v5068_v49, 1  ;;  %v9128_v19 = vpop.permute.xlu1 %4219  ;;  %v4058_v51 = vrot.slane %v4056_v54, 1  ;;  %v5219_v40 = vsel %vm1349_vm5, %v5217_v5, %v5218_v32  ;;  %v5220_v1 = vrot.slane %v6227_v16, 1  ;;  %v9162_v27 = vld [vmem:[#allocation3 + $0xc4] sm:$0xf] }
 0x290   : > { %v4068_v60 = vshll.u32 %v9138_v22, 16  ;;  %v6132_v3 = vcombine.low %v3626_v42, %v3593_v7  ;;  %v6148_v38 = vcombine.low %v3656_v25, %v9141_v47  ;;  %v4054_v53 = vshrl.u32 %v9122_v0, 16  ;;  %v9174_v58 = vld [vmem:[#allocation3 + $0xbc] ss:$0 sps:$4 sm:$0x11]  }
 0x291   : > { %4743 = vrot.lane.b32.xlu1 %v4710_v50, %s6728_s16  ;;  %v5071_v41 = vor.u32 %v5070_v63, %v5066_v57  ;;  %v4061_v29 = vshll.u32 %v6691_v55, 16  ;;  %v5368_v8 = vsel %vm2685_vm3, %v5336_v12, %v9018_v28  ;;  %v5222_v7 = vsel %vm1349_vm5, %v5220_v1, %v5221_v61  ;;  %v3627_v50 = vld [vmem:[#allocation3 + $0xb4] sm:$0xe] }
 0x292   : > { %v9135_v26 = vpop.permute.xlu0 %4221  ;;  %5125 = vrot.lane.b32.xlu0 %v5064_v33, %s6730_s20  ;;  %v4059_v13 = vor.u32 %v4058_v51, %v4054_v53  ;;  %v4070_v49 = vrot.slane %v4068_v60, 1  ;;  %v4199_v56 = vrot.slane %v6132_v3, 1  ;;  %v4200_v48 = vrot.slane %v6691_v55, 1  ;;  %v3658_v33 = vld [vmem:[#allocation3 + $0xc0] sm:$0xf] }
 0x293   : > { %v9145_v9 = vpop.permute.xlu1 %4603  ;;  %v5076_v23 = vsel %vm1076_vm6, %v5071_v41, %v5075_v37  ;;  %v4568_v63 = vshll.u32 %v6148_v38, 16  ;;  %v5401_v17 = vsel %vm5389_vm4, %v5368_v8, %v8979_v46  ;;  %v4063_v28 = vrot.slane %v4061_v29, 1  ;;  %v3721_v60 = vld [vmem:[#allocation3 + $0xc0] sm:$0xf]  ;;  %v3690_v3 = vld [vmem:[#allocation3 + $0xb4] sm:$0xe] }
 0x294   : > { %v4066_v32 = vshrl.u32 %v9138_v22, 16  ;;  %v4073_v2 = vshll.u32 %v9154_v18, 16  ;;  %v5274_v57 = vsel %vm2487_vm12, %v8509_v35, %v9034_v21  ;;  %v5434_v52 = vsel %vm5422_vm15, %v5401_v17, %v9100_v4 }
 0x295   : > { %4855 = vrot.lane.b32.xlu1 %v6195_v31, %s6727_s15  ;;  %v6133_v46 = vcombine.low %v3627_v50, %v9124_v6  ;;  %v4064_v5 = vsel %vm1076_vm6, %v4059_v13, %v4063_v28  ;;  %v6149_v41 = vcombine.low %v3658_v33, %v9162_v27  ;;  %v4201_v12 = vsel %vm1349_vm5, %v4199_v56, %v4200_v48  ;;  %v9185_v6 = vld [vmem:[#allocation3 + $0xc4] sm:$0xf]  ;;  %v6702_v33 = vld [vmem:[#allocation3 + $0xc8] ss:$0 sps:$4 sm:$0x11]  }
 0x296   : > { %v5240_v34 = vpop.permute.xlu0 %5239  ;;  %5253 = vrot.lane.b32.xlu0 %v5219_v40, %s6729_s17  ;;  %v4071_v55 = vor.u32 %v4070_v49, %v4066_v32  ;;  %v4570_v4 = vrot.slane %v4568_v63, 1  ;;  %v4075_v42 = vrot.slane %v4073_v2, 1  ;;  %v5306_v61 = vsel %vm2553_vm14, %v5274_v57, %v9013_v39  ;;  %v3723_v63 = vld [vmem:[#allocation3 + $0xcc] sm:$0xf] }
 0x297   : > { %v9158_v31 = vpop.permute.xlu1 %4093  ;;  %v4566_v51 = vshrl.u32 %v6148_v38, 16  ;;  %v4573_v25 = vshll.u32 %v9174_v58, 16  ;;  %v4203_v1 = vrot.slane %v9154_v18, 1  ;;  %v5338_v53 = vsel %vm2619_vm1, %v5306_v61, %v9107_v62  ;;  %v9204_v62 = vld [vmem:[#allocation3 + $0xd0] sm:$0xf] }
 0x298   : > { %v4076_v40 = vsel %vm1076_vm6, %v4071_v55, %v4075_v42  ;;  %v6180_v8 = vcombine.low %v3690_v3, %v9141_v47  ;;  %v6196_v13 = vcombine.low %v3721_v60, %v9185_v6  ;;  %v4712_v28 = vrot.slane %v9174_v58, 1 }
 0x299   : > { %5127 = vrot.lane.b32.xlu1 %v5076_v23, %s6730_s20  ;;  %v4580_v23 = vshll.u32 %v6149_v41, 16  ;;  %v4571_v39 = vor.u32 %v4570_v4, %v4566_v51  ;;  %v4575_v56 = vrot.slane %v4573_v25, 1  ;;  %v6197_v58 = vcombine.low %v3723_v63, %v9204_v62  ;;  %v6706_v4 = vld [vmem:[#allocation3 + $0xd4] ss:$0 sps:$4 sm:$0x11]  }
 0x29a   : > { %v4730_v43 = vpop.permute.xlu0 %4729  ;;  %5255 = vrot.lane.b32.xlu0 %v5222_v7, %s6729_s17  ;;  %v6701_v7 = vld [vmem:[#allocation3 + $0xc8] ss:$0 sps:$4 sm:$0x11]   ;;  %v5080_v57 = vshll.u32 %v6196_v13, 16  ;;  %v5078_v51 = vshrl.u32 %v6196_v13, 16  ;;  %v5085_v25 = vshll.u32 %v6702_v33, 16 }
 0x29b   : > { %v5112_v54 = vpop.permute.xlu1 %5111  ;;  %v4582_v32 = vrot.slane %v4580_v23, 1  ;;  %v5092_v42 = vshll.u32 %v6197_v58, 16  ;;  %v5090_v23 = vshrl.u32 %v6197_v58, 16 }
 0x29c   : > { %v5467_v16 = vsel %vm5455_vm10, %v5434_v52, %v5112_v54  ;;  %v4578_v52 = vshrl.u32 %v6149_v41, 16  ;;  %v4585_v54 = vshll.u32 %v6701_v7, 16 }
 0x29d   : > { %4105 = vrot.lane.b32.xlu1 %v4064_v5, %s6719_s24  ;;  %v5500_v21 = vsel %vm5488_vm7, %v5467_v16, %v5240_v34  ;;  %v4202_v34 = vrot.slane %v6133_v46, 1  ;;  %v3691_v5 = vld [vmem:[#allocation3 + $0xc0] sm:$0xe] }
 0x29e   : > { %v5114_v35 = vpop.permute.xlu0 %5113  ;;  %4233 = vrot.lane.b32.xlu0 %v4201_v12, %s6725_s9  ;;  %6385 = vmatmul.mubr.msk.bf16.gmra.mrb[8].mxu1 %vm5564_vm11, %v5500_v21  ;;  %v4583_v16 = vor.u32 %v4582_v32, %v4578_v52  ;;  %v6181_v55 = vcombine.low %v3691_v5, %v9162_v27  ;;  %v5082_v21 = vrot.slane %v5080_v57, 1  ;;  %v3755_v27 = vld [vmem:[#allocation3 + $0xc0] sm:$0xe]  ;;  %v5227_v57 = vrot.slane %v6706_v4, 1 }
 0x29f   : > { %v4204_v47 = vsel %vm1349_vm5, %v4202_v34, %v4203_v1  ;;  %v4715_v34 = vrot.slane %v6701_v7, 1  ;;  %v6228_v3 = vcombine.low %v3755_v27, %v9185_v6 }
 0x2a0   : > { %v9189_v37 = vpop.permute.xlu1 %4091 }
 0x2a1   : > { %4107 = vrot.lane.b32.xlu1 %v4076_v40, %s6719_s24  ;;  %v4714_v40 = vrot.slane %v6181_v55, 1  ;;  %v5276_v7 = vsel %vm2487_vm12, %v8610_v11, %v9189_v37  ;;  %v5223_v6 = vrot.slane %v6228_v3, 1  ;;  %v5278_v55 = vsel %vm2487_vm12, %v8604_v30, %v9158_v31 }
 0x2a2   : > { %v4602_v29 = vpop.permute.xlu0 %4601  ;;  %4345 = vrot.lane.b32.xlu0 %v6148_v38, %s6722_s27  ;;  %v4576_v38 = vsel %vm1076_vm6, %v4571_v39, %v4575_v56  ;;  %v5087_v39 = vrot.slane %v5085_v25, 1 }
 0x2a3   : > { %v5370_v49 = vsel %vm2685_vm3, %v5338_v53, %v4602_v29  ;;  %v5094_v53 = vrot.slane %v5092_v42, 1  ;;  %v5097_v29 = vshll.u32 %v6706_v4, 16 }
 0x2a4   : > { %v5403_v18 = vsel %vm5389_vm4, %v5370_v49, %v4730_v43  ;;  %v9202_v48 = vpop.permute.xlu1 %4335  ;;  %v4711_v43 = vrot.slane %v6180_v8, 1  ;;  %v3756_v49 = vld [vmem:[#allocation3 + $0xcc] sm:$0xe] }
 0x2a5   : > { %v5436_v17 = vsel %vm5422_vm15, %v5403_v18, %v9090_v15  ;;  %4235 = vrot.lane.b32.xlu1 %v4204_v47, %s6725_s9  ;;  %v4716_v18 = vsel %vm1349_vm5, %v4714_v40, %v4715_v34  ;;  %v5099_v47 = vrot.slane %v5097_v29, 1 }
 0x2a6   : > { %v9212_v2 = vpop.permute.xlu0 %4845  ;;  %v5469_v50 = vsel %vm5455_vm10, %v5436_v17, %v5114_v35  ;;  %4617 = vrot.lane.b32.xlu0 %v4576_v38, %s6724_s8  ;;  %v4713_v12 = vsel %vm1349_vm5, %v4711_v43, %v4712_v28  ;;  %v5224_v17 = vrot.slane %v6702_v33, 1  ;;  %v6229_v28 = vcombine.low %v3756_v49, %v9204_v62 }
 0x2a7   : > { %v5502_v15 = vsel %vm5488_vm7, %v5469_v50, %v9118_v59  ;;  %v4587_v59 = vrot.slane %v4585_v54, 1  ;;  %v5308_v38 = vsel %vm2553_vm14, %v5276_v7, %v9128_v19 }
 0x2a8   : > { %6388 = vmatprep.mubr.msk.bf16.mxu1 %vm5564_vm11, %v5502_v15  ;;  %v4844_v46 = vpop.permute.xlu1 %4843  ;;  %v5225_v43 = vsel %vm1349_vm5, %v5223_v6, %v5224_v17  ;;  %v5226_v50 = vrot.slane %v6229_v28, 1  ;;  %v5340_v15 = vsel %vm2619_vm1, %v5308_v38, %v9081_v24 }
 0x2a9   : > { %4347 = vrot.lane.b32.xlu1 %v6149_v41, %s6722_s27  ;;  %v4588_v60 = vsel %vm1076_vm6, %v4583_v16, %v4587_v59  ;;  %v5083_v41 = vor.u32 %v5082_v21, %v5078_v51  ;;  %v5372_v19 = vsel %vm2685_vm3, %v5340_v15, %v9145_v9 }
 0x2aa   : > { %v4334_v35 = vpop.permute.xlu0 %4333  ;;  %4745 = vrot.lane.b32.xlu0 %v4713_v12, %s6728_s16  ;;  %v5228_v52 = vsel %vm1349_vm5, %v5226_v50, %v5227_v57 }
 0x2ab   : > { %v5088_v56 = vsel %vm1076_vm6, %v5083_v41, %v5087_v39 }
 0x2ac   : > { %v9224_v61 = vpop.permute.xlu1 %4735 }
 0x2ad   : > { %4619 = vrot.lane.b32.xlu1 %v4588_v60, %s6724_s8  ;;  %s6255_s8 = sshll.u32 %s9471_s19, 8 }
 0x2ae   : > { %v5246_v1 = vpop.permute.xlu0 %5245  ;;  %4857 = vrot.lane.b32.xlu0 %v6196_v13, %s6727_s15  ;;  %v5095_v13 = vor.u32 %v5094_v53, %v5090_v23 }
 0x2b0   : > { %v4224_v8 = vpop.permute.xlu1 %4223  ;;  %v5100_v37 = vsel %vm1076_vm6, %v5095_v13, %v5099_v47 }
 0x2b1   : > { %4747 = vrot.lane.b32.xlu1 %v4716_v18, %s6728_s16 }
 0x2b2   : > { %v4226_v63 = vpop.permute.xlu0 %4225  ;;  %5129 = vrot.lane.b32.xlu0 %v5088_v56, %s6730_s20 }
 0x2b4   : > { %v4608_v32 = vpop.permute.xlu1 %4607 }
 0x2b5   : > { %4859 = vrot.lane.b32.xlu1 %v6197_v58, %s6727_s15  ;;  %v5405_v58 = vsel %vm5389_vm4, %v5372_v19, %v9112_v20  ;;  %v5310_v20 = vsel %vm2553_vm14, %v5278_v55, %v9135_v26  ;;  %s9352_s15 = scalar_lea.vmem %s9457_s5, %s6255_s8 }
 0x2b6   : > { %v5244_v11 = vpop.permute.xlu0 %5243  ;;  %5257 = vrot.lane.b32.xlu0 %v5225_v43, %s6729_s17  ;;  %v5438_v33 = vsel %vm5422_vm15, %v5405_v58, %v4844_v46  ;;  %v5342_v21 = vsel %vm2619_vm1, %v5310_v20, %v4334_v35 }
 0x2b9   : > { %5131 = vrot.lane.b32.xlu1 %v5100_v37, %s6730_s20  ;;  %v4098_v62 = vpop.permute.xlu1 %4097 }
 0x2bc   : > { %v4734_v54 = vpop.permute.xlu0 %4733 }
 0x2bd   : > { %5259 = vrot.lane.b32.xlu1 %v5228_v52, %s6729_s17 }
 0x2bf   : > { %v5116_v5 = vpop.permute.xlu1 %5115 }
 0x2c0   : > { %v5471_v16 = vsel %vm5455_vm10, %v5438_v33, %v5116_v5  ;;  %v5118_v9 = vpop.permute.xlu0 %5117 }
 0x2c1   : > { %v5504_v24 = vsel %vm5488_vm7, %v5471_v16, %v5244_v11 }
 0x2c2   : > { %6389 = vmatmul.mubr.msk.bf16.gmra.mrb[12].mxu1 %vm5564_vm11, %v5504_v24 }
 0x2c3   : > { %v4096_v12 = vpop.permute.xlu1 %4095 }
 0x2c4   : > { %v4606_v59 = vpop.permute.xlu0 %4605  ;;  %v5280_v35 = vsel %vm2487_vm12, %v8743_v45, %v4096_v12 }
 0x2c5   : > { %v5374_v46 = vsel %vm2685_vm3, %v5342_v21, %v4606_v59  ;;  %v5312_v41 = vsel %vm2553_vm14, %v5280_v35, %v4224_v8 }
 0x2c6   : > { %v5407_v42 = vsel %vm5389_vm4, %v5374_v46, %v4734_v54  ;;  %v5344_v23 = vsel %vm2619_vm1, %v5312_v41, %v9202_v48 }
 0x2c7   : > { %v4340_v4 = vpop.permute.xlu1 %4339  ;;  %v5440_v51 = vsel %vm5422_vm15, %v5407_v42, %v9212_v2  ;;  %v5282_v2 = vsel %vm2487_vm12, %v8750_v10, %v4098_v62  ;;  %v5376_v29 = vsel %vm2685_vm3, %v5344_v23, %v4608_v32 }
 0x2c8   : > { %v4850_v25 = vpop.permute.xlu0 %4849  ;;  %v5473_v30 = vsel %vm5455_vm10, %v5440_v51, %v5118_v9  ;;  %v5314_v53 = vsel %vm2553_vm14, %v5282_v2, %v4226_v63  ;;  %v5409_v8 = vsel %vm5389_vm4, %v5376_v29, %v9224_v61 }
 0x2c9   : > { %v5506_v31 = vsel %vm5488_vm7, %v5473_v30, %v5246_v1 }
 0x2ca   : > { %6392 = vmatprep.mubr.msk.bf16.mxu1 %vm5564_vm11, %v5506_v31 }
 0x2cb   : > { %v4848_v60 = vpop.permute.xlu1 %4847 }
 0x2cc   : > { %v4338_v26 = vpop.permute.xlu0 %4337  ;;  %v5442_v10 = vsel %vm5422_vm15, %v5409_v8, %v4848_v60 }
 0x2cd   : > { %v5346_v39 = vsel %vm2619_vm1, %v5314_v53, %v4338_v26 }
 0x2cf   : > { %v4740_v40 = vpop.permute.xlu1 %4739 }
 0x2d0   : > { %v5248_v34 = vpop.permute.xlu0 %5247 }
 0x2d3   : > { %v4228_v27 = vpop.permute.xlu1 %4227 }
 0x2d4   : > { %v4738_v3 = vpop.permute.xlu0 %4737 }
 0x2d7   : > { %v4612_v1 = vpop.permute.xlu1 %4611 }
 0x2d9   : > { %v4610_v49 = vpop.permute.xlu0 %4609 }
 0x2da   : > { %v5378_v45 = vsel %vm2685_vm3, %v5346_v39, %v4610_v49 }
 0x2db   : > { %v5411_v18 = vsel %vm5389_vm4, %v5378_v45, %v4738_v3 }
 0x2dc   : > { %v5444_v63 = vsel %vm5422_vm15, %v5411_v18, %v4850_v25 }
 0x2de   : > { %v5120_v7 = vpop.permute.xlu1 %5119 }
 0x2df   : > { %v5475_v48 = vsel %vm5455_vm10, %v5442_v10, %v5120_v7 }
 0x2e0   : > { %v5122_v56 = vpop.permute.xlu0 %5121  ;;  %v5508_v6 = vsel %vm5488_vm7, %v5475_v48, %v5248_v34 }
 0x2e1   : > { %6393 = vmatmul.mubr.msk.bf16.gmra.mrb[16].mxu1 %vm5564_vm11, %v5508_v6  ;;  %v5477_v17 = vsel %vm5455_vm10, %v5444_v63, %v5122_v56 }
 0x2e2   : > { %v4100_v13 = vpop.permute.xlu1 %4099 }
 0x2e3   : > { %v5284_v61 = vsel %vm2487_vm12, %v8894_v36, %v4100_v13 }
 0x2e4   : > { %v5250_v47 = vpop.permute.xlu0 %5249  ;;  %v5316_v32 = vsel %vm2553_vm14, %v5284_v61, %v4228_v27 }
 0x2e5   : > { %v5510_v28 = vsel %vm5488_vm7, %v5477_v17, %v5250_v47  ;;  %v5348_v11 = vsel %vm2619_vm1, %v5316_v32, %v4340_v4 }
 0x2e6   : > { %6396 = vmatprep.mubr.msk.bf16.mxu1 %vm5564_vm11, %v5510_v28  ;;  %v5380_v37 = vsel %vm2685_vm3, %v5348_v11, %v4612_v1 }
 0x2e7   : > { %v4102_v38 = vpop.permute.xlu1 %4101  ;;  %v5413_v15 = vsel %vm5389_vm4, %v5380_v37, %v4740_v40 }
 0x2e8   : > { %v5252_v43 = vpop.permute.xlu0 %5251  ;;  %v5286_v12 = vsel %vm2487_vm12, %v8984_v44, %v4102_v38 }
 0x2eb   : > { %v4852_v50 = vpop.permute.xlu1 %4851 }
 0x2ec   : > { %v4230_v57 = vpop.permute.xlu0 %4229  ;;  %v5446_v62 = vsel %vm5422_vm15, %v5413_v15, %v4852_v50 }
 0x2ed   : > { %v5318_v20 = vsel %vm2553_vm14, %v5286_v12, %v4230_v57 }
 0x2ef   : > { %v5124_v19 = vpop.permute.xlu1 %5123 }
 0x2f0   : > { %v5479_v36 = vsel %vm5455_vm10, %v5446_v62, %v5124_v19  ;;  %v4342_v58 = vpop.permute.xlu0 %4341  ;;  %v9342_v62 = vld [vmem:[%s9456_s4] ss:$0 sm:$0xff] }
 0x2f1   : > { %v5512_v52 = vsel %vm5488_vm7, %v5479_v36, %v5252_v43  ;;  %v5350_v59 = vsel %vm2619_vm1, %v5318_v20, %v4342_v58 }
 0x2f2   : > { %6397 = vmatmul.mubr.msk.bf16.gmra.mrb[20].mxu1 %vm5564_vm11, %v5512_v52 }
 0x2f3   : > { %v4104_v54 = vpop.permute.xlu1 %4103 }
 0x2f4   : > { %v5288_v42 = vsel %vm2487_vm12, %v9016_v14, %v4104_v54 }
 0x2f7   : > { %v4232_v33 = vpop.permute.xlu1 %4231 }
 0x2f8   : > { %v4614_v5 = vpop.permute.xlu0 %4613  ;;  %v5320_v25 = vsel %vm2553_vm14, %v5288_v42, %v4232_v33 }
 0x2f9   : > { %v5382_v4 = vsel %vm2685_vm3, %v5350_v59, %v4614_v5 }
 0x2fb   : > { %v4344_v16 = vpop.permute.xlu1 %4343 }
 0x2fc   : > { %v4742_v24 = vpop.permute.xlu0 %4741  ;;  %v5352_v44 = vsel %vm2619_vm1, %v5320_v25, %v4344_v16 }
 0x2fd   : > { %v5415_v51 = vsel %vm5389_vm4, %v5382_v4, %v4742_v24 }
 0x2ff   : > { %v4616_v55 = vpop.permute.xlu1 %4615 }
 0x300   : > { %v4854_v9 = vpop.permute.xlu0 %4853  ;;  %v5384_v40 = vsel %vm2685_vm3, %v5352_v44, %v4616_v55 }
 0x301   : > { %v5448_v30 = vsel %vm5422_vm15, %v5415_v51, %v4854_v9 }
 0x303   : > { %v4744_v21 = vpop.permute.xlu1 %4743 }
 0x304   : > { %v5126_v46 = vpop.permute.xlu0 %5125  ;;  %v5417_v34 = vsel %vm5389_vm4, %v5384_v40, %v4744_v21 }
 0x305   : > { %v5481_v60 = vsel %vm5455_vm10, %v5448_v30, %v5126_v46 }
 0x307   : > { %v4856_v31 = vpop.permute.xlu1 %4855 }
 0x308   : > { %v5254_v26 = vpop.permute.xlu0 %5253  ;;  %v5450_v14 = vsel %vm5422_vm15, %v5417_v34, %v4856_v31 }
 0x309   : > { %v5514_v35 = vsel %vm5488_vm7, %v5481_v60, %v5254_v26 }
 0x30a   : > { %6400 = vmatprep.mubr.msk.bf16.mxu1 %vm5564_vm11, %v5514_v35 }
 0x30b   : > { %v5128_v27 = vpop.permute.xlu1 %5127 }
 0x30c   : > { %v5256_v41 = vpop.permute.xlu0 %5255  ;;  %v5483_v2 = vsel %vm5455_vm10, %v5450_v14, %v5128_v27 }
 0x30d   : > { %v5516_v3 = vsel %vm5488_vm7, %v5483_v2, %v5256_v41 }
 0x30e   : > { %6401 = vmatmul.mubr.msk.bf16.gmra.mrb[24].mxu1 %vm5564_vm11, %v5516_v3 }
 0x30f   : > { %v4106_v23 = vpop.permute.xlu1 %4105 }
 0x310   : > { %v4234_v1 = vpop.permute.xlu0 %4233  ;;  %v5290_v18 = vsel %vm2487_vm12, %v9122_v0, %v4106_v23 }
 0x311   : > { %v5322_v48 = vsel %vm2553_vm14, %v5290_v18, %v4234_v1 }
 0x313   : > { %v4108_v53 = vpop.permute.xlu1 %4107 }
 0x314   : > { %v4346_v29 = vpop.permute.xlu0 %4345  ;;  %v5292_v0 = vsel %vm2487_vm12, %v9138_v22, %v4108_v53 }
 0x315   : > { %v5354_v63 = vsel %vm2619_vm1, %v5322_v48, %v4346_v29 }
 0x317   : > { %v4236_v39 = vpop.permute.xlu1 %4235 }
 0x318   : > { %v4618_v49 = vpop.permute.xlu0 %4617  ;;  %v5324_v43 = vsel %vm2553_vm14, %v5292_v0, %v4236_v39 }
 0x319   : > { %v5386_v17 = vsel %vm2685_vm3, %v5354_v63, %v4618_v49 }
 0x31b   : > { %v4348_v45 = vpop.permute.xlu1 %4347 }
 0x31c   : > { %v4746_v8 = vpop.permute.xlu0 %4745  ;;  %v5356_v11 = vsel %vm2619_vm1, %v5324_v43, %v4348_v45 }
 0x31d   : > { %v5419_v13 = vsel %vm5389_vm4, %v5386_v17, %v4746_v8 }
 0x31f   : > { %v4620_v10 = vpop.permute.xlu1 %4619 }
 0x320   : > { %v4858_v7 = vpop.permute.xlu0 %4857  ;;  %v5388_v50 = vsel %vm2685_vm3, %v5356_v11, %v4620_v10 }
 0x321   : > { %v5452_v47 = vsel %vm5422_vm15, %v5419_v13, %v4858_v7 }
 0x323   : > { %v4748_v56 = vpop.permute.xlu1 %4747 }
 0x324   : > { %v5130_v6 = vpop.permute.xlu0 %5129  ;;  %v5421_v57 = vsel %vm5389_vm4, %v5388_v50, %v4748_v56 }
 0x325   : > { %v5485_v28 = vsel %vm5455_vm10, %v5452_v47, %v5130_v6 }
 0x327   : > { %v4860_v61 = vpop.permute.xlu1 %4859 }
 0x328   : > { %v5258_v32 = vpop.permute.xlu0 %5257  ;;  %v5454_v15 = vsel %vm5422_vm15, %v5421_v57, %v4860_v61 }
 0x329   : > { %v5518_v38 = vsel %vm5488_vm7, %v5485_v28, %v5258_v32 }
 0x32a   : > { %6404 = vmatprep.mubr.msk.bf16.mxu1 %vm5564_vm11, %v5518_v38 }
 0x32b   : > { %v5132_v37 = vpop.permute.xlu1 %5131 }
 0x32c   : > { %v5487_v22 = vsel %vm5455_vm10, %v5454_v15, %v5132_v37 }
 0x32f   : > { %v5260_v19 = vpop.permute.xlu1 %5259 }
 0x330   : > { %v5520_v36 = vsel %vm5488_vm7, %v5487_v22, %v5260_v19 }
 0x331   : > { %v6378_v52 = vpop.f32.mrb[0].mxu1  ;;  %6405 = vmatmul.mubr.msk.bf16.gmra.mrb[28].mxu1 %vm5564_vm11, %v5520_v36 }
 0x332   : > { %v5644_v54 = vadd.f32 %v6378_v52, %v9342_v62  ;;  %v5635_v58 = vpop.f32.mrb[1].mxu1 }
 0x333   : > { %v5636_v33 = vadd.f32 %v9342_v62, %v5635_v58  ;;  %v6379_v5 = vpop.f32.mrb[2].mxu1 }
 0x334   : > { %v5764_v16 = vmax.f32 %v5644_v54, 0.0  ;;  %v5647_v24 = vadd.f32 %v6379_v5, %v9342_v62  ;;  %v5638_v55 = vpop.f32.mrb[3].mxu1 }
 0x335   : > { %v5762_v9 = vmax.f32 %v5636_v33, 0.0  ;;  %v5639_v12 = vadd.f32 %v9342_v62, %v5638_v55 }
 0x336   : > { %5796 = vst.msk [vmem:[%s9352_s15 + $0x10] sm:$0xff] %vm2487_vm12, %v5764_v16  ;;  %v5765_v20 = vmax.f32 %v5647_v24, 0.0 }
 0x337   : > { %5794 = vst.msk [vmem:[%s9352_s15] sm:$0xff] %vm2487_vm12, %v5762_v9  ;;  %v5763_v21 = vmax.f32 %v5639_v12, 0.0 }
 0x338   : > { %5797 = vst.msk [vmem:[%s9352_s15 + $0x18] sm:$0xff] %vm2487_vm12, %v5765_v20 }
 0x339   : > { %5795 = vst.msk [vmem:[%s9352_s15 + $0x8] sm:$0xff] %vm2487_vm12, %v5763_v21 }
 0x351   : > { %v6382_v59 = vpop.f32.mrb[4].mxu1 }
 0x352   : > { %v5660_v46 = vadd.f32 %v6382_v59, %v9342_v62  ;;  %v5651_v4 = vpop.f32.mrb[5].mxu1 }
 0x353   : > { %v5652_v42 = vadd.f32 %v9342_v62, %v5651_v4  ;;  %v6383_v51 = vpop.f32.mrb[6].mxu1 }
 0x354   : > { %v5768_v25 = vmax.f32 %v5660_v46, 0.0  ;;  %v5663_v30 = vadd.f32 %v6383_v51, %v9342_v62  ;;  %v5654_v31 = vpop.f32.mrb[7].mxu1 }
 0x355   : > { %v5766_v44 = vmax.f32 %v5652_v42, 0.0  ;;  %v5655_v60 = vadd.f32 %v9342_v62, %v5654_v31 }
 0x356   : > { %5800 = vst.msk [vmem:[%s9352_s15 + $0x30] sm:$0xff] %vm2487_vm12, %v5768_v25  ;;  %v5769_v26 = vmax.f32 %v5663_v30, 0.0 }
 0x357   : > { %5798 = vst.msk [vmem:[%s9352_s15 + $0x20] sm:$0xff] %vm2487_vm12, %v5766_v44  ;;  %v5767_v40 = vmax.f32 %v5655_v60, 0.0 }
 0x358   : > { %5801 = vst.msk [vmem:[%s9352_s15 + $0x38] sm:$0xff] %vm2487_vm12, %v5769_v26 }
 0x359   : > { %5799 = vst.msk [vmem:[%s9352_s15 + $0x28] sm:$0xff] %vm2487_vm12, %v5767_v40 }
 0x371   : > { %v6386_v35 = vpop.f32.mrb[8].mxu1 }
 0x372   : > { %v5676_v34 = vadd.f32 %v6386_v35, %v9342_v62  ;;  %v5667_v14 = vpop.f32.mrb[9].mxu1 }
 0x373   : > { %v5668_v27 = vadd.f32 %v9342_v62, %v5667_v14  ;;  %v6387_v41 = vpop.f32.mrb[10].mxu1 }
 0x374   : > { %v5772_v2 = vmax.f32 %v5676_v34, 0.0  ;;  %v5679_v3 = vadd.f32 %v6387_v41, %v9342_v62  ;;  %v5670_v23 = vpop.f32.mrb[11].mxu1 }
 0x375   : > { %v5770_v1 = vmax.f32 %v5668_v27, 0.0  ;;  %v5671_v53 = vadd.f32 %v9342_v62, %v5670_v23 }
 0x376   : > { %5804 = vst.msk [vmem:[%s9352_s15 + $0x50] sm:$0xff] %vm2487_vm12, %v5772_v2  ;;  %v5773_v29 = vmax.f32 %v5679_v3, 0.0 }
 0x377   : > { %5802 = vst.msk [vmem:[%s9352_s15 + $0x40] sm:$0xff] %vm2487_vm12, %v5770_v1  ;;  %v5771_v39 = vmax.f32 %v5671_v53, 0.0 }
 0x378   : > { %5805 = vst.msk [vmem:[%s9352_s15 + $0x58] sm:$0xff] %vm2487_vm12, %v5773_v29 }
 0x379   : > { %5803 = vst.msk [vmem:[%s9352_s15 + $0x48] sm:$0xff] %vm2487_vm12, %v5771_v39 }
 0x395   : > { %v6390_v49 = vpop.f32.mrb[12].mxu1 }
 0x396   : > { %v5692_v45 = vadd.f32 %v6390_v49, %v9342_v62  ;;  %v5683_v8 = vpop.f32.mrb[13].mxu1 }
 0x397   : > { %v5684_v18 = vadd.f32 %v9342_v62, %v5683_v8  ;;  %v6391_v10 = vpop.f32.mrb[14].mxu1 }
 0x398   : > { %v5776_v7 = vmax.f32 %v5692_v45, 0.0  ;;  %v5695_v48 = vadd.f32 %v6391_v10, %v9342_v62  ;;  %v5686_v56 = vpop.f32.mrb[15].mxu1 }
 0x399   : > { %v5774_v63 = vmax.f32 %v5684_v18, 0.0  ;;  %v5687_v6 = vadd.f32 %v9342_v62, %v5686_v56 }
 0x39a   : > { %5808 = vst.msk [vmem:[%s9352_s15 + $0x70] sm:$0xff] %vm2487_vm12, %v5776_v7  ;;  %v5777_v17 = vmax.f32 %v5695_v48, 0.0 }
 0x39b   : > { %5806 = vst.msk [vmem:[%s9352_s15 + $0x60] sm:$0xff] %vm2487_vm12, %v5774_v63  ;;  %v5775_v13 = vmax.f32 %v5687_v6, 0.0 }
 0x39c   : > { %5809 = vst.msk [vmem:[%s9352_s15 + $0x78] sm:$0xff] %vm2487_vm12, %v5777_v17 }
 0x39d   : > { %5807 = vst.msk [vmem:[%s9352_s15 + $0x68] sm:$0xff] %vm2487_vm12, %v5775_v13 }
 0x3b4   : > { %v6394_v47 = vpop.f32.mrb[16].mxu1 }
 0x3b5   : > { %v5708_v61 = vadd.f32 %v6394_v47, %v9342_v62  ;;  %v5699_v28 = vpop.f32.mrb[17].mxu1 }
 0x3b6   : > { %v5700_v32 = vadd.f32 %v9342_v62, %v5699_v28  ;;  %v6395_v0 = vpop.f32.mrb[18].mxu1 }
 0x3b7   : > { %v5780_v38 = vmax.f32 %v5708_v61, 0.0  ;;  %v5711_v43 = vadd.f32 %v6395_v0, %v9342_v62  ;;  %v5702_v11 = vpop.f32.mrb[19].mxu1 }
 0x3b8   : > { %v5778_v37 = vmax.f32 %v5700_v32, 0.0  ;;  %v5703_v50 = vadd.f32 %v9342_v62, %v5702_v11 }
 0x3b9   : > { %5812 = vst.msk [vmem:[%s9352_s15 + $0x90] sm:$0xff] %vm2487_vm12, %v5780_v38  ;;  %v5781_v57 = vmax.f32 %v5711_v43, 0.0 }
 0x3ba   : > { %5810 = vst.msk [vmem:[%s9352_s15 + $0x80] sm:$0xff] %vm2487_vm12, %v5778_v37  ;;  %v5779_v15 = vmax.f32 %v5703_v50, 0.0 }
 0x3bb   : > { %5813 = vst.msk [vmem:[%s9352_s15 + $0x98] sm:$0xff] %vm2487_vm12, %v5781_v57 }
 0x3bc   : > { %5811 = vst.msk [vmem:[%s9352_s15 + $0x88] sm:$0xff] %vm2487_vm12, %v5779_v15 }
 0x3c5   : > { %v6398_v22 = vpop.f32.mrb[20].mxu1 }
 0x3c6   : > { %v5724_v19 = vadd.f32 %v6398_v22, %v9342_v62  ;;  %v5715_v36 = vpop.f32.mrb[21].mxu1 }
 0x3c7   : > { %v5716_v52 = vadd.f32 %v9342_v62, %v5715_v36  ;;  %v6399_v54 = vpop.f32.mrb[22].mxu1 }
 0x3c8   : > { %v5784_v58 = vmax.f32 %v5724_v19, 0.0  ;;  %v5727_v33 = vadd.f32 %v6399_v54, %v9342_v62  ;;  %v5718_v5 = vpop.f32.mrb[23].mxu1 }
 0x3c9   : > { %v5782_v16 = vmax.f32 %v5716_v52, 0.0  ;;  %v5719_v24 = vadd.f32 %v9342_v62, %v5718_v5 }
 0x3ca   : > { %5816 = vst.msk [vmem:[%s9352_s15 + $0xb0] sm:$0xff] %vm2487_vm12, %v5784_v58  ;;  %v5785_v55 = vmax.f32 %v5727_v33, 0.0 }
 0x3cb   : > { %5814 = vst.msk [vmem:[%s9352_s15 + $0xa0] sm:$0xff] %vm2487_vm12, %v5782_v16  ;;  %v5783_v9 = vmax.f32 %v5719_v24, 0.0 }
 0x3cc   : > { %5817 = vst.msk [vmem:[%s9352_s15 + $0xb8] sm:$0xff] %vm2487_vm12, %v5785_v55 }
 0x3cd   : > { %5815 = vst.msk [vmem:[%s9352_s15 + $0xa8] sm:$0xff] %vm2487_vm12, %v5783_v9 }
 0x3e1   : > { %v6402_v12 = vpop.f32.mrb[24].mxu1 }
 0x3e2   : > { %v5740_v20 = vadd.f32 %v6402_v12, %v9342_v62  ;;  %v5731_v21 = vpop.f32.mrb[25].mxu1 }
 0x3e3   : > { %v5732_v59 = vadd.f32 %v9342_v62, %v5731_v21  ;;  %v6403_v46 = vpop.f32.mrb[26].mxu1 }
 0x3e4   : > { %v5788_v4 = vmax.f32 %v5740_v20, 0.0  ;;  %v5743_v42 = vadd.f32 %v6403_v46, %v9342_v62  ;;  %v5734_v51 = vpop.f32.mrb[27].mxu1 }
 0x3e5   : > { %v5786_v25 = vmax.f32 %v5732_v59, 0.0  ;;  %v5735_v30 = vadd.f32 %v9342_v62, %v5734_v51 }
 0x3e6   : > { %5820 = vst.msk [vmem:[%s9352_s15 + $0xd0] sm:$0xff] %vm2487_vm12, %v5788_v4  ;;  %v5789_v31 = vmax.f32 %v5743_v42, 0.0 }
 0x3e7   : > { %5818 = vst.msk [vmem:[%s9352_s15 + $0xc0] sm:$0xff] %vm2487_vm12, %v5786_v25  ;;  %v5787_v44 = vmax.f32 %v5735_v30, 0.0 }
 0x3e8   : > { %5821 = vst.msk [vmem:[%s9352_s15 + $0xd8] sm:$0xff] %vm2487_vm12, %v5789_v31 }
 0x3e9   : > { %5819 = vst.msk [vmem:[%s9352_s15 + $0xc8] sm:$0xff] %vm2487_vm12, %v5787_v44 }
 0x404   : > { %v6406_v60 = vpop.f32.mrb[28].mxu1 }
 0x405   : > { %v5756_v26 = vadd.f32 %v6406_v60, %v9342_v62  ;;  %v5747_v40 = vpop.f32.mrb[29].mxu1 }
 0x406   : > { %v5748_v35 = vadd.f32 %v9342_v62, %v5747_v40  ;;  %v6407_v34 = vpop.f32.mrb[30].mxu1 }
 0x407   : > { %v5792_v14 = vmax.f32 %v5756_v26, 0.0  ;;  %v5759_v27 = vadd.f32 %v6407_v34, %v9342_v62  ;;  %v5750_v41 = vpop.f32.mrb[31].mxu1 }
 0x408   : > { %v5790_v2 = vmax.f32 %v5748_v35, 0.0  ;;  %v5751_v3 = vadd.f32 %v9342_v62, %v5750_v41 }
 0x409   : > { %5824 = vst.msk [vmem:[%s9352_s15 + $0xf0] sm:$0xff] %vm2487_vm12, %v5792_v14  ;;  %v5793_v23 = vmax.f32 %v5759_v27, 0.0 }
 0x40a   : > { %5822 = vst.msk [vmem:[%s9352_s15 + $0xe0] sm:$0xff] %vm2487_vm12, %v5790_v2  ;;  %v5791_v1 = vmax.f32 %v5751_v3, 0.0 }
 0x40b   : > { %5825 = vst.msk [vmem:[%s9352_s15 + $0xf8] sm:$0xff] %vm2487_vm12, %v5793_v23 }
 0x40c   : > { %5823 = vst.msk [vmem:[%s9352_s15 + $0xe8] sm:$0xff] %vm2487_vm12, %v5791_v1 }
 0x40d PF: > { %s15_s18 = sadd.s32 1, %s6716_s18  }
 0x40e   : > { %p12_p4 = scmp.ge.s32.totalorder %s15_s18, 4  }
 0x410   :  { %14 = sbr.rel (!%p12_p4) target bundleno = 1 (0x1), region = 74 }

</bundles_post_ra>
